<compile_context>
chip_gen: v7x
topology: tpu7x:2x2x1
jax: 0.10.0
libtpu: 0.0.40
codegen_flags: <defaults>
</compile_context>

<pallas_src>
import functools
import math

import jax
import jax.numpy as jnp
from jax.experimental import pallas as pl
from jax.experimental.pallas import tpu as pltpu


def edge_pool_kernel(z_ref, r_ref, h_ref, w1a_ref, w1b_ref, b1_ref, w2at_ref,
                     o_ref, *, rc):
    B, ma, nfs = h_ref.shape
    hidden = b1_ref.shape[1]
    nout, haug = w2at_ref.shape            # haug == hidden + 1 (bias channel)
    mm = ma * ma

    r2 = r_ref[...]                        # (B, ma, 3)
    h2 = h_ref[...]                        # (B, ma, nfs)
    zf = z_ref[...][:, :, 0]               # (B, ma) float atomic numbers, -1 == pad

    # ---- pairwise geometry / masks, kept 2-D (ma, ma) per molecule ----------
    rx, ry, rz = r2[:, :, 0], r2[:, :, 1], r2[:, :, 2]            # (B, ma)
    # TODO(synk): alt_distance_vectors / distance are not shown in the source;
    #             assumed dv[i, j] = r_i - r_j and Euclidean norm.
    dxp = rx[:, :, None] - rx[:, None, :]                         # (B, ma, ma)
    dyp = ry[:, :, None] - ry[:, None, :]
    dzp = rz[:, :, None] - rz[:, None, :]
    d = jnp.sqrt(dxp * dxp + dyp * dyp + dzp * dzp)               # (B, ma, ma)

    rows = jax.lax.broadcasted_iota(jnp.int32, (ma, ma), 0)
    cols = jax.lax.broadcasted_iota(jnp.int32, (ma, ma), 1)
    eye = (rows == cols).astype(jnp.float32)                      # (ma, ma)

    # cosine cutoff minus identity: 0.5*(cos(pi*min(d, rc)/rc) + 1) - I
    cf = 0.5 * (jnp.cos((jnp.pi / rc) * jnp.minimum(d, rc)) + 1.0) - eye

    # pair validity (z > -1) minus identity.  NOTE: on the diagonal of padded
    # atoms mask = -1 (not 0), exactly as in the PyTorch reference; this is
    # harmless because dv (and hence the final output) is 0 on the diagonal.
    valid = (zf > -1.0).astype(jnp.float32)                       # (B, ma)
    mask = valid[:, :, None] * valid[:, None, :] - eye            # (B, ma, ma)

    cfm = cf * mask                                               # (B, ma, ma)
    inv_d = pl.reciprocal(jnp.maximum(d, 1e-4), approx=True)      # EUP, (B, ma, ma)
    base = mask * inv_d                                           # (B, ma, ma)

    # ---- layer 1 with cfm hoisted out of the matmul --------------------------
    #   e @ W1 = cfm * ((h @ W1a)_i + (h @ W1b)_j)
    hflat = h2.reshape(B * ma, nfs)                               # leading-dim merge
    hw_a = jnp.dot(hflat, w1a_ref[...],
                   preferred_element_type=jnp.float32).reshape(B, ma, hidden)
    hw_b = jnp.dot(hflat, w1b_ref[...],
                   preferred_element_type=jnp.float32).reshape(B, ma, hidden)
    pre = (cfm[..., None] * (hw_a[:, :, None, :] + hw_b[:, None, :, :])
           + b1_ref[...])                                         # (B, ma, ma, hidden)
    act = jnp.tanh(pre)

    # ---- layer 2 + mask/unit-vector scaling, emitted lane-dense --------------
    # For each Cartesian component the per-pair scale s = mask * dv_c / d is
    # folded into the matmul operand (and b2 rides along as a constant
    # channel), so the batched dot directly yields (B, nout, ma*ma) with the
    # pair axis on lanes (lane width 256 -> unmasked stores).
    w2b = jnp.broadcast_to(w2at_ref[...][None], (B, nout, haug))  # hoisted once

    def component(dcomp):
        s = (base * dcomp)[..., None]                             # (B, ma, ma, 1)
        aug = jnp.concatenate([act * s, s], axis=-1)              # (B, ma, ma, hidden+1)
        aug = aug.reshape(B, mm, haug)                            # leading-dim merge only
        return jax.lax.dot_general(
            w2b, aug,
            dimension_numbers=(((2,), (2,)), ((0,), (0,))),
            preferred_element_type=jnp.float32)                   # (B, nout, ma*ma)

    o_ref[...] = jnp.concatenate(
        [component(dxp), component(dyp), component(dzp)], axis=1)  # (B, 3*nout, ma*ma)


def edge_pool(z, r, h, params, rc, block_b=8):
    """Pallas implementation of EdgePool.forward((z, r, h)) -> (z, r, c)."""
    n, ma = z.shape
    nfs = h.shape[2]
    w1, b1, w2, b2 = params
    hidden = w1.shape[1]
    nout = w2.shape[1]
    mm = ma * ma

    # Molecules per grid step.  Keep >= 2 grid steps so both v7x TensorCores
    # get work; for large ma/hidden cap block_b so the per-step activations
    # (~ B*ma*ma*hidden*4 bytes plus double-buffered blocks) stay well inside
    # the scoped VMEM limit (16 MiB v5e / 32 MiB v6e / 32-of-64 MiB v7x).
    B = max(1, min(block_b, (n + 1) // 2))
    n_pad = ((n + B - 1) // B) * B
    if n_pad != n:
        pad = n_pad - n
        z_p = jnp.concatenate([z, jnp.full((pad, ma), -1, z.dtype)], axis=0)
        r_p = jnp.concatenate([r, jnp.zeros((pad, ma, 3), r.dtype)], axis=0)
        h_p = jnp.concatenate([h, jnp.zeros((pad, ma, nfs), h.dtype)], axis=0)
    else:
        z_p, r_p, h_p = z, r, h

    z_col = z_p.astype(jnp.float32).reshape(n_pad, ma, 1)
    r_p = r_p.astype(jnp.float32)
    h_p = h_p.astype(jnp.float32)
    w1a = w1[:nfs]                          # acts on the h_i half of the concat
    w1b = w1[nfs:]                          # acts on the h_j half
    # layer-2 weight with the bias appended as a constant channel, transposed
    # so the kernel's batched dot directly emits (nout, pair) tiles.
    w2at = jnp.concatenate([w2, b2.reshape(1, nout)], axis=0).T   # (nout, hidden+1)

    kernel = functools.partial(edge_pool_kernel, rc=float(rc))
    slab = pl.pallas_call(
        kernel,
        out_shape=jax.ShapeDtypeStruct((n_pad, 3 * nout, mm), jnp.float32),
        grid=(n_pad // B,),
        in_specs=[
            pl.BlockSpec((B, ma, 1), lambda t: (t, 0, 0)),        # z (column form)
            pl.BlockSpec((B, ma, 3), lambda t: (t, 0, 0)),        # r
            pl.BlockSpec((B, ma, nfs), lambda t: (t, 0, 0)),      # h
            pl.BlockSpec((nfs, hidden), lambda t: (0, 0)),        # W1 (h_i half)
            pl.BlockSpec((nfs, hidden), lambda t: (0, 0)),        # W1 (h_j half)
            pl.BlockSpec((1, hidden), lambda t: (0, 0)),          # b1
            pl.BlockSpec((nout, hidden + 1), lambda t: (0, 0)),   # [W2; b2]^T
        ],
        out_specs=pl.BlockSpec((B, 3 * nout, mm), lambda t: (t, 0, 0)),
        compiler_params=pltpu.CompilerParams(
            dimension_semantics=("parallel",)),
    )(z_col, r_p, h_p, w1a, w1b, b1, w2at)

    # (n, 3, nout, ma, ma) -> PyTorch layout (n, ma, ma, nout, 3)
    c = slab[:n].reshape(n, 3, nout, ma, ma).transpose(0, 3, 4, 2, 1)
    return z, r, c


def edge_pool_ref(z, r, h, params, rc):
    """Pure-JAX reference mirroring the PyTorch forward exactly."""
    w1, b1, w2, b2 = params
    n, ma = z.shape
    nfs = h.shape[2]
    dv = r[:, :, None, :] - r[:, None, :, :]                       # (n,ma,ma,3)
    d = jnp.sqrt(jnp.sum(dv * dv, axis=-1))                        # (n,ma,ma)
    eye = jnp.eye(ma, dtype=jnp.float32)[None]
    cf = 0.5 * (jnp.cos(jnp.pi * jnp.minimum(d, rc) / rc) + 1.0)
    cf = (cf - eye)[..., None]
    m = (z > -1).astype(jnp.float32)
    mask = (m[:, None, :] * m[:, :, None] - eye)[..., None]
    cfm = cf * mask
    u1 = jnp.broadcast_to(h[:, :, None, :], (n, ma, ma, nfs))
    u2 = jnp.broadcast_to(h[:, None, :, :], (n, ma, ma, nfs))
    u = jnp.concatenate([u1, u2], axis=-1)
    e = cfm * u
    hid = jnp.tanh(jnp.matmul(e, w1, precision=jax.lax.Precision.HIGHEST) + b1)
    c = jnp.matmul(hid, w2, precision=jax.lax.Precision.HIGHEST) + b2
    c = c * mask
    dvu = dv / jnp.maximum(d, 1e-4)[..., None]
    return c[..., None] * dvu[:, :, :, None, :]                    # (n,ma,ma,nout,3)


if __name__ == "__main__":
    n, ma, nfs, hidden, nout = 4, 16, 8, 32, 4
    rc = 3.0

    key = jax.random.PRNGKey(0)
    kz, kr, kh, kw1, kb1, kw2, kb2 = jax.random.split(key, 7)
    z = jax.random.randint(kz, (n, ma), -1, 9, dtype=jnp.int32)     # -1 = padding
    r = jax.random.normal(kr, (n, ma, 3), jnp.float32) * 2.0
    h = jax.random.normal(kh, (n, ma, nfs), jnp.float32)

    # deterministic synthetic parameters for `self.net`
    w1 = jax.random.normal(kw1, (2 * nfs, hidden), jnp.float32) / math.sqrt(2 * nfs)
    b1 = jax.random.normal(kb1, (1, hidden), jnp.float32) * 0.1
    w2 = jax.random.normal(kw2, (hidden, nout), jnp.float32) / math.sqrt(hidden)
    b2 = jax.random.normal(kb2, (1, nout), jnp.float32) * 0.1
    params = (w1, b1, w2, b2)

    z_out, r_out, c = edge_pool(z, r, h, params, rc)
    c = jax.block_until_ready(c)

    c_ref = edge_pool_ref(z, r, h, params, rc)
    # tolerance: in-kernel matmuls use default MXU precision and dv/d uses the
    # EUP approximate reciprocal, vs. a HIGHEST-precision f32 reference.
    if not bool(jnp.allclose(c, c_ref, atol=3e-3, rtol=3e-3)):
        max_err = float(jnp.max(jnp.abs(c - c_ref)))
        raise AssertionError(f"Pallas kernel mismatch vs reference, max abs err = {max_err}")

    print("KERNEL_OK")
</pallas_src>

<mosaic_0001>
module attributes {stable_mosaic.version = 11 : i64} {
  func.func @edge_pool_kernel(%arg0: i32, %arg1: memref<2x16x1xf32, #tpu.memory_space<vmem>>, %arg2: memref<2x16x3xf32, #tpu.memory_space<vmem>>, %arg3: memref<2x16x8xf32, #tpu.memory_space<vmem>>, %arg4: memref<8x32xf32, #tpu.memory_space<vmem>>, %arg5: memref<8x32xf32, #tpu.memory_space<vmem>>, %arg6: memref<1x32xf32, #tpu.memory_space<vmem>>, %arg7: memref<4x33xf32, #tpu.memory_space<vmem>>, %arg8: memref<2x12x256xf32, #tpu.memory_space<vmem>>) attributes {dimension_semantics = [#tpu.dimension_semantics<parallel>], iteration_bounds = array<i64: 2>, scalar_prefetch = 0 : i64, scratch_operands = 0 : i64, tpu.core_type = #tpu.core_type<tc>, window_params = [{transform_indices = @transform_0, window_bounds = array<i64: 2, 16, 1>}, {transform_indices = @transform_1, window_bounds = array<i64: 2, 16, 3>}, {transform_indices = @transform_2, window_bounds = array<i64: 2, 16, 8>}, {pipeline_mode = #tpu.pipeline_mode<synchronous>, transform_indices = @transform_3, window_bounds = array<i64: 8, 32>}, {pipeline_mode = #tpu.pipeline_mode<synchronous>, transform_indices = @transform_4, window_bounds = array<i64: 8, 32>}, {pipeline_mode = #tpu.pipeline_mode<synchronous>, transform_indices = @transform_5, window_bounds = array<i64: 1, 32>}, {pipeline_mode = #tpu.pipeline_mode<synchronous>, transform_indices = @transform_6, window_bounds = array<i64: 4, 33>}, {transform_indices = @transform_7, window_bounds = array<i64: 2, 12, 256>}]} {
    %c0 = arith.constant 0 : index
    %c0_0 = arith.constant 0 : index
    %c0_1 = arith.constant 0 : index
    %0 = vector.load %arg2[%c0, %c0_0, %c0_1] : memref<2x16x3xf32, #tpu.memory_space<vmem>>, vector<2x16x3xf32>
    %c0_2 = arith.constant 0 : index
    %c0_3 = arith.constant 0 : index
    %c0_4 = arith.constant 0 : index
    %1 = vector.load %arg3[%c0_2, %c0_3, %c0_4] : memref<2x16x8xf32, #tpu.memory_space<vmem>>, vector<2x16x8xf32>
    %c0_5 = arith.constant 0 : index
    %c0_6 = arith.constant 0 : index
    %c0_7 = arith.constant 0 : index
    %2 = vector.load %arg1[%c0_5, %c0_6, %c0_7] : memref<2x16x1xf32, #tpu.memory_space<vmem>>, vector<2x16x1xf32>
    %3 = vector.shape_cast %2 : vector<2x16x1xf32> to vector<2x16xf32>
    %4 = vector.extract_strided_slice %0 {offsets = [0, 0, 0], sizes = [2, 16, 1], strides = [1, 1, 1]} : vector<2x16x3xf32> to vector<2x16x1xf32>
    %5 = vector.shape_cast %4 : vector<2x16x1xf32> to vector<2x16xf32>
    %6 = vector.extract_strided_slice %0 {offsets = [0, 0, 1], sizes = [2, 16, 1], strides = [1, 1, 1]} : vector<2x16x3xf32> to vector<2x16x1xf32>
    %7 = vector.shape_cast %6 : vector<2x16x1xf32> to vector<2x16xf32>
    %8 = vector.extract_strided_slice %0 {offsets = [0, 0, 2], sizes = [2, 16, 1], strides = [1, 1, 1]} : vector<2x16x3xf32> to vector<2x16x1xf32>
    %9 = vector.shape_cast %8 : vector<2x16x1xf32> to vector<2x16xf32>
    %10 = vector.shape_cast %5 : vector<2x16xf32> to vector<2x16x1xf32>
    %11 = vector.shape_cast %5 : vector<2x16xf32> to vector<2x1x16xf32>
    %12 = vector.broadcast %10 : vector<2x16x1xf32> to vector<2x16x16xf32>
    %13 = vector.broadcast %11 : vector<2x1x16xf32> to vector<2x16x16xf32>
    %14 = arith.subf %12, %13 : vector<2x16x16xf32>
    %15 = vector.shape_cast %7 : vector<2x16xf32> to vector<2x16x1xf32>
    %16 = vector.shape_cast %7 : vector<2x16xf32> to vector<2x1x16xf32>
    %17 = vector.broadcast %15 : vector<2x16x1xf32> to vector<2x16x16xf32>
    %18 = vector.broadcast %16 : vector<2x1x16xf32> to vector<2x16x16xf32>
    %19 = arith.subf %17, %18 : vector<2x16x16xf32>
    %20 = vector.shape_cast %9 : vector<2x16xf32> to vector<2x16x1xf32>
    %21 = vector.shape_cast %9 : vector<2x16xf32> to vector<2x1x16xf32>
    %22 = vector.broadcast %20 : vector<2x16x1xf32> to vector<2x16x16xf32>
    %23 = vector.broadcast %21 : vector<2x1x16xf32> to vector<2x16x16xf32>
    %24 = arith.subf %22, %23 : vector<2x16x16xf32>
    %25 = arith.mulf %14, %14 : vector<2x16x16xf32>
    %26 = arith.mulf %19, %19 : vector<2x16x16xf32>
    %27 = arith.addf %25, %26 : vector<2x16x16xf32>
    %28 = arith.mulf %24, %24 : vector<2x16x16xf32>
    %29 = arith.addf %27, %28 : vector<2x16x16xf32>
    %30 = math.sqrt %29 : vector<2x16x16xf32>
    %31 = tpu.iota {dimensions = array<i32: 0>} : vector<16x16xi32>
    %32 = tpu.iota {dimensions = array<i32: 1>} : vector<16x16xi32>
    %33 = arith.cmpi eq, %31, %32 : vector<16x16xi32>
    %34 = arith.extui %33 : vector<16x16xi1> to vector<16x16xi32>
    %35 = arith.sitofp %34 : vector<16x16xi32> to vector<16x16xf32>
    %cst = arith.constant 3.000000e+00 : f32
    %36 = vector.broadcast %cst : f32 to vector<2x16x16xf32>
    %37 = arith.minimumf %30, %36 : vector<2x16x16xf32>
    %cst_8 = arith.constant 1.04719758 : f32
    %38 = vector.broadcast %cst_8 : f32 to vector<2x16x16xf32>
    %39 = arith.mulf %38, %37 : vector<2x16x16xf32>
    %40 = math.cos %39 : vector<2x16x16xf32>
    %cst_9 = arith.constant 1.000000e+00 : f32
    %41 = vector.broadcast %cst_9 : f32 to vector<2x16x16xf32>
    %42 = arith.addf %40, %41 : vector<2x16x16xf32>
    %cst_10 = arith.constant 5.000000e-01 : f32
    %43 = vector.broadcast %cst_10 : f32 to vector<2x16x16xf32>
    %44 = arith.mulf %43, %42 : vector<2x16x16xf32>
    %45 = vector.shape_cast %35 : vector<16x16xf32> to vector<1x16x16xf32>
    %46 = vector.broadcast %45 : vector<1x16x16xf32> to vector<2x16x16xf32>
    %47 = arith.subf %44, %46 : vector<2x16x16xf32>
    %cst_11 = arith.constant -1.000000e+00 : f32
    %48 = vector.broadcast %cst_11 : f32 to vector<2x16xf32>
    %49 = arith.cmpf ogt, %3, %48 : vector<2x16xf32>
    %50 = arith.extui %49 : vector<2x16xi1> to vector<2x16xi32>
    %51 = arith.sitofp %50 : vector<2x16xi32> to vector<2x16xf32>
    %52 = vector.shape_cast %51 : vector<2x16xf32> to vector<2x16x1xf32>
    %53 = vector.shape_cast %51 : vector<2x16xf32> to vector<2x1x16xf32>
    %54 = vector.broadcast %52 : vector<2x16x1xf32> to vector<2x16x16xf32>
    %55 = vector.broadcast %53 : vector<2x1x16xf32> to vector<2x16x16xf32>
    %56 = arith.mulf %54, %55 : vector<2x16x16xf32>
    %57 = vector.shape_cast %35 : vector<16x16xf32> to vector<1x16x16xf32>
    %58 = vector.broadcast %57 : vector<1x16x16xf32> to vector<2x16x16xf32>
    %59 = arith.subf %56, %58 : vector<2x16x16xf32>
    %60 = arith.mulf %47, %59 : vector<2x16x16xf32>
    %cst_12 = arith.constant 9.99999974E-5 : f32
    %61 = vector.broadcast %cst_12 : f32 to vector<2x16x16xf32>
    %62 = arith.maximumf %30, %61 : vector<2x16x16xf32>
    %63 = tpu.reciprocal %62 {approx = true} : vector<2x16x16xf32> -> vector<2x16x16xf32>
    %64 = arith.mulf %59, %63 : vector<2x16x16xf32>
    %65 = vector.shape_cast %1 : vector<2x16x8xf32> to vector<32x8xf32>
    %c0_13 = arith.constant 0 : index
    %c0_14 = arith.constant 0 : index
    %66 = vector.load %arg4[%c0_13, %c0_14] : memref<8x32xf32, #tpu.memory_space<vmem>>, vector<8x32xf32>
    %cst_15 = arith.constant dense<0.000000e+00> : vector<32x32xf32>
    %67 = tpu.matmul %65, %66, %cst_15 {dimension_numbers = #tpu.dot_dimension_numbers<[1], [0], [0], [1], [0, 0, 1, 1], [], []>} : vector<32x8xf32>, vector<8x32xf32>, vector<32x32xf32> -> vector<32x32xf32>
    %68 = vector.shape_cast %67 : vector<32x32xf32> to vector<2x16x32xf32>
    %c0_16 = arith.constant 0 : index
    %c0_17 = arith.constant 0 : index
    %69 = vector.load %arg5[%c0_16, %c0_17] : memref<8x32xf32, #tpu.memory_space<vmem>>, vector<8x32xf32>
    %cst_18 = arith.constant dense<0.000000e+00> : vector<32x32xf32>
    %70 = tpu.matmul %65, %69, %cst_18 {dimension_numbers = #tpu.dot_dimension_numbers<[1], [0], [0], [1], [0, 0, 1, 1], [], []>} : vector<32x8xf32>, vector<8x32xf32>, vector<32x32xf32> -> vector<32x32xf32>
    %71 = vector.shape_cast %70 : vector<32x32xf32> to vector<2x16x32xf32>
    %72 = vector.shape_cast %60 : vector<2x16x16xf32> to vector<2x16x16x1xf32>
    %73 = vector.shape_cast %68 : vector<2x16x32xf32> to vector<2x16x1x32xf32>
    %74 = vector.shape_cast %71 : vector<2x16x32xf32> to vector<2x1x16x32xf32>
    %75 = vector.broadcast %73 : vector<2x16x1x32xf32> to vector<2x16x16x32xf32>
    %76 = vector.broadcast %74 : vector<2x1x16x32xf32> to vector<2x16x16x32xf32>
    %77 = arith.addf %75, %76 : vector<2x16x16x32xf32>
    %78 = vector.broadcast %72 : vector<2x16x16x1xf32> to vector<2x16x16x32xf32>
    %79 = arith.mulf %78, %77 : vector<2x16x16x32xf32>
    %c0_19 = arith.constant 0 : index
    %c0_20 = arith.constant 0 : index
    %80 = vector.load %arg6[%c0_19, %c0_20] : memref<1x32xf32, #tpu.memory_space<vmem>>, vector<1x32xf32>
    %81 = vector.shape_cast %80 : vector<1x32xf32> to vector<1x1x1x32xf32>
    %82 = vector.broadcast %81 : vector<1x1x1x32xf32> to vector<2x16x16x32xf32>
    %83 = arith.addf %79, %82 : vector<2x16x16x32xf32>
    %84 = math.tanh %83 : vector<2x16x16x32xf32>
    %c0_21 = arith.constant 0 : index
    %c0_22 = arith.constant 0 : index
    %85 = vector.load %arg7[%c0_21, %c0_22] : memref<4x33xf32, #tpu.memory_space<vmem>>, vector<4x33xf32>
    %86 = vector.shape_cast %85 : vector<4x33xf32> to vector<1x4x33xf32>
    %87 = vector.shape_cast %86 : vector<1x4x33xf32> to vector<1x4x33xf32>
    %88 = vector.broadcast %87 : vector<1x4x33xf32> to vector<2x4x33xf32>
    %89 = arith.mulf %64, %14 : vector<2x16x16xf32>
    %90 = vector.shape_cast %89 : vector<2x16x16xf32> to vector<2x16x16x1xf32>
    %91 = vector.broadcast %90 : vector<2x16x16x1xf32> to vector<2x16x16x32xf32>
    %92 = arith.mulf %84, %91 : vector<2x16x16x32xf32>
    %93 = tpu.concatenate %92, %90 in 3 : vector<2x16x16x32xf32>, vector<2x16x16x1xf32> -> vector<2x16x16x33xf32>
    %94 = vector.shape_cast %93 : vector<2x16x16x33xf32> to vector<2x256x33xf32>
    %cst_23 = arith.constant dense<0.000000e+00> : vector<2x4x256xf32>
    %95 = tpu.matmul %88, %94, %cst_23 {dimension_numbers = #tpu.dot_dimension_numbers<[2], [2], [1], [1], [0, 0, 0, 1, 1, 1], [0], [0]>} : vector<2x4x33xf32>, vector<2x256x33xf32>, vector<2x4x256xf32> -> vector<2x4x256xf32>
    %96 = arith.mulf %64, %19 : vector<2x16x16xf32>
    %97 = vector.shape_cast %96 : vector<2x16x16xf32> to vector<2x16x16x1xf32>
    %98 = vector.broadcast %97 : vector<2x16x16x1xf32> to vector<2x16x16x32xf32>
    %99 = arith.mulf %84, %98 : vector<2x16x16x32xf32>
    %100 = tpu.concatenate %99, %97 in 3 : vector<2x16x16x32xf32>, vector<2x16x16x1xf32> -> vector<2x16x16x33xf32>
    %101 = vector.shape_cast %100 : vector<2x16x16x33xf32> to vector<2x256x33xf32>
    %cst_24 = arith.constant dense<0.000000e+00> : vector<2x4x256xf32>
    %102 = tpu.matmul %88, %101, %cst_24 {dimension_numbers = #tpu.dot_dimension_numbers<[2], [2], [1], [1], [0, 0, 0, 1, 1, 1], [0], [0]>} : vector<2x4x33xf32>, vector<2x256x33xf32>, vector<2x4x256xf32> -> vector<2x4x256xf32>
    %103 = arith.mulf %64, %24 : vector<2x16x16xf32>
    %104 = vector.shape_cast %103 : vector<2x16x16xf32> to vector<2x16x16x1xf32>
    %105 = vector.broadcast %104 : vector<2x16x16x1xf32> to vector<2x16x16x32xf32>
    %106 = arith.mulf %84, %105 : vector<2x16x16x32xf32>
    %107 = tpu.concatenate %106, %104 in 3 : vector<2x16x16x32xf32>, vector<2x16x16x1xf32> -> vector<2x16x16x33xf32>
    %108 = vector.shape_cast %107 : vector<2x16x16x33xf32> to vector<2x256x33xf32>
    %cst_25 = arith.constant dense<0.000000e+00> : vector<2x4x256xf32>
    %109 = tpu.matmul %88, %108, %cst_25 {dimension_numbers = #tpu.dot_dimension_numbers<[2], [2], [1], [1], [0, 0, 0, 1, 1, 1], [0], [0]>} : vector<2x4x33xf32>, vector<2x256x33xf32>, vector<2x4x256xf32> -> vector<2x4x256xf32>
    %110 = tpu.concatenate %95, %102, %109 in 1 : vector<2x4x256xf32>, vector<2x4x256xf32>, vector<2x4x256xf32> -> vector<2x12x256xf32>
    %c0_26 = arith.constant 0 : index
    %c0_27 = arith.constant 0 : index
    %c0_28 = arith.constant 0 : index
    %111 = vector.load %arg8[%c0_26, %c0_27, %c0_28] : memref<2x12x256xf32, #tpu.memory_space<vmem>>, vector<2x12x256xf32>
    tpu.vector_store %arg8[%c0_26, %c0_27, %c0_28], %110 {strides = array<i32>} : memref<2x12x256xf32, #tpu.memory_space<vmem>>, vector<2x12x256xf32>,
    return
  }
  func.func @transform_0(%arg0: i32) -> (i32, i32, i32) {
    %c0_i32 = arith.constant 0 : i32
    %c0_i32_0 = arith.constant 0 : i32
    %c0_i32_1 = arith.constant 0 : i32
    return %arg0, %c0_i32, %c0_i32_0 : i32, i32, i32
  }
  func.func @transform_1(%arg0: i32) -> (i32, i32, i32) {
    %c0_i32 = arith.constant 0 : i32
    %c0_i32_0 = arith.constant 0 : i32
    %c0_i32_1 = arith.constant 0 : i32
    return %arg0, %c0_i32, %c0_i32_0 : i32, i32, i32
  }
  func.func @transform_2(%arg0: i32) -> (i32, i32, i32) {
    %c0_i32 = arith.constant 0 : i32
    %c0_i32_0 = arith.constant 0 : i32
    %c0_i32_1 = arith.constant 0 : i32
    return %arg0, %c0_i32, %c0_i32_0 : i32, i32, i32
  }
  func.func @transform_3(%arg0: i32) -> (i32, i32) {
    %c0_i32 = arith.constant 0 : i32
    %c0_i32_0 = arith.constant 0 : i32
    %c0_i32_1 = arith.constant 0 : i32
    return %c0_i32, %c0_i32_0 : i32, i32
  }
  func.func @transform_4(%arg0: i32) -> (i32, i32) {
    %c0_i32 = arith.constant 0 : i32
    %c0_i32_0 = arith.constant 0 : i32
    %c0_i32_1 = arith.constant 0 : i32
    return %c0_i32, %c0_i32_0 : i32, i32
  }
  func.func @transform_5(%arg0: i32) -> (i32, i32) {
    %c0_i32 = arith.constant 0 : i32
    %c0_i32_0 = arith.constant 0 : i32
    %c0_i32_1 = arith.constant 0 : i32
    return %c0_i32, %c0_i32_0 : i32, i32
  }
  func.func @transform_6(%arg0: i32) -> (i32, i32) {
    %c0_i32 = arith.constant 0 : i32
    %c0_i32_0 = arith.constant 0 : i32
    %c0_i32_1 = arith.constant 0 : i32
    return %c0_i32, %c0_i32_0 : i32, i32
  }
  func.func @transform_7(%arg0: i32) -> (i32, i32, i32) {
    %c0_i32 = arith.constant 0 : i32
    %c0_i32_0 = arith.constant 0 : i32
    %c0_i32_1 = arith.constant 0 : i32
    return %arg0, %c0_i32, %c0_i32_0 : i32, i32, i32
  }
}

</mosaic_0001>

<bundles_post_ra>
// kernel: tpu_custom_call.1
= control target key start
LH: loop header
LB: loop body
LE: loop exit
PB: predicated region body
PF: predicated region fallthrough
CT: control target
= control target key end

     0   :  { %s5868_s24 = smov 0   ;;  %s8476_s0 = inlined_call_operand.vmem [shape: f32[4,16,1], index: 0, kind: input, shape index: {}]   ;;  %s8477_s1 = inlined_call_operand.vmem [shape: f32[4,16,3], index: 1, kind: input, shape index: {}]   ;;  %s8478_s2 = inlined_call_operand.vmem [shape: f32[4,16,8], index: 2, kind: input, shape index: {}]   ;;  %s8479_s3 = inlined_call_operand.vmem [shape: f32[8,32], index: 3, kind: input, shape index: {}]   ;;  %s8480_s4 = inlined_call_operand.vmem [shape: f32[8,32], index: 4, kind: input, shape index: {}]   ;;  %s8481_s5 = inlined_call_operand.vmem [shape: f32[1,32], index: 5, kind: input, shape index: {}]   ;;  %s8482_s6 = inlined_call_operand.vmem [shape: f32[4,33], index: 6, kind: input, shape index: {}]   ;;  %s8483_s7 = inlined_call_operand.vmem [shape: f32[4,12,256], index: 7, kind: output, shape index: {}]  }
   0x1 LB: > { %s4823_s25 = sadd.s32 4294967295, %s5815_s24   ;;  %p4827_p0 = scmp.ge.s32.totalorder %s5815_s24, 1  ;;  %s5815_s24 = sphi %s5868_s24, %s17_s24  }
   0x2   : > { %p263_p1 = scmp.lt.s32.totalorder %s5815_s24, 3 }
   0x4   : > { %p264_p2 = pnand %p4827_p0, %p263_p1 }
   0x6   : > { %267 = sbr.rel (%p264_p2) target bundleno = 1135 (0x46f), region = 48 }
   0xd   : > { %s4828_s26 = sshll.u32 %s4823_s25, 1  ;;  %v5817_v0 = vmov 1   ;;  %v5818_v4 = vmov 2   ;;  %v5819_v6 = vmov 0   ;;  %v5820_v9 = vmov 0.0   ;;  %v1096_v18 = vld [vmem:[%s8479_s3] sm:$0xff] }
   0xe   : > { %5630 = vset.pattern.permute.xlu0 %v5817_v0  ;;  %5628 = vset.pattern.permute.xlu1 %v5817_v0  ;;  %p310_p3 = scmp.lt.s32.totalorder %s4828_s26, 3  ;;  %vm1097_vm4 = vcmask 64512   ;;  %v369_v21 = vlaneseq  ;;  %v1195_v22 = vld [vmem:[%s8480_s4] sm:$0xff]  ;;  %vm380_vm5 = vcmask 130112  }
   0xf   : > { %5289 = vmatprep.subr.mxu0 %v1096_v18  ;;  %5297 = vmatprep.subr.mxu1 %v1195_v22 }
  0x10   : > { %s9016_s26 = smov (!%p310_p3, %s4828_s26), 3  ;;  %5290 = vmatpush3.msra.mxu0 %v1096_v18  ;;  %5298 = vmatpush3.msra.mxu1 %v1195_v22  ;;  %v5910_v25 = vand.u32 127, %v369_v21  ;;  %v5914_v29 = vshrl.u32 %v369_v21, 7 }
  0x11   : > { %s5879_s27 = sshll.u32 %s9016_s26, 4 }
  0x12   : > { %s321_s30 = scalar_lea.vmem %s8477_s1, %s5879_s27  ;;  %s314_s10 = scalar_lea.vmem %s8476_s0, %s5879_s27  ;;  %v375_v26 = vadd.s32 4294967288, %v5910_v25  ;;  %v5921_v32 = vsub.s32 %v5910_v25, %v5914_v29  ;;  %vm570_vm6 = vcmp.eq.s32.totalorder %v5914_v29, %v5910_v25 }
  0x13   : > { %v339_v1 = vld [vmem:[%s321_s30 + $0x10] sm:$0xff]  ;;  %v337_v2 = vld [vmem:[%s321_s30] sm:$0xff]  ;;  %v338_v3 = vld [vmem:[%s321_s30 + $0x8] sm:$0xff]  ;;  %s5900_s15 = scalar_lea.vmem %s8478_s2, %s5879_s27 }
  0x14   : > { %424 = vperm.xlu0 %5630, %v339_v1   ;;  %416 = vperm.xlu1 %5628, %v337_v2   ;;  %v340_v5 = vld [vmem:[%s321_s30 + $0x18] sm:$0xff]  ;;  %v345_v7 = vld [vmem:[%s314_s10] sm:$0xff]  ;;  %v346_v8 = vld [vmem:[%s314_s10 + $0x8] sm:$0xff]  ;;  %v5917_v30 = vsub.s32 %v375_v26, %v5914_v29  ;;  %s5074_s30 = sshll.u32 %s9016_s26, 5 }
  0x15   : > { %vm1008_vm0 = vcmp.gt.f32.partialorder %v345_v7, -1.0  ;;  %vm1009_vm1 = vcmp.gt.f32.partialorder %v346_v8, -1.0  ;;  %v347_v13 = vld [vmem:[%s314_s10 + $0x10] sm:$0xff]  ;;  %v348_v14 = vld [vmem:[%s314_s10 + $0x18] sm:$0xff]  ;;  %v341_v19 = vld [vmem:[%s5900_s15] sm:$0xff]  ;;  %s335_s10 = scalar_lea.vmem %s8483_s7, %s5074_s30 }
  0x16   : > { %v4858_v10 = vsel %vm1008_vm0, 1.0, %v5820_v9  ;;  %v4859_v11 = vsel %vm1009_vm1, 1.0, %v5820_v9  ;;  %vm1010_vm2 = vcmp.gt.f32.partialorder %v347_v13, -1.0  ;;  %vm1011_vm3 = vcmp.gt.f32.partialorder %v348_v14, -1.0  ;;  %5291 = vmatprep.mubr.msk.f32.mxu0 %vm1097_vm4, %v341_v19  ;;  %5299 = vmatprep.mubr.msk.f32.mxu1 %vm1097_vm4, %v341_v19  ;;  %v342_v20 = vld [vmem:[%s5900_s15 + $0x8] sm:$0xff] }
  0x17   : > { %v5635_v12 = vpack.i.bf16 %v4859_v11, %v4858_v10  ;;  %v4860_v15 = vsel %vm1010_vm2, 1.0, %v5820_v9  ;;  %v4861_v16 = vsel %vm1011_vm3, 1.0, %v5820_v9  ;;  %5292 = vmatmul.mubr.msk.f32.vlgmr.msra.gmra.mrb[0].mxu0 %vm1097_vm4, %v342_v20  ;;  %5300 = vmatmul.mubr.msk.f32.vlgmr.msra.gmra.mrb[0].mxu1 %vm1097_vm4, %v342_v20 }
  0x18   : > { %5633 = vset.pattern.permute.xlu0 %v5818_v4  ;;  %420 = vperm.xlu1 %5628, %v338_v3   ;;  %v5641_v17 = vpack.i.bf16 %v4861_v16, %v4860_v15 }
  0x19   : > { %472 = vperm.xlu0 %5633, %v338_v3  }
  0x1c   : > { %5629 = vset.pattern.permute.xlu1 %v5819_v6 }
  0x1d   : > { %5634 = vset.pattern.permute.xlu0 %v5819_v6  ;;  %366 = vperm.xlu1 %5629, %v340_v5  }
  0x1e   : > { %351 = vperm.xlu0 %5634, %v337_v2  }
  0x21   : > { %5631 = vset.pattern.permute.xlu1 %v5817_v0 }
  0x22   : > { %356 = vperm.xlu0 %5634, %v338_v3   ;;  %428 = vperm.xlu1 %5631, %v340_v5  }
  0x26   : > { %361 = vperm.xlu0 %5634, %v339_v1   ;;  %5632 = vset.pattern.permute.xlu1 %v5818_v4 }
  0x27   : > { %468 = vperm.xlu1 %5632, %v337_v2  }
  0x2a   : > { %5636 = vperm.xlu0 %5634, %v5635_v12  }
  0x2b   : > { %476 = vperm.xlu1 %5632, %v339_v1  }
  0x2f   : > { %480 = vperm.xlu1 %5632, %v340_v5  }
  0x33   : > { %5640 = vset.pattern.permute.xlu1 %v5819_v6 }
  0x34   : > { %5642 = vperm.xlu1 %5640, %v5641_v17  }
  0x93   : > { %v417_v23 = vpop.permute.xlu1 %416  ;;  %v425_v24 = vpop.permute.xlu0 %424 }
  0x94   : > { %v434_v36 = vrot.slane %v417_v23, %v5921_v32  ;;  %v443_v55 = vrot.slane %v425_v24, %v5921_v32 }
  0x97   : > { %v421_v27 = vpop.permute.xlu1 %420 }
  0x98   : > { %v473_v28 = vpop.permute.xlu0 %472  ;;  %v438_v34 = vrot.slane %v421_v27, %v5917_v30 }
  0x99   : > { %v490_v49 = vrot.slane %v473_v28, %v5917_v30 }
  0x9a   : > { %v439_v40 = vsel %vm380_vm5, %v438_v34, %v434_v36 }
  0x9b   : > { %v5933_v45 = vsub.f32 %v417_v23, %v439_v40  ;;  %v5935_v47 = vsub.f32 %v421_v27, %v439_v40 }
  0x9c   : > { %v367_v31 = vpop.permute.xlu1 %366 }
  0x9d   : > { %v352_v33 = vpop.permute.xlu0 %351  ;;  %v389_v52 = vrot.slane %v367_v31, %v5917_v30  ;;  %v523_v56 = vmul.f32 %v5933_v45, %v5933_v45  ;;  %v524_v59 = vmul.f32 %v5935_v47, %v5935_v47 }
  0x9e   : > { %v374_v35 = vrot.slane %v352_v33, %v5921_v32 }
  0xa1   : > { %v357_v37 = vpop.permute.xlu0 %356  ;;  %v429_v38 = vpop.permute.xlu1 %428 }
  0xa2   : > { %v379_v39 = vrot.slane %v357_v37, %v5917_v30  ;;  %v447_v50 = vrot.slane %v429_v38, %v5917_v30 }
  0xa4   : > { %v381_v41 = vsel %vm380_vm5, %v379_v39, %v374_v35  ;;  %v448_v63 = vsel %vm380_vm5, %v447_v50, %v443_v55 }
  0xa5   : > { %v5929_v42 = vsub.f32 %v352_v33, %v381_v41  ;;  %v5931_v43 = vsub.f32 %v357_v37, %v381_v41  ;;  %v362_v44 = vpop.permute.xlu0 %361  ;;  %v5966_v10 = vsub.f32 %v425_v24, %v448_v63  ;;  %v5968_v11 = vsub.f32 %v429_v38, %v448_v63  ;;  %v343_v37 = vld [vmem:[%s5900_s15 + $0x10] sm:$0xff]  ;;  %v344_v38 = vld [vmem:[%s5900_s15 + $0x18] sm:$0xff] }
  0xa6   : > { %v469_v46 = vpop.permute.xlu1 %468  ;;  %v385_v48 = vrot.slane %v362_v44, %v5921_v32  ;;  %5294 = vmatprep.mubr.msk.f32.mxu0 %vm1097_vm4, %v343_v37  ;;  %5302 = vmatprep.mubr.msk.f32.mxu1 %vm1097_vm4, %v343_v37 }
  0xa7   : > { %v486_v51 = vrot.slane %v469_v46, %v5921_v32  ;;  %v519_v53 = vmul.f32 %v5929_v42, %v5929_v42  ;;  %v520_v54 = vmul.f32 %v5931_v43, %v5931_v43  ;;  %v525_v18 = vmul.f32 %v5966_v10, %v5966_v10  ;;  %5295 = vmatmul.mubr.msk.f32.gmra.mrb[2].mxu0 %vm1097_vm4, %v344_v38 }
  0xa8   : > { %v390_v60 = vsel %vm380_vm5, %v389_v52, %v385_v48  ;;  %v526_v19 = vmul.f32 %v5968_v11, %v5968_v11  ;;  %5303 = vmatmul.mubr.msk.f32.gmra.mrb[2].mxu1 %vm1097_vm4, %v344_v38 }
  0xa9   : > { %v491_v57 = vsel %vm380_vm5, %v490_v49, %v486_v51  ;;  %v528_v0 = vadd.f32 %v524_v59, %v520_v54  ;;  %v527_v1 = vadd.f32 %v523_v56, %v519_v53  ;;  %v5962_v4 = vsub.f32 %v362_v44, %v390_v60  ;;  %v5637_v16 = vpop.permute.xlu0 %5636 }
  0xaa   : > { %v477_v58 = vpop.permute.xlu1 %476  ;;  %v5953_v61 = vsub.f32 %v469_v46, %v491_v57  ;;  %v5955_v62 = vsub.f32 %v473_v28, %v491_v57  ;;  %v5964_v5 = vsub.f32 %v367_v31, %v390_v60  ;;  %v5639_v22 = vunpack.i.h.bf16 %v5637_v16 }
  0xab   : > { %v495_v13 = vrot.slane %v477_v58, %v5921_v32  ;;  %v521_v14 = vmul.f32 %v5962_v4, %v5962_v4  ;;  %v5638_v23 = vunpack.i.l.bf16 %v5637_v16  ;;  %v569_v31 = vadd.s32 8, %v5914_v29 }
  0xac   : > { %v531_v2 = vmul.f32 %v5953_v61, %v5953_v61  ;;  %v532_v3 = vmul.f32 %v5955_v62, %v5955_v62  ;;  %v522_v15 = vmul.f32 %v5964_v5, %v5964_v5  ;;  %v1047_v35 = vrot.slane %v5639_v22, %v5917_v30 }
  0xad   : > { %v529_v24 = vadd.f32 %v525_v18, %v521_v14  ;;  %v1043_v36 = vrot.slane %v5638_v23, %v5921_v32  ;;  %vm571_vm7 = vcmp.eq.s32.totalorder %v569_v31, %v5910_v25  ;;  %v6009_v54 = vsel %vm570_vm6, 1.0, %v5820_v9 }
  0xae   : > { %v481_v6 = vpop.permute.xlu1 %480  ;;  %v535_v7 = vadd.f32 %v531_v2, %v527_v1  ;;  %v536_v8 = vadd.f32 %v532_v3, %v528_v0  ;;  %v530_v26 = vadd.f32 %v526_v19, %v522_v15  ;;  %v6014_v57 = vsel %vm571_vm7, 1.0, %v5820_v9 }
  0xaf   : > { %v499_v12 = vrot.slane %v481_v6, %v5917_v30  ;;  %v1048_v48 = vsel %vm380_vm5, %v1047_v35, %v1043_v36 }
  0xb0   : > { %5646 = vrsqrt.f32 %v535_v7  ;;  %vm541_vm8 = vcmp.eq.f32.partialorder %v535_v7, inf  ;;  %v544_v44 = vand.u32 2147483648, %v535_v7  ;;  %vm543_vm9 = vcmp.eq.f32.partialorder %v535_v7, 0.0 }
  0xb1   : > { %5648 = vrsqrt.f32 %v536_v8  ;;  %v500_v17 = vsel %vm380_vm5, %v499_v12, %v495_v13  ;;  %vm548_vm10 = vcmp.eq.f32.partialorder %v536_v8, inf  ;;  %v551_v50 = vand.u32 2147483648, %v536_v8 }
  0xb2   : > { %v5981_v20 = vsub.f32 %v477_v58, %v500_v17  ;;  %v5983_v21 = vsub.f32 %v481_v6, %v500_v17  ;;  %vm550_vm11 = vcmp.eq.f32.partialorder %v536_v8, 0.0  ;;  %v1072_v59 = vmul.f32 %v5638_v23, %v1048_v48 }
  0xb3   : > { %v6018_v63 = vpop.permute.xlu1 %5642  ;;  %v1073_v6 = vmul.f32 %v5639_v22, %v1048_v48 }
  0xb4   : > { %v533_v27 = vmul.f32 %v5981_v20, %v5981_v20  ;;  %v534_v28 = vmul.f32 %v5983_v21, %v5983_v21  ;;  %v5645_v12 = vunpack.i.h.bf16 %v6018_v63  ;;  %v5644_v16 = vunpack.i.l.bf16 %v6018_v63 }
  0xb6   : > { %v5990_v33 = vadd.f32 %v533_v27, %v529_v24  ;;  %v5992_v34 = vadd.f32 %v534_v28, %v530_v26  ;;  %v6042_v28 = vsub.f32 %v1073_v6, %v6014_v57  ;;  %v6049_v37 = vrot.slane %v5645_v12, %v5917_v30 }
  0xb7   : > { %v6054_v38 = vrot.slane %v5644_v16, %v5921_v32  ;;  %v8492_v6 = vmov 2475754826  }
  0xb8   : > { %5650 = vrsqrt.f32 %v5990_v33  ;;  %vm555_vm12 = vcmp.eq.f32.partialorder %v5990_v33, inf  ;;  %v558_v19 = vand.u32 2147483648, %v5990_v33  ;;  %vm557_vm13 = vcmp.eq.f32.partialorder %v5990_v33, 0.0 }
  0xb9   : > { %5652 = vrsqrt.f32 %v5992_v34  ;;  %vm562_vm14 = vcmp.eq.f32.partialorder %v5992_v34, inf  ;;  %vm564_vm0 = vcmp.eq.f32.partialorder %v5992_v34, 0.0 }
  0xba   : > { %v5647_v39 = vpop.eup %5646 }
  0xbb   : > { %v5649_v40 = vpop.eup %5648  ;;  %v540_v41 = vmul.f32 %v5647_v39, %v535_v7 }
  0xbc   : > { %v547_v46 = vmul.f32 %v5649_v40, %v536_v8 }
  0xbd   : > { %v542_v49 = vsel %vm541_vm8, %v535_v7, %v540_v41 }
  0xbe   : > { %v545_v51 = vsel %vm543_vm9, %v544_v44, %v542_v49  ;;  %v549_v52 = vsel %vm548_vm10, %v536_v8, %v547_v46  ;;  %v6027_v8 = vsub.f32 %v1072_v59, %v6009_v54  ;;  %v565_v44 = vand.u32 2147483648, %v5992_v34 }
  0xbf   : > { %v552_v53 = vsel %vm550_vm11, %v551_v50, %v549_v52  ;;  %v576_v55 = vmin.f32 %v545_v51, 3.0  ;;  %v1084_v56 = vmax.f32 %v545_v51, 0.0001 }
  0xc0   : > { %v577_v58 = vmin.f32 %v552_v53, 3.0  ;;  %v1085_v27 = vmax.f32 %v552_v53, 0.0001 }
  0xc1   : > { %v6016_v60 = vmul.f32 1.0471976, %v576_v55  ;;  %5654 = vrcp.f32 %v1084_v56 }
  0xc2   : > { %v6020_v0 = vmul.f32 1.0471976, %v577_v58  ;;  %v5651_v1 = vpop.eup %5650  ;;  %5656 = vrcp.f32 %v1085_v27  ;;  %v8498_v58 = vmov 683565275  }
  0xc3   : > { %v8485_v2 = vand.u32 2147483647, %v6016_v60  ;;  %v587_v3 = vand.u32 2139095040, %v6016_v60  ;;  %v5653_v7 = vpop.eup %5652  ;;  %v554_v15 = vmul.f32 %v5651_v1, %v5990_v33 }
  0xc4   : > { %v8484_v25 = vand.u32 2147483647, %v6020_v0  ;;  %v690_v9 = vand.u32 2139095040, %v6020_v0  ;;  %v561_v23 = vmul.f32 %v5653_v7, %v5992_v34 }
  0xc5   : > { %v588_v13 = vshrl.u32 %v587_v3, 23  ;;  %v591_v14 = vand.u32 8388607, %v8485_v2  ;;  %v556_v24 = vsel %vm555_vm12, %v5990_v33, %v554_v15  ;;  %v5825_v15 = vmov 920167782  }
  0xc6   : > { %v691_v17 = vshrl.u32 %v690_v9, 23  ;;  %v694_v18 = vand.u32 8388607, %v8484_v25  ;;  %v6044_v31 = vsel %vm557_vm13, %v558_v19, %v556_v24  ;;  %v563_v46 = vsel %vm562_vm14, %v5992_v34, %v561_v23 }
  0xc7   : > { %v4842_v22 = vadd.s32 4294967169, %v588_v13  ;;  %v592_v35 = vor.u32 8388608, %v591_v14  ;;  %v578_v40 = vmin.f32 %v6044_v31, 3.0  ;;  %v6072_v55 = vsel %vm564_vm0, %v565_v44, %v563_v46 }
  0xc8   : > { %v4846_v26 = vadd.s32 4294967169, %v691_v17  ;;  %v695_v33 = vor.u32 8388608, %v694_v18  ;;  %v8496_v9 = vmov 2131351028   ;;  %v5824_v14 = vmov 2102212464  }
  0xc9   : > { %v594_v36 = vadd.s32 1, %v4842_v22  ;;  %v6064_v50 = vshll.u32 %v592_v35, 8  ;;  %v6074_v34 = vmul.f32 1.0471976, %v578_v40 }
  0xca   : > { %v697_v39 = vadd.s32 1, %v4846_v26  ;;  %v6066_v52 = vshll.u32 %v695_v33, 8  ;;  %v8488_v26 = vmov 1326507024  }
  0xcb   : > { %v5655_v41 = vpop.eup %5654  ;;  %vm595_vm15 = vcmp.gt.s32.totalorder %v594_v36, 0 }
  0xcc   : > { %v596_v30 = vsel %vm595_vm15, %v594_v36, 0  ;;  %vm698_vm1 = vcmp.gt.s32.totalorder %v697_v39, 0  ;;  %v6062_v32 = vmul.f32 %v5655_v41, %v6027_v8 }
  0xcd   : > { %v597_v48 = vshrl.u32 %v596_v30, 5  ;;  %v598_v49 = vand.u32 31, %v596_v30  ;;  %v699_v51 = vsel %vm698_vm1, %v697_v39, 0 }
  0xce   : > { %v6070_v53 = vmul.f32 %v6062_v32, %v5933_v45  ;;  %v6077_v1 = vshrl.u32 %v699_v51, 5  ;;  %v701_v3 = vand.u32 31, %v699_v51  ;;  %v5657_v51 = vpop.eup %5656 }
  0xcf   : > { %v599_v56 = vsub.s32 32, %v598_v49  ;;  %v601_v59 = vshll.u32 %v8498_v58, %v598_v49  ;;  %v604_v7 = vshll.u32 %v8492_v6, %v598_v49  ;;  %v607_v13 = vshll.u32 %v8496_v9, %v598_v49 }
  0xd0   : > { %8647 = vst [vmem:[#allocation2_spill] sm:$0xff] %v6070_v53  ;;  %v610_v45 = vshll.u32 %v5824_v14, %v598_v49  ;;  %v613_v17 = vshll.u32 %v5825_v15, %v598_v49  ;;  %vm616_vm2 = vcmp.lt.s32.totalorder %v597_v48, 1  ;;  %vm617_vm3 = vcmp.lt.s32.totalorder %v597_v48, 2 }
  0xd1   : > { %v602_v18 = vshrl.u32 %v8492_v6, %v599_v56  ;;  %v605_v19 = vshrl.u32 %v8496_v9, %v599_v56  ;;  %v608_v22 = vshrl.u32 %v5824_v14, %v599_v56  ;;  %v600_v23 = vshrl.u32 %v8498_v58, %v599_v56 }
  0xd2   : > { %v611_v24 = vshrl.u32 %v5825_v15, %v599_v56  ;;  %v614_v27 = vshrl.u32 %v8488_v26, %v599_v56  ;;  %v702_v39 = vsub.s32 32, %v701_v3  ;;  %vm618_vm4 = vcmp.lt.s32.totalorder %v597_v48, 3 }
  0xd3   : > { %v603_v35 = vor.u32 %v602_v18, %v601_v59  ;;  %v606_v36 = vor.u32 %v605_v19, %v604_v7  ;;  %v609_v33 = vor.u32 %v608_v22, %v607_v13  ;;  %vm619_vm6 = vcmp.lt.s32.totalorder %v597_v48, 4 }
  0xd4   : > { %v612_v40 = vor.u32 %v611_v24, %v610_v45  ;;  %v615_v41 = vor.u32 %v614_v27, %v613_v17  ;;  %v704_v59 = vshll.u32 %v8498_v58, %v701_v3  ;;  %v705_v45 = vshrl.u32 %v8492_v6, %v702_v39 }
  0xd5   : > { %v620_v44 = vsel %vm616_vm2, %v600_v23, %v603_v35  ;;  %v621_v46 = vsel %vm619_vm6, %v609_v33, 2102212464  ;;  %v624_v30 = vsel %vm616_vm2, %v603_v35, %v606_v36  ;;  %v628_v49 = vsel %vm616_vm2, %v606_v36, %v609_v33 }
  0xd6   : > { %v622_v25 = vsel %vm618_vm4, %v606_v36, %v621_v46  ;;  %v625_v2 = vsel %vm619_vm6, %v612_v40, 920167782  ;;  %v629_v56 = vsel %vm619_vm6, %v615_v41, 1326507024  ;;  %v707_v17 = vshll.u32 %v8492_v6, %v701_v3 }
  0xd7   : > { %v626_v7 = vsel %vm618_vm4, %v609_v33, %v625_v2  ;;  %v630_v13 = vsel %vm618_vm4, %v612_v40, %v629_v56  ;;  %v623_v18 = vsel %vm617_vm3, %v620_v44, %v622_v25  ;;  %v708_v23 = vshrl.u32 %v8496_v9, %v702_v39 }
  0xd8   : > { %v627_v19 = vsel %vm617_vm3, %v624_v30, %v626_v7  ;;  %v631_v22 = vsel %vm617_vm3, %v628_v49, %v630_v13  ;;  %v706_v36 = vor.u32 %v705_v45, %v704_v59  ;;  %v710_v40 = vshll.u32 %v8496_v9, %v701_v3 }
  0xd9   : > { %v6100_v24 = vmul.u32.u64.low %v6064_v50, %v631_v22  ;;  %v6101_v27 = vmul.u32.u64.high %v6064_v50, %v631_v22, %v6100_v24  ;;  %v6104_v35 = vmul.u32.u64.low %v6064_v50, %v627_v19  ;;  %v6105_v2 = vmul.u32.u64.high %v6064_v50, %v627_v19, %v6104_v35 }
  0xda   : > { %v709_v33 = vor.u32 %v708_v23, %v707_v17  ;;  %v711_v25 = vshrl.u32 %v5824_v14, %v702_v39  ;;  %v713_v48 = vshll.u32 %v5824_v14, %v701_v3  ;;  %v714_v41 = vshrl.u32 %v5825_v15, %v702_v39 }
  0xdb   : > { %v717_v44 = vshrl.u32 %v8488_v26, %v702_v39  ;;  %v6114_v46 = vmul.f32 %v5657_v51, %v6042_v28  ;;  %v639_v30 = vmul.u32 %v6064_v50, %v623_v18  ;;  %v703_v49 = vshrl.u32 %v8498_v58, %v702_v39 }
  0xdc   : > { %v712_v56 = vor.u32 %v711_v25, %v710_v40  ;;  %v716_v59 = vshll.u32 %v5825_v15, %v701_v3  ;;  %vm641_vm7 = vc.u32 %v6101_v27, %v6104_v35  ;;  %v642_v7 = vadd.s32 1, %v6105_v2 }
  0xdd   : > { %v715_v13 = vor.u32 %v714_v41, %v713_v48  ;;  %vm719_vm8 = vcmp.lt.s32.totalorder %v6077_v1, 1  ;;  %vm721_vm9 = vcmp.lt.s32.totalorder %v6077_v1, 3  ;;  %vm722_vm10 = vcmp.lt.s32.totalorder %v6077_v1, 4 }
  0xde   : > { %v718_v45 = vor.u32 %v717_v44, %v716_v59  ;;  %v727_v51 = vsel %vm719_vm8, %v706_v36, %v709_v33  ;;  %v643_v50 = vsel %vm641_vm7, %v642_v7, %v6105_v2  ;;  %v724_v39 = vsel %vm722_vm10, %v712_v56, 2102212464 }
  0xdf   : > { %v728_v17 = vsel %vm722_vm10, %v715_v13, 920167782  ;;  %v731_v18 = vsel %vm719_vm8, %v709_v33, %v712_v56  ;;  %v644_v3 = vadd.s32 %v643_v50, %v639_v30  ;;  %vm720_vm11 = vcmp.lt.s32.totalorder %v6077_v1, 2 }
  0xe0   : > { %v729_v19 = vsel %vm721_vm9, %v712_v56, %v728_v17  ;;  %v732_v22 = vsel %vm722_vm10, %v718_v45, 1326507024  ;;  %v723_v23 = vsel %vm719_vm8, %v703_v49, %v706_v36  ;;  %v725_v24 = vsel %vm721_vm9, %v709_v33, %v724_v39 }
  0xe1   : > { %v730_v40 = vsel %vm720_vm11, %v727_v51, %v729_v19  ;;  %v733_v25 = vsel %vm721_vm9, %v715_v13, %v732_v22  ;;  %v645_v48 = vadd.s32 536870912, %v644_v3  ;;  %v579_v30 = vmin.f32 %v6072_v55, 3.0 }
  0xe2   : > { %v734_v41 = vsel %vm720_vm11, %v731_v18, %v733_v25  ;;  %v6128_v44 = vmul.u32.u64.low %v6066_v52, %v730_v40  ;;  %v6129_v59 = vmul.u32.u64.high %v6066_v52, %v730_v40, %v6128_v44  ;;  %v726_v1 = vsel %vm720_vm11, %v723_v23, %v725_v24 }
  0xe3   : > { %v6132_v2 = vmul.u32.u64.low %v6066_v52, %v734_v41  ;;  %v6133_v7 = vmul.u32.u64.high %v6066_v52, %v734_v41, %v6132_v2  ;;  %v646_v50 = vshrl.u32 %v645_v48, 30  ;;  %v6138_v36 = vmul.f32 %v6062_v32, %v5953_v61 }
  0xe4   : > { %v6142_v33 = vmul.f32 %v6114_v46, %v5955_v62  ;;  %v793_v49 = vand.u32 2139095040, %v6074_v34  ;;  %v745_v13 = vadd.s32 1, %v6129_v59  ;;  %v8486_v45 = vand.u32 2147483647, %v6074_v34 }
  0xe5   : > { %8648 = vst [vmem:[#allocation3_spill] sm:$0xff] %v6138_v36  ;;  %v647_v56 = vshll.u32 %v646_v50, 30  ;;  %v1057_v51 = vsel %vm380_vm5, %v6049_v37, %v6054_v38  ;;  %v742_v39 = vmul.u32 %v6066_v52, %v726_v1  ;;  %vm744_vm12 = vc.u32 %v6133_v7, %v6128_v44 }
  0xe6   : > { %8649 = vst [vmem:[#allocation4_spill] sm:$0xff] %v6142_v33  ;;  %v794_v61 = vshrl.u32 %v793_v49, 23  ;;  %v670_v18 = vsub.s32 4, %v646_v50  ;;  %v746_v62 = vsel %vm744_vm12, %v745_v13, %v6129_v59  ;;  %v6153_v19 = vmul.f32 1.0471976, %v579_v30 }
  0xe7   : > { %v648_v17 = vsub.s32 %v644_v3, %v647_v56  ;;  %v747_v22 = vadd.s32 %v746_v62, %v742_v39  ;;  %v1074_v24 = vmul.f32 %v5644_v16, %v1057_v51  ;;  %v1075_v40 = vmul.f32 %v5645_v12, %v1057_v51 }
  0xe8   : > { %8650 = vst [vmem:[#allocation5_spill] sm:$0xff] %v6153_v19  ;;  %v4850_v23 = vadd.s32 4294967169, %v794_v61  ;;  %v797_v38 = vand.u32 8388607, %v8486_v45  ;;  %vm586_vm5 = vcmp.lt.s32.totalorder %v6016_v60, 0  ;;  %v6163_v25 = vsub.s32 0, %v5914_v29 }
  0xe9   : > { %v650_v37 = vsub.s32 0, %v648_v17  ;;  %v748_v52 = vadd.s32 536870912, %v747_v22  ;;  %v671_v41 = vsel %vm586_vm5, %v670_v18, %v646_v50  ;;  %v896_v16 = vand.u32 2139095040, %v6153_v19 }
  0xea   : > { %v800_v3 = vadd.s32 1, %v4850_v23  ;;  %v6171_v63 = vsub.f32 %v1074_v24, %v6009_v54  ;;  %v6174_v12 = vsub.f32 %v1075_v40, %v6014_v57  ;;  %v8651_v2 = vand.u32 2147483647, %v6016_v60 }
  0xeb   : > { %v4843_v48 = vmin.u32 %v650_v37, %v648_v17  ;;  %v6168_v59 = vshrl.u32 %v748_v52, 30  ;;  %v798_v49 = vor.u32 8388608, %v797_v38  ;;  %v8487_v39 = vand.u32 2147483647, %v6153_v19 }
  0xec   : > { %vm801_vm13 = vcmp.gt.s32.totalorder %v800_v3, 0  ;;  %vm6178_vm14 = vcmp.le.f32.partialorder %v8651_v2, 0.7853982  ;;  %v897_v18 = vshrl.u32 %v896_v16, 23  ;;  %v640_v24 = vadd.s32 %v6104_v35, %v6101_v27 }
  0xed   : > { %v652_v1 = vclz %v4843_v48  ;;  %v802_v50 = vsel %vm801_vm13, %v800_v3, 0  ;;  %v673_v56 = vsel %vm6178_vm14, 0, %v671_v41  ;;  %v750_v13 = vshll.u32 %v6168_v59, 30 }
  0xee   : > { %v804_v51 = vand.u32 31, %v802_v50  ;;  %v6194_v37 = vmul.f32 %v6114_v46, %v5931_v43  ;;  %v6196_v52 = vand.u32 3, %v673_v56  ;;  %v743_v3 = vadd.s32 %v6128_v44, %v6133_v7 }
  0xef   : > { %v4844_v61 = vadd.s32 4294967294, %v652_v1  ;;  %v6190_v40 = vsub.s32 %v747_v22, %v750_v13  ;;  %v6199_v48 = vshll.u32 %v798_v49, 8  ;;  %v6202_v2 = vshrl.u32 %v802_v50, 5 }
  0xf0   : > { %v805_v38 = vsub.s32 32, %v804_v51  ;;  %v6206_v27 = vand.u32 8388607, %v8487_v39  ;;  %v4854_v1 = vadd.s32 4294967169, %v897_v18  ;;  %v807_v44 = vshll.u32 %v8498_v58, %v804_v51 }
  0xf1   : > { %vm4845_vm15 = vcmp.lt.s32.totalorder %v4844_v61, 0  ;;  %v753_v16 = vsub.s32 0, %v6190_v40  ;;  %v810_v7 = vshll.u32 %v8492_v6, %v804_v51  ;;  %v813_v49 = vshll.u32 %v8496_v9, %v804_v51 }
  0xf2   : > { %v655_v41 = vsel %vm4845_vm15, 0, %v4844_v61  ;;  %v808_v22 = vshrl.u32 %v8492_v6, %v805_v38  ;;  %v811_v45 = vshrl.u32 %v8496_v9, %v805_v38  ;;  %v806_v23 = vshrl.u32 %v8498_v58, %v805_v38 }
  0xf3   : > { %v656_v35 = vsub.s32 32, %v655_v41  ;;  %v660_v43 = vsub.s32 4294967266, %v655_v41  ;;  %v4847_v56 = vmin.u32 %v753_v16, %v6190_v40  ;;  %v657_v13 = vshll.u32 %v648_v17, %v655_v41 }
  0xf4   : > { %v814_v62 = vshrl.u32 %v5824_v14, %v805_v38  ;;  %v817_v18 = vshrl.u32 %v5825_v15, %v805_v38  ;;  %v809_v36 = vor.u32 %v808_v22, %v807_v44  ;;  %v816_v33 = vshll.u32 %v5824_v14, %v804_v51 }
  0xf5   : > { %v658_v50 = vshrl.u32 %v640_v24, %v656_v35  ;;  %v661_v61 = vadd.s32 127, %v660_v43  ;;  %v755_v39 = vclz %v4847_v56  ;;  %v819_v17 = vshll.u32 %v5825_v15, %v804_v51 }
  0xf6   : > { %v815_v19 = vor.u32 %v814_v62, %v813_v49  ;;  %v8654_v24 = vmov 1326507024   ;;  %v812_v56 = vor.u32 %v811_v45, %v810_v7  ;;  %v818_v9 = vor.u32 %v817_v18, %v816_v33 }
  0xf7   : > { %v659_v26 = vor.u32 %v658_v50, %v657_v13  ;;  %v662_v16 = vshll.u32 %v661_v61, 23  ;;  %v4848_v6 = vadd.s32 4294967294, %v755_v39  ;;  %v820_v41 = vshrl.u32 %v8654_v24, %v805_v38 }
  0xf8   : > { %vm822_vm1 = vcmp.lt.s32.totalorder %v6202_v2, 1  ;;  %vm823_vm2 = vcmp.lt.s32.totalorder %v6202_v2, 2  ;;  %vm824_vm3 = vcmp.lt.s32.totalorder %v6202_v2, 3  ;;  %vm825_vm4 = vcmp.lt.s32.totalorder %v6202_v2, 4 }
  0xf9   : > { %v663_v35 = vor.u32 4788187, %v662_v16  ;;  %v666_v43 = vcvt.s32.f32 %v659_v26  ;;  %vm4849_vm0 = vcmp.lt.s32.totalorder %v4848_v6, 0  ;;  %v821_v58 = vor.u32 %v820_v41, %v819_v17 }
  0xfa   : > { %v758_v22 = vsel %vm4849_vm0, 0, %v4848_v6  ;;  %v826_v62 = vsel %vm822_vm1, %v806_v23, %v809_v36  ;;  %v827_v26 = vsel %vm825_vm4, %v815_v19, 2102212464  ;;  %v830_v38 = vsel %vm822_vm1, %v809_v36, %v812_v56 }
  0xfb   : > { %v664_v13 = vand.u32 2147483647, %v663_v35  ;;  %v759_v39 = vsub.s32 32, %v758_v22  ;;  %v763_v51 = vsub.s32 4294967266, %v758_v22  ;;  %v760_v45 = vshll.u32 %v6190_v40, %v758_v22 }
  0xfc   : > { %v831_v6 = vsel %vm825_vm4, %v818_v9, 920167782  ;;  %v834_v23 = vsel %vm822_vm1, %v812_v56, %v815_v19  ;;  %v828_v61 = vsel %vm824_vm3, %v812_v56, %v827_v26  ;;  %v835_v36 = vsel %vm825_vm4, %v821_v58, 1326507024 }
  0xfd   : > { %v667_v33 = vmul.f32 %v666_v43, %v664_v13  ;;  %v761_v44 = vshrl.u32 %v743_v3, %v759_v39  ;;  %v764_v7 = vadd.s32 127, %v763_v51  ;;  %v832_v49 = vsel %vm824_vm3, %v815_v19, %v831_v6 }
  0xfe   : > { %v833_v40 = vsel %vm823_vm2, %v830_v38, %v832_v49  ;;  %v836_v3 = vsel %vm824_vm3, %v818_v9, %v835_v36  ;;  %v903_v17 = vadd.s32 1, %v4854_v1  ;;  %vm689_vm6 = vcmp.lt.s32.totalorder %v6020_v0, 0 }
  0xff   : > { %v668_v50 = vxor.u32 2147483648, %v667_v33  ;;  %v762_v18 = vor.u32 %v761_v44, %v760_v45  ;;  %v765_v16 = vshll.u32 %v764_v7, 23  ;;  %v837_v19 = vsel %vm823_vm2, %v834_v23, %v836_v3 }
 0x100   : > { %v6251_v35 = vmul.u32.u64.low %v6199_v48, %v833_v40  ;;  %v6252_v43 = vmul.u32.u64.high %v6199_v48, %v833_v40, %v6251_v35  ;;  %v829_v9 = vsel %vm823_vm2, %v826_v62, %v828_v61  ;;  %vm904_vm7 = vcmp.gt.s32.totalorder %v903_v17, 0 }
 0x101   : > { %v669_v41 = vsel %vm586_vm5, %v668_v50, %v667_v33  ;;  %v766_v56 = vor.u32 4788187, %v765_v16  ;;  %v6261_v1 = vmul.u32.u64.low %v6199_v48, %v837_v19  ;;  %v6262_v13 = vmul.u32.u64.high %v6199_v48, %v837_v19, %v6261_v1 }
 0x102   : > { %v672_v58 = vsel %vm6178_vm14, %v6016_v60, %v669_v41  ;;  %v905_v22 = vsel %vm904_vm7, %v903_v17, 0  ;;  %v769_v51 = vcvt.s32.f32 %v762_v18  ;;  %v8655_v33 = vand.u32 2147483647, %v6020_v0 }
 0x103   : > { %5658 = vcosq.f32 %v672_v58  ;;  %v767_v39 = vand.u32 2147483647, %v766_v56  ;;  %v907_v26 = vand.u32 31, %v905_v22  ;;  %v848_v2 = vadd.s32 1, %v6252_v43 }
 0x104   : > { %5660 = vsinq.f32 %v672_v58  ;;  %vm6266_vm8 = vcmp.le.f32.partialorder %v8655_v33, 0.7853982  ;;  %v901_v62 = vor.u32 8388608, %v6206_v27  ;;  %v2352_v45 = vrot.slane %v6194_v37, %v6163_v25 }
 0x105   : > { %v770_v38 = vmul.f32 %v769_v51, %v767_v39  ;;  %v773_v6 = vsub.s32 4, %v6168_v59  ;;  %v908_v44 = vsub.s32 32, %v907_v26  ;;  %v8658_v7 = vmax.f32 %v6044_v31, 0.0001 }
 0x106   : > { %v845_v49 = vmul.u32 %v6199_v48, %v829_v9  ;;  %vm847_vm9 = vc.u32 %v6262_v13, %v6251_v35  ;;  %v6280_v23 = vshrl.u32 %v905_v22, 5  ;;  %v8659_v50 = vmax.f32 %v6072_v55, 0.0001  ;;  %2358 = vbcast.lane.b32.xlu0 %v2352_v45, 264  ;;  %2354 = vbcast.lane.b32.xlu1 %v2352_v45, 256 }
 0x107   : > { %5662 = vrcp.f32 %v8658_v7  ;;  %vm679_vm10 = vcmp.eq.s32.totalorder %v6196_v52, 0  ;;  %v771_v27 = vxor.u32 2147483648, %v770_v38  ;;  %v849_v61 = vsel %vm847_vm9, %v848_v2, %v6252_v43 }
 0x108   : > { %5664 = vrcp.f32 %v8659_v50  ;;  %v8660_v40 = vmov 683565275   ;;  %v8661_v31 = vmov 2475754826   ;;  %v850_v48 = vadd.s32 %v849_v61, %v845_v49 }
 0x109   : > { %v910_v36 = vshll.u32 %v8660_v40, %v907_v26  ;;  %v911_v18 = vshrl.u32 %v8661_v31, %v908_v44  ;;  %v913_v16 = vshll.u32 %v8661_v31, %v907_v26  ;;  %v8662_v3 = vmov 2131351028  }
 0x10a   : > { %v914_v17 = vshrl.u32 %v8662_v3, %v908_v44  ;;  %v920_v41 = vshrl.u32 %v5825_v15, %v908_v44  ;;  %vm678_vm11 = vcmp.lt.s32.totalorder %v6196_v52, 2  ;;  %v772_v55 = vsel %vm689_vm6, %v771_v27, %v770_v38 }
 0x10b   : > { %v917_v19 = vshrl.u32 %v5824_v14, %v908_v44  ;;  %v919_v43 = vshll.u32 %v5824_v14, %v907_v26  ;;  %v923_v58 = vshrl.u32 %v8654_v24, %v908_v44  ;;  %v775_v56 = vsel %vm6266_vm8, %v6020_v0, %v772_v55 }
 0x10c   : > { %v851_v9 = vadd.s32 536870912, %v850_v48  ;;  %v912_v1 = vor.u32 %v911_v18, %v910_v36  ;;  %v916_v22 = vshll.u32 %v8662_v3, %v907_v26  ;;  %5666 = vcosq.f32 %v775_v56 }
 0x10d   : > { %v915_v39 = vor.u32 %v914_v17, %v913_v16  ;;  %v921_v51 = vor.u32 %v920_v41, %v919_v43  ;;  %v922_v33 = vshll.u32 %v5825_v15, %v907_v26  ;;  %v5659_v2 = vpop.eup %5658  ;;  %vm676_vm12 = vweird.f32 %v6016_v60 }
 0x10e   : > { %vm682_vm5 = vcmp.eq.s32.totalorder %v6196_v52, 2  ;;  %v774_v14 = vsel %vm689_vm6, %v773_v6, %v6168_v59  ;;  %5668 = vsinq.f32 %v775_v56  ;;  %v6307_v24 = vshrl.u32 %v851_v9, 30  ;;  %v5661_v45 = vpop.eup %5660 }
 0x10f   : > { %v683_v38 = vxor.u32 2147483648, %v5659_v2  ;;  %v918_v7 = vor.u32 %v917_v19, %v916_v22  ;;  %v924_v49 = vor.u32 %v923_v58, %v922_v33  ;;  %v6309_v50 = vshll.u32 %v901_v62, 8 }
 0x110   : > { %v680_v27 = vxor.u32 2147483648, %v5661_v45  ;;  %v853_v15 = vshll.u32 %v6307_v24, 30  ;;  %vm925_vm13 = vcmp.lt.s32.totalorder %v6280_v23, 1  ;;  %vm928_vm14 = vcmp.lt.s32.totalorder %v6280_v23, 4 }
 0x111   : > { %v5663_v26 = vpop.eup %5662  ;;  %v684_v61 = vsel %vm682_vm5, %v683_v38, %v5661_v45  ;;  %v776_v59 = vsel %vm6266_vm8, 0, %v774_v14  ;;  %v933_v6 = vsel %vm925_vm13, %v912_v1, %v915_v39  ;;  %v934_v36 = vsel %vm928_vm14, %v921_v51, 920167782 }
 0x112   : > { %v5665_v31 = vpop.eup %5664  ;;  %v681_v62 = vsel %vm679_vm10, %v5659_v2, %v680_v27  ;;  %v6320_v18 = vsub.s32 %v850_v48, %v853_v15  ;;  %v909_v16 = vshrl.u32 %v8660_v40, %v908_v44  ;;  %vm927_vm15 = vcmp.lt.s32.totalorder %v6280_v23, 3 }
 0x113   : > { %vm926_vm0 = vcmp.lt.s32.totalorder %v6280_v23, 2  ;;  %v930_v3 = vsel %vm928_vm14, %v918_v7, 2102212464  ;;  %v935_v17 = vsel %vm927_vm15, %v918_v7, %v934_v36  ;;  %v938_v30 = vsel %vm928_vm14, %v924_v49, 1326507024 }
 0x114   : > { %v685_v41 = vsel %vm678_vm11, %v681_v62, %v684_v61  ;;  %v856_v55 = vsub.s32 0, %v6320_v18  ;;  %v936_v19 = vsel %vm926_vm0, %v933_v6, %v935_v17  ;;  %v937_v48 = vsel %vm925_vm13, %v915_v39, %v918_v7 }
 0x115   : > { %v780_v43 = vand.u32 3, %v776_v59  ;;  %v939_v44 = vsel %vm927_vm15, %v921_v51, %v938_v30  ;;  %v6333_v40 = vmul.u32.u64.low %v6309_v50, %v936_v19  ;;  %v6334_v58 = vmul.u32.u64.high %v6309_v50, %v936_v19, %v6333_v40 }
 0x116   : > { %vm779_vm1 = vweird.f32 %v6020_v0  ;;  %v4851_v52 = vmin.u32 %v856_v55, %v6320_v18  ;;  %v929_v56 = vsel %vm925_vm13, %v909_v16, %v912_v1  ;;  %v931_v9 = vsel %vm927_vm15, %v915_v39, %v930_v3  ;;  %v5667_v22 = vpop.eup %5666 }
 0x117   : > { %v686_v33 = vsel %vm676_vm12, nan, %v685_v41  ;;  %v6345_v51 = vmul.f32 %v6062_v32, %v5929_v42  ;;  %v940_v2 = vsel %vm926_vm0, %v937_v48, %v939_v44  ;;  %v6350_v14 = vmul.f32 %v5665_v31, %v6174_v12 }
 0x118   : > { %v5669_v45 = vpop.eup %5668  ;;  %v786_v38 = vxor.u32 2147483648, %v5667_v22  ;;  %v858_v7 = vclz %v4851_v52  ;;  %v6353_v1 = vmul.u32.u64.low %v6309_v50, %v940_v2  ;;  %v6354_v39 = vmul.u32.u64.high %v6309_v50, %v940_v2, %v6353_v1 }
 0x119   : > { %v783_v49 = vxor.u32 2147483648, %v5669_v45  ;;  %vm785_vm2 = vcmp.eq.s32.totalorder %v780_v43, 2  ;;  %v932_v60 = vsel %vm926_vm0, %v929_v56, %v931_v9  ;;  %v951_v42 = vadd.s32 1, %v6334_v58 }
 0x11a   : > { %vm781_vm3 = vcmp.lt.s32.totalorder %v780_v43, 2  ;;  %vm782_vm4 = vcmp.eq.s32.totalorder %v780_v43, 0  ;;  %v787_v32 = vsel %vm785_vm2, %v786_v38, %v5669_v45  ;;  %v4852_v27 = vadd.s32 4294967294, %v858_v7 }
 0x11b   : > { %v784_v15 = vsel %vm782_vm4, %v5667_v22, %v783_v49  ;;  %v996_v61 = vadd.f32 1.0, %v686_v33  ;;  %v6360_v59 = vmul.f32 %v5663_v26, %v6171_v63  ;;  %v6364_v6 = vmul.f32 %v6350_v14, %v5964_v5 }
 0x11c   : > { %v788_v36 = vsel %vm781_vm3, %v784_v15, %v787_v32  ;;  %vm4853_vm6 = vcmp.lt.s32.totalorder %v4852_v27, 0  ;;  %v948_v23 = vmul.u32 %v6309_v50, %v932_v60  ;;  %vm950_vm7 = vc.u32 %v6354_v39, %v6333_v40 }
 0x11d   : > { %v789_v31 = vsel %vm779_vm1, nan, %v788_v36  ;;  %v861_v62 = vsel %vm4853_vm6, 0, %v4852_v27  ;;  %v952_v16 = vsel %vm950_vm7, %v951_v42, %v6334_v58  ;;  %v2264_v26 = vrot.slane %v6345_v51, %v6163_v25 }
 0x11e   : > { %v846_v5 = vadd.s32 %v6251_v35, %v6262_v13  ;;  %v862_v3 = vsub.s32 32, %v861_v62  ;;  %v866_v17 = vsub.s32 4294967266, %v861_v62  ;;  %v1000_v30 = vmul.f32 0.5, %v996_v61 }
 0x11f   : > { %v953_v41 = vadd.s32 %v952_v16, %v948_v23  ;;  %2270 = vbcast.lane.b32.xlu0 %v2264_v26, 264  ;;  %2266 = vbcast.lane.b32.xlu1 %v2264_v26, 256  ;;  %v2528_v50 = vrot.slane %v6364_v6, %v6163_v25  ;;  %v997_v0 = vadd.f32 1.0, %v789_v31  ;;  %v863_v55 = vshll.u32 %v6320_v18, %v861_v62 }
 0x120   : > { %v864_v19 = vshrl.u32 %v846_v5, %v862_v3  ;;  %v867_v48 = vadd.s32 127, %v866_v17  ;;  %v6381_v44 = vmul.f32 %v6360_v59, %v5962_v4  ;;  %v1004_v56 = vsub.f32 %v1000_v30, %v6009_v54 }
 0x121   : > { %v954_v43 = vadd.s32 536870912, %v953_v41  ;;  %v1001_v52 = vmul.f32 0.5, %v997_v0  ;;  %v876_v22 = vsub.s32 4, %v6307_v24  ;;  %v6391_v4 = vsub.s32 1, %v5914_v29 }
 0x122   : > { %v865_v35 = vor.u32 %v864_v19, %v863_v55  ;;  %v868_v13 = vshll.u32 %v867_v48, 23  ;;  %v2440_v33 = vrot.slane %v6381_v44, %v6163_v25  ;;  %vm792_vm8 = vcmp.lt.s32.totalorder %v6074_v34, 0 }
 0x123   : > { %v6383_v58 = vshrl.u32 %v954_v43, 30  ;;  %2534 = vbcast.lane.b32.xlu0 %v2528_v50, 264  ;;  %2530 = vbcast.lane.b32.xlu1 %v2528_v50, 256  ;;  %v1005_v7 = vsub.f32 %v1001_v52, %v6014_v57  ;;  %v6398_v1 = vmul.f32 %v6027_v8, %v1004_v56  ;;  %v877_v60 = vsel %vm792_vm8, %v876_v22, %v6307_v24 }
 0x124   : > { %v869_v9 = vor.u32 4788187, %v868_v13  ;;  %v872_v45 = vcvt.s32.f32 %v865_v35  ;;  %v2363_v32 = vrot.slane %v6194_v37, %v6391_v4  ;;  %v8663_v27 = vand.u32 2147483647, %v6074_v34 }
 0x125   : > { %v956_v18 = vshll.u32 %v6383_v58, 30  ;;  %v6413_v8 = vsub.s32 2, %v5914_v29  ;;  %v6419_v23 = vmul.f32 %v6042_v28, %v1005_v7  ;;  %v6425_v62 = vrot.slane %v6398_v1, %v6391_v4 }
 0x126   : > { %v870_v2 = vand.u32 2147483647, %v869_v9  ;;  %vm6408_vm9 = vcmp.le.f32.partialorder %v8663_v27, 0.7853982  ;;  %v2275_v28 = vrot.slane %v6345_v51, %v6391_v4  ;;  %v6437_v3 = vsub.s32 6, %v5914_v29 }
 0x127   : > { %v6394_v38 = vsub.s32 %v953_v41, %v956_v18  ;;  %2446 = vbcast.lane.b32.xlu0 %v2440_v33, 264  ;;  %2442 = vbcast.lane.b32.xlu1 %v2440_v33, 256  ;;  %v879_v36 = vsel %vm6408_vm9, 0, %v877_v60  ;;  %v6429_v16 = vrot.slane %v6398_v1, %v6413_v8  ;;  %v6442_v30 = vsub.s32 3, %v5914_v29 }
 0x128   : > { %v873_v49 = vmul.f32 %v872_v45, %v870_v2  ;;  %v6439_v17 = vand.u32 3, %v879_v36  ;;  %v6445_v50 = vsub.s32 4, %v5914_v29  ;;  %v6448_v0 = vsub.s32 5, %v5914_v29 }
 0x129   : > { %v959_v42 = vsub.s32 0, %v6394_v38  ;;  %v6452_v55 = vmul.f32 %v6114_v46, %v5935_v47  ;;  %v6456_v19 = vmul.f32 %v6360_v59, %v5966_v10  ;;  %v6460_v48 = vrot.slane %v6419_v23, %v6437_v3 }
 0x12a   : > { %v874_v61 = vxor.u32 2147483648, %v873_v49  ;;  %v6463_v43 = vsub.s32 7, %v5914_v29  ;;  %v2539_v35 = vrot.slane %v6364_v6, %v6391_v4  ;;  %v6469_v13 = vrot.slane %v6345_v51, %v6437_v3 }
 0x12b   : > { %v4855_v24 = vmin.u32 %v959_v42, %v6394_v38  ;;  %2369 = vbcast.lane.b32.xlu0 %v2363_v32, 264  ;;  %2365 = vbcast.lane.b32.xlu1 %v2363_v32, 256  ;;  %8666 = vst [vmem:[#allocation6_spill] sm:$0xff] %v6452_v55  ;;  %8667 = vst [vmem:[#allocation7_spill] sm:$0xff] %v6456_v19  ;;  %v6473_v47 = vrot.slane %v6364_v6, %v6437_v3  ;;  %vm888_vm11 = vcmp.eq.s32.totalorder %v6439_v17, 2  ;;  %vm2742_vm4 = vcmask 269312  }
 0x12c   : > { %v875_v31 = vsel %vm792_vm8, %v874_v61, %v873_v49  ;;  %v6478_v46 = vmul.f32 %v6350_v14, %v5968_v11  ;;  %v6482_v52 = vmul.f32 %v6360_v59, %v5981_v20  ;;  %v6486_v56 = vrot.slane %v6381_v44, %v6437_v3  ;;  %vm7429_vm7 = vmpackc.low %vm2742_vm4, %vm2742_vm4 }
 0x12d   : > { %v878_v26 = vsel %vm6408_vm9, %v6074_v34, %v875_v31  ;;  %v961_v5 = vclz %v4855_v24  ;;  %vm885_vm12 = vcmp.eq.s32.totalorder %v6439_v17, 0  ;;  %v949_v9 = vadd.s32 %v6333_v40, %v6354_v39 }
 0x12e   : > { %5670 = vcosq.f32 %v878_v26  ;;  %8668 = vst [vmem:[#allocation8_spill] sm:$0xff] %v6478_v46  ;;  %8669 = vst [vmem:[#allocation9_spill] sm:$0xff] %v6482_v52  ;;  %v6493_v33 = vmul.f32 %v6350_v14, %v5983_v21  ;;  %vm884_vm5 = vcmp.lt.s32.totalorder %v6439_v17, 2  ;;  %v2451_v20 = vrot.slane %v6381_v44, %v6391_v4 }
 0x12f   : > { %5672 = vsinq.f32 %v878_v26  ;;  %v4856_v41 = vadd.s32 4294967294, %v961_v5  ;;  %2281 = vbcast.lane.b32.xlu0 %v2275_v28, 264  ;;  %2277 = vbcast.lane.b32.xlu1 %v2275_v28, 256  ;;  %v2374_v59 = vrot.slane %v6194_v37, %v6413_v8  ;;  %v2286_v40 = vrot.slane %v6345_v51, %v6413_v8  ;;  %v8682_v28 = vld [vmem:[#allocation5_spill] sm:$0xff] }
 0x130   : > { %8670 = vst [vmem:[#allocation10_spill] sm:$0xff] %v6493_v33  ;;  %vm882_vm13 = vweird.f32 %v6074_v34  ;;  %v6507_v2 = vrot.slane %v6452_v55, %v6391_v4  ;;  %v6511_v45 = vrot.slane %v6070_v53, %v6391_v4  ;;  %v6515_v7 = vrot.slane %v6478_v46, %v6391_v4 }
 0x131   : > { %vm4857_vm10 = vcmp.lt.s32.totalorder %v4856_v41, 0  ;;  %v6519_v49 = vrot.slane %v6456_v19, %v6391_v4  ;;  %v6527_v32 = vrot.slane %v6070_v53, %v6413_v8  ;;  %v6531_v27 = vrot.slane %v6478_v46, %v6413_v8 }
 0x132   : > { %v964_v10 = vsel %vm4857_vm10, 0, %v4856_v41  ;;  %8671 = vst [vmem:[#allocation11_spill] sm:$0xff] %v6507_v2  ;;  %8672 = vst [vmem:[#allocation12_spill] sm:$0xff] %v6511_v45  ;;  %v6535_v61 = vrot.slane %v6456_v19, %v6413_v8  ;;  %v6539_v36 = vrot.slane %v6452_v55, %v6442_v30  ;;  %v6543_v24 = vrot.slane %v6070_v53, %v6442_v30 }
 0x133   : > { %v965_v22 = vsub.s32 32, %v964_v10  ;;  %v969_v18 = vsub.s32 4294967266, %v964_v10  ;;  %2545 = vbcast.lane.b32.xlu0 %v2539_v35, 264  ;;  %2541 = vbcast.lane.b32.xlu1 %v2539_v35, 256  ;;  %v966_v21 = vshll.u32 %v6394_v38, %v964_v10  ;;  %8673 = vst [vmem:[#allocation13_spill] sm:$0xff] %v6515_v7  ;;  %8674 = vst [vmem:[#allocation14_spill] sm:$0xff] %v6519_v49  ;;  %vm985_vm3 = vweird.f32 %v8682_v28 }
 0x134   : > { %v6523_v38 = vrot.slane %v6452_v55, %v6413_v8  ;;  %8676 = vst [vmem:[#allocation16_spill] sm:$0xff] %v6527_v32  ;;  %8677 = vst [vmem:[#allocation17_spill] sm:$0xff] %v6531_v27  ;;  %v6547_v31 = vrot.slane %v6478_v46, %v6442_v30  ;;  %v8683_v41 = vand.u32 2147483647, %v8682_v28  ;;  %v6613_v17 = vrot.slane %v6456_v19, %v6437_v3 }
 0x135   : > { %v967_v14 = vshrl.u32 %v949_v9, %v965_v22  ;;  %v970_v39 = vadd.s32 127, %v969_v18  ;;  %8678 = vst [vmem:[#allocation18_spill] sm:$0xff] %v6535_v61  ;;  %8679 = vst [vmem:[#allocation19_spill] sm:$0xff] %v6539_v36  ;;  %v6557_v22 = vrot.slane %v6456_v19, %v6442_v30  ;;  %v6621_v34 = vrot.slane %v6070_v53, %v6463_v43 }
 0x136   : > { %8675 = vst [vmem:[#allocation15_spill] sm:$0xff] %v6523_v38  ;;  %8680 = vst [vmem:[#allocation20_spill] sm:$0xff] %v6543_v24  ;;  %vm6551_vm14 = vcmp.le.f32.partialorder %v8683_v41, 0.7853982  ;;  %v6579_v41 = vrot.slane %v6452_v55, %v6448_v0  ;;  %vm895_vm15 = vcmp.lt.s32.totalorder %v8682_v28, 0  ;;  %v1328_v61 = vrot.slane %v6398_v1, %v6445_v50 }
 0x137   : > { %v968_v60 = vor.u32 %v967_v14, %v966_v21  ;;  %v971_v42 = vshll.u32 %v970_v39, 23  ;;  %2457 = vbcast.lane.b32.xlu0 %v2451_v20, 264  ;;  %2453 = vbcast.lane.b32.xlu1 %v2451_v20, 256  ;;  %8681 = vst [vmem:[#allocation21_spill] sm:$0xff] %v6547_v31  ;;  %8686 = vst [vmem:[#allocation5_spill] sm:$0xff] %v6557_v22  ;;  %v6561_v20 = vrot.slane %v6452_v55, %v6445_v50  ;;  %vm2677_vm6 = vcmask 261120  }
 0x138   : > { %v5671_v15 = vpop.eup %5670  ;;  %v6565_v21 = vrot.slane %v6070_v53, %v6445_v50  ;;  %v6569_v14 = vrot.slane %v6478_v46, %v6445_v50  ;;  %8691 = vst [vmem:[#allocation26_spill] sm:$0xff] %v6579_v41  ;;  %v6599_v41 = vrot.slane %v6452_v55, %v6437_v3  ;;  %8698 = vst [vmem:[#allocation33_spill] sm:$0xff] %v6613_v17  ;;  %vm4728_vm8 = vcmask 1043456  }
 0x139   : > { %v5673_v26 = vpop.eup %5672  ;;  %v889_v5 = vxor.u32 2147483648, %v5671_v15  ;;  %v972_v10 = vor.u32 4788187, %v971_v42  ;;  %v975_v9 = vcvt.s32.f32 %v968_v60  ;;  %8687 = vst [vmem:[#allocation22_spill] sm:$0xff] %v6561_v20  ;;  %v6575_v42 = vrot.slane %v6456_v19, %v6445_v50  ;;  %8700 = vst [vmem:[#allocation35_spill] sm:$0xff] %v6621_v34 }
 0x13a   : > { %v886_v18 = vxor.u32 2147483648, %v5673_v26  ;;  %8688 = vst [vmem:[#allocation23_spill] sm:$0xff] %v6565_v21  ;;  %8689 = vst [vmem:[#allocation24_spill] sm:$0xff] %v6569_v14  ;;  %v6585_v14 = vrot.slane %v6070_v53, %v6448_v0  ;;  %v8703_v34 = vsub.s32 4, %v6383_v58 }
 0x13b   : > { %v890_v39 = vsel %vm888_vm11, %v889_v5, %v5673_v26  ;;  %v973_v60 = vand.u32 2147483647, %v972_v10  ;;  %2380 = vbcast.lane.b32.xlu0 %v2374_v59, 264  ;;  %2376 = vbcast.lane.b32.xlu1 %v2374_v59, 256  ;;  %8690 = vst [vmem:[#allocation25_spill] sm:$0xff] %v6575_v42  ;;  %v6589_v26 = vrot.slane %v6478_v46, %v6448_v0  ;;  %8695 = vst [vmem:[#allocation30_spill] sm:$0xff] %v6599_v41 }
 0x13c   : > { %v887_v11 = vsel %vm885_vm12, %v5671_v15, %v886_v18  ;;  %8692 = vst [vmem:[#allocation27_spill] sm:$0xff] %v6585_v14  ;;  %v6593_v59 = vrot.slane %v6456_v19, %v6448_v0  ;;  %v6603_v15 = vrot.slane %v6070_v53, %v6437_v3  ;;  %v980_v17 = vsel %vm895_vm15, %v8703_v34, %v6383_v58 }
 0x13d   : > { %8693 = vst [vmem:[#allocation28_spill] sm:$0xff] %v6589_v26  ;;  %v891_v5 = vsel %vm884_vm5, %v887_v11, %v890_v39  ;;  %v976_v10 = vmul.f32 %v975_v9, %v973_v60  ;;  %v6609_v26 = vrot.slane %v6478_v46, %v6437_v3  ;;  %v6617_v11 = vrot.slane %v6452_v55, %v6463_v43 }
 0x13e   : > { %8694 = vst [vmem:[#allocation29_spill] sm:$0xff] %v6593_v59  ;;  %8696 = vst [vmem:[#allocation31_spill] sm:$0xff] %v6603_v15  ;;  %v892_v18 = vsel %vm882_vm13, nan, %v891_v5  ;;  %v6625_v60 = vrot.slane %v6478_v46, %v6463_v43  ;;  %v2550_v5 = vrot.slane %v6364_v6, %v6413_v8  ;;  %v8706_v59 = vld [vmem:[#allocation3_spill] sm:$0xff]  ;;  %v6656_v58 = vrot.slane %v6482_v52, %v6391_v4 }
 0x13f   : > { %8697 = vst [vmem:[#allocation32_spill] sm:$0xff] %v6609_v26  ;;  %8699 = vst [vmem:[#allocation34_spill] sm:$0xff] %v6617_v11  ;;  %v977_v9 = vxor.u32 2147483648, %v976_v10  ;;  %v998_v39 = vadd.f32 1.0, %v892_v18  ;;  %2292 = vbcast.lane.b32.xlu0 %v2286_v40, 264  ;;  %2288 = vbcast.lane.b32.xlu1 %v2286_v40, 256  ;;  %v2462_v11 = vrot.slane %v6381_v44, %v6413_v8 }
 0x140   : > { %8701 = vst [vmem:[#allocation36_spill] sm:$0xff] %v6625_v60  ;;  %v6634_v18 = vrot.slane %v6456_v19, %v6463_v43  ;;  %v8704_v60 = vld [vmem:[#allocation4_spill] sm:$0xff]  ;;  %v6648_v14 = vrot.slane %v8706_v59, %v6391_v4  ;;  %8709 = vst [vmem:[#allocation41_spill] sm:$0xff] %v6656_v58  ;;  %v6665_v34 = vrot.slane %v8706_v59, %v6413_v8 }
 0x141   : > { %v978_v40 = vsel %vm895_vm15, %v977_v9, %v976_v10  ;;  %v1002_v26 = vmul.f32 0.5, %v998_v39  ;;  %v6641_v15 = vrot.slane %v8704_v60, %v6391_v4  ;;  %v6652_v10 = vrot.slane %v6493_v33, %v6391_v4 }
 0x142   : > { %8702 = vst [vmem:[#allocation37_spill] sm:$0xff] %v6634_v18  ;;  %v981_v41 = vsel %vm6551_vm14, %v8682_v28, %v978_v40  ;;  %8707 = vst [vmem:[#allocation39_spill] sm:$0xff] %v6648_v14  ;;  %v6661_v39 = vrot.slane %v8704_v60, %v6413_v8  ;;  %v6669_v40 = vrot.slane %v6493_v33, %v6413_v8 }
 0x143   : > { %8705 = vst [vmem:[#allocation38_spill] sm:$0xff] %v6641_v15  ;;  %8708 = vst [vmem:[#allocation40_spill] sm:$0xff] %v6652_v10  ;;  %5674 = vcosq.f32 %v981_v41  ;;  %v1006_v9 = vsub.f32 %v1002_v26, %v6009_v54  ;;  %2556 = vbcast.lane.b32.xlu0 %v2550_v5, 264  ;;  %2552 = vbcast.lane.b32.xlu1 %v2550_v5, 256  ;;  %v6673_v58 = vrot.slane %v6482_v52, %v6413_v8 }
 0x144   : > { %8710 = vst [vmem:[#allocation42_spill] sm:$0xff] %v6661_v39  ;;  %8711 = vst [vmem:[#allocation43_spill] sm:$0xff] %v6665_v34  ;;  %5676 = vsinq.f32 %v981_v41  ;;  %v6677_v54 = vrot.slane %v8704_v60, %v6442_v30  ;;  %v6684_v5 = vrot.slane %v8706_v59, %v6442_v30  ;;  %v6688_v41 = vrot.slane %v6493_v33, %v6442_v30 }
 0x145   : > { %8712 = vst [vmem:[#allocation44_spill] sm:$0xff] %v6669_v40  ;;  %8713 = vst [vmem:[#allocation45_spill] sm:$0xff] %v6673_v58  ;;  %v6680_v26 = vmul.f32 %v6171_v63, %v1006_v9  ;;  %v6692_v40 = vrot.slane %v6482_v52, %v6442_v30  ;;  %v6696_v58 = vrot.slane %v8704_v60, %v6445_v50 }
 0x146   : > { %8714 = vst [vmem:[#allocation46_spill] sm:$0xff] %v6677_v54  ;;  %8715 = vst [vmem:[#allocation47_spill] sm:$0xff] %v6684_v5  ;;  %v6700_v63 = vrot.slane %v8706_v59, %v6445_v50  ;;  %v6704_v9 = vrot.slane %v6493_v33, %v6445_v50  ;;  %v6708_v5 = vrot.slane %v6482_v52, %v6445_v50 }
 0x147   : > { %8716 = vst [vmem:[#allocation48_spill] sm:$0xff] %v6688_v41  ;;  %8717 = vst [vmem:[#allocation49_spill] sm:$0xff] %v6692_v40  ;;  %v982_v41 = vsel %vm6551_vm14, 0, %v980_v17  ;;  %2468 = vbcast.lane.b32.xlu0 %v2462_v11, 264  ;;  %2464 = vbcast.lane.b32.xlu1 %v2462_v11, 256  ;;  %v6730_v35 = vrot.slane %v6680_v26, %v6448_v0  ;;  %v6734_v17 = vrot.slane %v6680_v26, %v6437_v3 }
 0x148   : > { %8718 = vst [vmem:[#allocation50_spill] sm:$0xff] %v6696_v58  ;;  %8719 = vst [vmem:[#allocation51_spill] sm:$0xff] %v6700_v63  ;;  %v6714_v58 = vrot.slane %v6680_v26, %v6391_v4  ;;  %v6718_v63 = vrot.slane %v6680_v26, %v6413_v8  ;;  %v2385_v11 = vrot.slane %v6194_v37, %v6442_v30 }
 0x149   : > { %8720 = vst [vmem:[#allocation52_spill] sm:$0xff] %v6704_v9  ;;  %8721 = vst [vmem:[#allocation53_spill] sm:$0xff] %v6708_v5  ;;  %v6722_v9 = vrot.slane %v6680_v26, %v6442_v30  ;;  %v6726_v5 = vrot.slane %v6680_v26, %v6445_v50  ;;  %v6740_v40 = vrot.slane %v8704_v60, %v6448_v0 }
 0x14a   : > { %v6744_v54 = vrot.slane %v8706_v59, %v6448_v0  ;;  %v6748_v34 = vrot.slane %v6493_v33, %v6448_v0  ;;  %v6752_v39 = vrot.slane %v6482_v52, %v6448_v0  ;;  %v6756_v10 = vrot.slane %v8704_v60, %v6437_v3 }
 0x14b   : > { %8722 = vst [vmem:[#allocation54_spill] sm:$0xff] %v6740_v40  ;;  %v6760_v14 = vrot.slane %v8706_v59, %v6437_v3  ;;  %v6764_v40 = vrot.slane %v6493_v33, %v6437_v3  ;;  %2391 = vbcast.lane.b32.xlu0 %v2385_v11, 264  ;;  %2387 = vbcast.lane.b32.xlu1 %v2385_v11, 256 }
 0x14c   : > { %8723 = vst [vmem:[#allocation55_spill] sm:$0xff] %v6744_v54  ;;  %8724 = vst [vmem:[#allocation56_spill] sm:$0xff] %v6748_v34  ;;  %v986_v54 = vand.u32 3, %v982_v41  ;;  %v6768_v34 = vrot.slane %v6482_v52, %v6437_v3  ;;  %v6784_v41 = vrot.slane %v6482_v52, %v6463_v43  ;;  %v1383_v55 = vrot.slane %v6419_v23, %v6391_v4 }
 0x14d   : > { %8725 = vst [vmem:[#allocation57_spill] sm:$0xff] %v6752_v39  ;;  %8726 = vst [vmem:[#allocation58_spill] sm:$0xff] %v6756_v10  ;;  %v6772_v39 = vrot.slane %v8704_v60, %v6463_v43  ;;  %v6776_v10 = vrot.slane %v8706_v59, %v6463_v43  ;;  %v5675_v11 = vpop.eup %5674  ;;  %v2473_v59 = vrot.slane %v6381_v44, %v6442_v30 }
 0x14e   : > { %8727 = vst [vmem:[#allocation59_spill] sm:$0xff] %v6760_v14  ;;  %8728 = vst [vmem:[#allocation60_spill] sm:$0xff] %v6764_v40  ;;  %v6780_v14 = vrot.slane %v6493_v33, %v6463_v43  ;;  %v5677_v40 = vpop.eup %5676  ;;  %v992_v15 = vxor.u32 2147483648, %v5675_v11  ;;  %vm991_vm0 = vcmp.eq.s32.totalorder %v986_v54, 2  ;;  %vm988_vm1 = vcmp.eq.s32.totalorder %v986_v54, 0 }
 0x14f   : > { %8729 = vst [vmem:[#allocation61_spill] sm:$0xff] %v6768_v34  ;;  %8730 = vst [vmem:[#allocation62_spill] sm:$0xff] %v6772_v39  ;;  %v2297_v34 = vrot.slane %v6345_v51, %v6442_v30  ;;  %v989_v60 = vxor.u32 2147483648, %v5677_v40  ;;  %vm987_vm2 = vcmp.lt.s32.totalorder %v986_v54, 2  ;;  %v2407_v54 = vrot.slane %v6194_v37, %v6448_v0 }
 0x150   : > { %8731 = vst [vmem:[#allocation63_spill] sm:$0xff] %v6776_v10  ;;  %8732 = vst [vmem:[#allocation64_spill] sm:$0xff] %v6780_v14  ;;  %v993_v10 = vsel %vm991_vm0, %v992_v15, %v5677_v40  ;;  %v2561_v14 = vrot.slane %v6364_v6, %v6442_v30  ;;  %v2396_v40 = vrot.slane %v6194_v37, %v6445_v50 }
 0x151   : > { %8733 = vst [vmem:[#allocation65_spill] sm:$0xff] %v6784_v41  ;;  %2303 = vbcast.lane.b32.xlu0 %v2297_v34, 264  ;;  %2299 = vbcast.lane.b32.xlu1 %v2297_v34, 256  ;;  %v990_v39 = vsel %vm988_vm1, %v5675_v11, %v989_v60  ;;  %v5827_v34 = vmov 1966171168  }
 0x152   : > { %v994_v41 = vsel %vm987_vm2, %v990_v39, %v993_v10  ;;  %v1639_v60 = vunpack.c.l.s4 %v5827_v34  ;;  %v2484_v10 = vrot.slane %v6381_v44, %v6445_v50 }
 0x153   : > { %v995_v52 = vsel %vm985_vm3, nan, %v994_v41  ;;  %v6818_v41 = vpop.f32.mrb[0].mxu1 }
 0x154   : > { %v999_v33 = vadd.f32 1.0, %v995_v52  ;;  %v2308_v52 = vrot.slane %v6345_v51, %v6445_v50 }
 0x155   : > { %2567 = vbcast.lane.b32.xlu0 %v2561_v14, 264  ;;  %2563 = vbcast.lane.b32.xlu1 %v2561_v14, 256  ;;  %v1640_v14 = vunpack.c.0.s8 %v1639_v60 }
 0x156   : > { %v1003_v18 = vmul.f32 0.5, %v999_v33 }
 0x158   : > { %v1007_v15 = vsub.f32 %v1003_v18, %v6014_v57  ;;  %v6806_v57 = vsub.s32 %v1640_v14, %v5914_v29  ;;  %v2583_v14 = vrot.slane %v6364_v6, %v6448_v0 }
 0x159   : > { %2479 = vbcast.lane.b32.xlu0 %v2473_v59, 264  ;;  %2475 = vbcast.lane.b32.xlu1 %v2473_v59, 256  ;;  %v2572_v59 = vrot.slane %v6364_v6, %v6445_v50 }
 0x15a   : > { %v6797_v28 = vmul.f32 %v6174_v12, %v1007_v15  ;;  %v6810_v12 = vpop.f32.mrb[0].mxu0  ;;  %v2319_v15 = vrot.slane %v6345_v51, %v6448_v0 }
 0x15b   : > { %v1176_v18 = vpop.f32.mrb[1].mxu0 }
 0x15c   : > { %v6803_v33 = vrot.slane %v6797_v28, %v6437_v3  ;;  %v1644_v39 = vrot.slane %v1176_v18, %v6806_v57 }
 0x15d   : > { %2402 = vbcast.lane.b32.xlu0 %v2396_v40, 264  ;;  %2398 = vbcast.lane.b32.xlu1 %v2396_v40, 256 }
 0x15e   : > { %v1660_v29 = vrot.slane %v1644_v39, %v6806_v57  ;;  %v1652_v11 = vcombine.high %v1644_v39, %v1644_v39 }
 0x160   : > { %v1836_v34 = vrot.slane %v1660_v29, %v6163_v25  ;;  %v1674_v60 = vrot.slane %v1652_v11, %v6806_v57  ;;  %v1682_v39 = vcombine.high %v1660_v29, %v1660_v29  ;;  %v2495_v11 = vrot.slane %v6381_v44, %v6448_v0 }
 0x161   : > { %2314 = vbcast.lane.b32.xlu0 %v2308_v52, 264  ;;  %2310 = vbcast.lane.b32.xlu1 %v2308_v52, 256  ;;  %v6829_v52 = vpop.f32.mrb[1].mxu1 }
 0x162   : > { %v6825_v40 = vadd.f32 %v6818_v41, %v1836_v34  ;;  %v1844_v21 = vrot.slane %v1682_v39, %v6163_v25 }
 0x164   : > { %v6849_v29 = vadd.f32 %v6818_v41, %v1844_v21 }
 0x165   : > { %2578 = vbcast.lane.b32.xlu0 %v2572_v59, 264  ;;  %2574 = vbcast.lane.b32.xlu1 %v2572_v59, 256  ;;  %v1840_v59 = vrot.slane %v1674_v60, %v6163_v25 }
 0x166   : > { %8734 = vst [vmem:[#allocation66_spill] sm:$0xff] %v6849_v29 }
 0x167   : > { %v6852_v20 = vadd.f32 %v1840_v59, %v6829_v52 }
 0x169   : > { %2490 = vbcast.lane.b32.xlu0 %v2484_v10, 264  ;;  %2486 = vbcast.lane.b32.xlu1 %v2484_v10, 256  ;;  %v1637_v10 = vcombine.high %v1176_v18, %v1176_v18  ;;  %v1284_v18 = vrot.slane %v6398_v1, %v6163_v25 }
 0x16b   : > { %v1651_v42 = vrot.slane %v1637_v10, %v6806_v57  ;;  %v1684_v10 = vcombine.high %v1674_v60, %v1674_v60  ;;  %v1317_v60 = vrot.slane %v6398_v1, %v6442_v30 }
 0x16d   : > { %2413 = vbcast.lane.b32.xlu0 %v2407_v54, 264  ;;  %2409 = vbcast.lane.b32.xlu1 %v2407_v54, 256  ;;  %v6833_v54 = vadd.f32 %v6818_v41, %v1840_v59  ;;  %v1848_v39 = vrot.slane %v1684_v10, %v6163_v25  ;;  %v1653_v22 = vcombine.high %v1651_v42, %v1651_v42 }
 0x16f   : > { %v6862_v31 = vadd.f32 %v6818_v41, %v1848_v39  ;;  %v6869_v36 = vadd.f32 %v1848_v39, %v6829_v52 }
 0x171   : > { %2325 = vbcast.lane.b32.xlu0 %v2319_v15, 264  ;;  %2321 = vbcast.lane.b32.xlu1 %v2319_v15, 256  ;;  %v6838_v15 = vadd.f32 %v1836_v34, %v6829_v52  ;;  %v1667_v34 = vrot.slane %v1651_v42, %v6806_v57  ;;  %8736 = vst [vmem:[#allocation68_spill] sm:$0xff] %v6862_v31  ;;  %8738 = vst [vmem:[#allocation70_spill] sm:$0xff] %v6869_v36 }
 0x172   : > { %v6876_v42 = vrot.slane %v1653_v22, %v6806_v57  ;;  %v1350_v31 = vrot.slane %v6398_v1, %v6437_v3 }
 0x173   : > { %v1852_v59 = vrot.slane %v1667_v34, %v6163_v25  ;;  %v1683_v22 = vcombine.high %v1667_v34, %v1667_v34 }
 0x175   : > { %2589 = vbcast.lane.b32.xlu0 %v2583_v14, 264  ;;  %2585 = vbcast.lane.b32.xlu1 %v2583_v14, 256  ;;  %v6844_v14 = vrot.slane %v6194_v37, %v6437_v3  ;;  %v6866_v24 = vadd.f32 %v6818_v41, %v1852_v59  ;;  %v6883_v10 = vadd.f32 %v1852_v59, %v6829_v52 }
 0x176   : > { %v1860_v27 = vrot.slane %v1683_v22, %v6163_v25 }
 0x177   : > { %8737 = vst [vmem:[#allocation69_spill] sm:$0xff] %v6866_v24  ;;  %8739 = vst [vmem:[#allocation71_spill] sm:$0xff] %v6883_v10 }
 0x178   : > { %v6898_v59 = vpop.permute.xlu0 %2358  ;;  %v6903_v38 = vadd.f32 %v6818_v41, %v1860_v27 }
 0x179   : > { %2501 = vbcast.lane.b32.xlu0 %v2495_v11, 264  ;;  %2497 = vbcast.lane.b32.xlu1 %v2495_v11, 256  ;;  %v6858_v11 = vadd.f32 %v1844_v21, %v6829_v52  ;;  %v1693_v21 = vrot.slane %v6810_v12, %v6806_v57  ;;  %8742 = vst [vmem:[#allocation74_spill] sm:$0xff] %v6898_v59 }
 0x17a   : > { %8744 = vst [vmem:[#allocation76_spill] sm:$0xff] %v6903_v38  ;;  %v6909_v49 = vpop.f32.mrb[2].mxu0 }
 0x17b   : > { %8735 = vst [vmem:[#allocation67_spill] sm:$0xff] %v6858_v11  ;;  %v6916_v22 = vpop.f32.mrb[3].mxu0  ;;  %v1701_v38 = vcombine.high %v1693_v21, %v1693_v21  ;;  %v6923_v7 = vpop.f32.mrb[2].mxu1 }
 0x17c   : > { %v1742_v10 = vrot.slane %v6916_v22, %v6806_v57 }
 0x17d   : > { %2420 = vbcast.lane.b32.xlu1 %v6844_v14, 256  ;;  %1290 = vbcast.lane.b32.xlu0 %v1284_v18, 264 }
 0x181   : > { %1301 = vbcast.lane.b32.xlu0 %v6425_v62, 264  ;;  %1286 = vbcast.lane.b32.xlu1 %v1284_v18, 256  ;;  %v1856_v18 = vrot.slane %v6876_v42, %v6163_v25 }
 0x183   : > { %v6890_v39 = vadd.f32 %v6818_v41, %v1856_v18  ;;  %v6896_v32 = vadd.f32 %v1856_v18, %v6829_v52 }
 0x185   : > { %1312 = vbcast.lane.b32.xlu0 %v6429_v16, 264  ;;  %1297 = vbcast.lane.b32.xlu1 %v6425_v62, 256  ;;  %v6887_v62 = vrot.slane %v1693_v21, %v6806_v57  ;;  %8740 = vst [vmem:[#allocation72_spill] sm:$0xff] %v6890_v39  ;;  %8741 = vst [vmem:[#allocation73_spill] sm:$0xff] %v6896_v32  ;;  %v1339_v39 = vrot.slane %v6398_v1, %v6448_v0 }
 0x186   : > { %v6919_v32 = vadd.f32 %v1860_v27, %v6829_v52  ;;  %v6933_v27 = vrot.slane %v1742_v10, %v6806_v57 }
 0x187   : > { %v1868_v34 = vrot.slane %v6887_v62, %v6163_v25 }
 0x188   : > { %8745 = vst [vmem:[#allocation77_spill] sm:$0xff] %v6919_v32  ;;  %v6938_v32 = vpop.f32.mrb[3].mxu1  ;;  %v1900_v46 = vrot.slane %v6933_v27, %v6163_v25 }
 0x189   : > { %1323 = vbcast.lane.b32.xlu0 %v1317_v60, 264  ;;  %1308 = vbcast.lane.b32.xlu1 %v6429_v16, 256  ;;  %v6900_v16 = vpop.permute.xlu1 %2354  ;;  %v6912_v18 = vadd.f32 %v6818_v41, %v1868_v34  ;;  %v6942_v19 = vadd.f32 %v1868_v34, %v6829_v52 }
 0x18a   : > { %8743 = vst [vmem:[#allocation75_spill] sm:$0xff] %v6900_v16 }
 0x18d   : > { %1334 = vbcast.lane.b32.xlu0 %v1328_v61, 264  ;;  %1319 = vbcast.lane.b32.xlu1 %v1317_v60, 256  ;;  %v1791_v60 = vrot.slane %v6909_v49, %v6806_v57 }
 0x18f   : > { %v1807_v24 = vrot.slane %v1791_v60, %v6806_v57  ;;  %v1799_v21 = vcombine.high %v1791_v60, %v1791_v60  ;;  %v6956_v60 = vadd.f32 %v6923_v7, %v1900_v46 }
 0x191   : > { %1345 = vbcast.lane.b32.xlu0 %v1339_v39, 264  ;;  %1330 = vbcast.lane.b32.xlu1 %v1328_v61, 256  ;;  %v6926_v45 = vpop.permute.xlu0 %2270  ;;  %v6928_v2 = vpop.permute.xlu1 %2266  ;;  %v6936_v61 = vrot.slane %v1701_v38, %v6806_v57  ;;  %v1932_v36 = vrot.slane %v1807_v24, %v6163_v25  ;;  %v6962_v34 = vrot.slane %v1799_v21, %v6806_v57 }
 0x192   : > { %8746 = vst [vmem:[#allocation78_spill] sm:$0xff] %v6926_v45  ;;  %8747 = vst [vmem:[#allocation79_spill] sm:$0xff] %v6928_v2  ;;  %v1548_v45 = vrot.slane %v6797_v28, %v6163_v25 }
 0x193   : > { %v6953_v38 = vadd.f32 %v6923_v7, %v1932_v36  ;;  %v6959_v53 = vadd.f32 %v1932_v36, %v6938_v32  ;;  %v6976_v36 = vadd.f32 %v1900_v46, %v6938_v32 }
 0x195   : > { %1356 = vbcast.lane.b32.xlu0 %v1350_v31, 264  ;;  %1341 = vbcast.lane.b32.xlu1 %v1339_v39, 256  ;;  %v6946_v3 = vpop.permute.xlu0 %2534  ;;  %v6948_v16 = vpop.permute.xlu1 %2530  ;;  %v1372_v39 = vrot.slane %v6419_v23, %v6163_v25  ;;  %8752 = vst [vmem:[#allocation84_spill] sm:$0xff] %v6976_v36 }
 0x196   : > { %8748 = vst [vmem:[#allocation80_spill] sm:$0xff] %v6946_v3  ;;  %8749 = vst [vmem:[#allocation81_spill] sm:$0xff] %v6948_v16  ;;  %v1750_v3 = vcombine.high %v1742_v10, %v1742_v10  ;;  %v1872_v16 = vrot.slane %v6936_v61, %v6163_v25  ;;  %v1936_v10 = vrot.slane %v6962_v34, %v6163_v25 }
 0x198   : > { %v6973_v11 = vadd.f32 %v6818_v41, %v1872_v16  ;;  %v6990_v2 = vadd.f32 %v6923_v7, %v1936_v10  ;;  %v6993_v46 = vadd.f32 %v1872_v16, %v6829_v52  ;;  %v7009_v16 = vadd.f32 %v1936_v10, %v6938_v32 }
 0x199   : > { %1378 = vbcast.lane.b32.xlu0 %v1372_v39, 264  ;;  %1352 = vbcast.lane.b32.xlu1 %v1350_v31, 256  ;;  %v6966_v29 = vpop.permute.xlu0 %2446  ;;  %v6968_v59 = vpop.permute.xlu1 %2442  ;;  %v6979_v31 = vrot.slane %v1750_v3, %v6806_v57  ;;  %v1731_v3 = vcombine.high %v6887_v62, %v6887_v62 }
 0x19a   : > { %8750 = vst [vmem:[#allocation82_spill] sm:$0xff] %v6966_v29  ;;  %8751 = vst [vmem:[#allocation83_spill] sm:$0xff] %v6968_v59  ;;  %v1460_v29 = vrot.slane %v6680_v26, %v6163_v25 }
 0x19b   : > { %8755 = vst [vmem:[#allocation87_spill] sm:$0xff] %v6990_v2  ;;  %8756 = vst [vmem:[#allocation88_spill] sm:$0xff] %v6993_v46  ;;  %v1876_v62 = vrot.slane %v1731_v3, %v6163_v25 }
 0x19d   : > { %1554 = vbcast.lane.b32.xlu0 %v1548_v45, 264  ;;  %1374 = vbcast.lane.b32.xlu1 %v1372_v39, 256  ;;  %v6983_v21 = vpop.permute.xlu0 %2369  ;;  %v6985_v59 = vpop.permute.xlu1 %2365  ;;  %v1904_v39 = vrot.slane %v6979_v31, %v6163_v25 }
 0x19e   : > { %8753 = vst [vmem:[#allocation85_spill] sm:$0xff] %v6983_v21  ;;  %8754 = vst [vmem:[#allocation86_spill] sm:$0xff] %v6985_v59 }
 0x19f   : > { %v7006_v2 = vadd.f32 %v6923_v7, %v1904_v39 }
 0x1a1   : > { %1466 = vbcast.lane.b32.xlu0 %v1460_v29, 264  ;;  %1550 = vbcast.lane.b32.xlu1 %v1548_v45, 256  ;;  %v6999_v21 = vpop.permute.xlu0 %2281  ;;  %v7001_v59 = vpop.permute.xlu1 %2277  ;;  %8759 = vst [vmem:[#allocation91_spill] sm:$0xff] %v7006_v2  ;;  %v1829_v45 = vcombine.high %v1807_v24, %v1807_v24  ;;  %v7022_v2 = vadd.f32 %v1904_v39, %v6938_v32 }
 0x1a2   : > { %8757 = vst [vmem:[#allocation89_spill] sm:$0xff] %v6999_v21  ;;  %8758 = vst [vmem:[#allocation90_spill] sm:$0xff] %v7001_v59  ;;  %v1559_v21 = vrot.slane %v6797_v28, %v6391_v4  ;;  %v7019_v59 = vadd.f32 %v6818_v41, %v1876_v62  ;;  %v1780_v24 = vcombine.high %v6933_v27, %v6933_v27 }
 0x1a3   : > { %v7035_v4 = vadd.f32 %v1876_v62, %v6829_v52 }
 0x1a5   : > { %1389 = vbcast.lane.b32.xlu0 %v1383_v55, 264  ;;  %1462 = vbcast.lane.b32.xlu1 %v1460_v29, 256  ;;  %v7012_v46 = vpop.permute.xlu0 %2545  ;;  %v7014_v36 = vpop.permute.xlu1 %2541  ;;  %v1940_v29 = vrot.slane %v1829_v45, %v6163_v25  ;;  %v1394_v45 = vrot.slane %v6419_v23, %v6413_v8 }
 0x1a6   : > { %8760 = vst [vmem:[#allocation92_spill] sm:$0xff] %v7012_v46  ;;  %8761 = vst [vmem:[#allocation93_spill] sm:$0xff] %v7014_v36 }
 0x1a7   : > { %v7032_v36 = vadd.f32 %v6923_v7, %v1940_v29  ;;  %v7051_v62 = vadd.f32 %v1940_v29, %v6938_v32 }
 0x1a9   : > { %1565 = vbcast.lane.b32.xlu0 %v1559_v21, 264  ;;  %1385 = vbcast.lane.b32.xlu1 %v1383_v55, 256  ;;  %v7027_v10 = vpop.permute.xlu0 %2457  ;;  %v7029_v3 = vpop.permute.xlu1 %2453  ;;  %v1908_v55 = vrot.slane %v1780_v24, %v6163_v25 }
 0x1aa   : > { %8762 = vst [vmem:[#allocation94_spill] sm:$0xff] %v7027_v10  ;;  %8763 = vst [vmem:[#allocation95_spill] sm:$0xff] %v7029_v3  ;;  %v1686_v10 = vcombine.high %v6810_v12, %v6810_v12 }
 0x1ab   : > { %v7046_v3 = vadd.f32 %v6923_v7, %v1908_v55  ;;  %v7065_v29 = vadd.f32 %v1908_v55, %v6938_v32 }
 0x1ac   : > { %v1700_v12 = vrot.slane %v1686_v10, %v6806_v57 }
 0x1ad   : > { %1477 = vbcast.lane.b32.xlu0 %v6714_v58, 264  ;;  %1561 = vbcast.lane.b32.xlu1 %v1559_v21, 256  ;;  %v7039_v39 = vpop.permute.xlu0 %2380  ;;  %v7041_v27 = vpop.permute.xlu1 %2376  ;;  %v1733_v21 = vcombine.high %v6936_v61, %v6936_v61 }
 0x1ae   : > { %8764 = vst [vmem:[#allocation96_spill] sm:$0xff] %v7039_v39  ;;  %8765 = vst [vmem:[#allocation97_spill] sm:$0xff] %v7041_v27  ;;  %v1570_v39 = vrot.slane %v6797_v28, %v6413_v8  ;;  %v7080_v55 = vrot.slane %v1700_v12, %v6806_v57 }
 0x1af   : > { %v1880_v46 = vrot.slane %v1733_v21, %v6163_v25 }
 0x1b1   : > { %1400 = vbcast.lane.b32.xlu0 %v1394_v45, 264  ;;  %1473 = vbcast.lane.b32.xlu1 %v6714_v58, 256  ;;  %v7056_v24 = vpop.permute.xlu0 %2292  ;;  %v7058_v27 = vpop.permute.xlu1 %2288  ;;  %v1784_v58 = vcombine.high %v6909_v49, %v6909_v49  ;;  %v7070_v61 = vadd.f32 %v6818_v41, %v1880_v46  ;;  %v7085_v49 = vadd.f32 %v1880_v46, %v6829_v52 }
 0x1b2   : > { %8766 = vst [vmem:[#allocation98_spill] sm:$0xff] %v7056_v24  ;;  %8767 = vst [vmem:[#allocation99_spill] sm:$0xff] %v7058_v27  ;;  %v1831_v24 = vcombine.high %v6962_v34, %v6962_v34 }
 0x1b3   : > { %8770 = vst [vmem:[#allocation102_spill] sm:$0xff] %v7085_v49  ;;  %v1798_v34 = vrot.slane %v1784_v58, %v6806_v57 }
 0x1b4   : > { %v1944_v10 = vrot.slane %v1831_v24, %v6163_v25  ;;  %v1782_v24 = vcombine.high %v6979_v31, %v6979_v31 }
 0x1b5   : > { %1576 = vbcast.lane.b32.xlu0 %v1570_v39, 264  ;;  %1396 = vbcast.lane.b32.xlu1 %v1394_v45, 256  ;;  %v7074_v27 = vpop.permute.xlu0 %2556  ;;  %v7076_v8 = vpop.permute.xlu1 %2552  ;;  %v1735_v45 = vcombine.high %v6916_v22, %v6916_v22  ;;  %v1405_v22 = vrot.slane %v6419_v23, %v6442_v30  ;;  %v7107_v58 = vrot.slane %v1798_v34, %v6806_v57 }
 0x1b6   : > { %8768 = vst [vmem:[#allocation100_spill] sm:$0xff] %v7074_v27  ;;  %8769 = vst [vmem:[#allocation101_spill] sm:$0xff] %v7076_v8  ;;  %v7090_v21 = vadd.f32 %v6923_v7, %v1944_v10  ;;  %v1912_v46 = vrot.slane %v1782_v24, %v6163_v25 }
 0x1b7   : > { %v1749_v49 = vrot.slane %v1735_v45, %v6806_v57 }
 0x1b8   : > { %8771 = vst [vmem:[#allocation103_spill] sm:$0xff] %v7090_v21  ;;  %v7110_v31 = vadd.f32 %v6923_v7, %v1912_v46 }
 0x1b9   : > { %1488 = vbcast.lane.b32.xlu0 %v6718_v63, 264  ;;  %1572 = vbcast.lane.b32.xlu1 %v1570_v39, 256  ;;  %v7094_v8 = vpop.permute.xlu0 %2468  ;;  %v7096_v27 = vpop.permute.xlu1 %2464  ;;  %v7103_v39 = vadd.f32 %v1944_v10, %v6938_v32  ;;  %v1581_v10 = vrot.slane %v6797_v28, %v6442_v30 }
 0x1ba   : > { %8772 = vst [vmem:[#allocation104_spill] sm:$0xff] %v7094_v8  ;;  %8773 = vst [vmem:[#allocation105_spill] sm:$0xff] %v7096_v27  ;;  %v1884_v27 = vrot.slane %v7080_v55, %v6163_v25 }
 0x1bb   : > { %8774 = vst [vmem:[#allocation106_spill] sm:$0xff] %v7103_v39  ;;  %8775 = vst [vmem:[#allocation107_spill] sm:$0xff] %v7110_v31  ;;  %v7127_v39 = vrot.slane %v1749_v49, %v6806_v57  ;;  %v1948_v31 = vrot.slane %v7107_v58, %v6163_v25 }
 0x1bc   : > { %v7121_v45 = vadd.f32 %v6818_v41, %v1884_v27 }
 0x1bd   : > { %1411 = vbcast.lane.b32.xlu0 %v1405_v22, 264  ;;  %1484 = vbcast.lane.b32.xlu1 %v6718_v63, 256  ;;  %v7114_v8 = vpop.permute.xlu0 %2391  ;;  %v7116_v24 = vpop.permute.xlu1 %2387  ;;  %v7124_v63 = vadd.f32 %v1912_v46, %v6938_v32  ;;  %v7136_v30 = vadd.f32 %v6923_v7, %v1948_v31  ;;  %v1916_v46 = vrot.slane %v7127_v39, %v6163_v25 }
 0x1be   : > { %8776 = vst [vmem:[#allocation108_spill] sm:$0xff] %v7114_v8  ;;  %8777 = vst [vmem:[#allocation109_spill] sm:$0xff] %v7116_v24 }
 0x1bf   : > { %8778 = vst [vmem:[#allocation110_spill] sm:$0xff] %v7121_v45  ;;  %8779 = vst [vmem:[#allocation111_spill] sm:$0xff] %v7124_v63  ;;  %v7139_v45 = vadd.f32 %v1884_v27, %v6829_v52  ;;  %v7154_v27 = vadd.f32 %v1948_v31, %v6938_v32  ;;  %v1751_v31 = vcombine.high %v1749_v49, %v1749_v49 }
 0x1c0   : > { %8782 = vst [vmem:[#allocation114_spill] sm:$0xff] %v7136_v30 }
 0x1c1   : > { %1587 = vbcast.lane.b32.xlu0 %v1581_v10, 264  ;;  %1407 = vbcast.lane.b32.xlu1 %v1405_v22, 256  ;;  %8783 = vst [vmem:[#allocation115_spill] sm:$0xff] %v7139_v45  ;;  %v1702_v22 = vcombine.high %v1700_v12, %v1700_v12  ;;  %v1800_v12 = vcombine.high %v1798_v34, %v1798_v34 }
 0x1c2   : > { %v7188_v49 = vrot.slane %v1751_v31, %v6806_v57 }
 0x1c3   : > { %v7131_v8 = vpop.permute.xlu0 %2303  ;;  %v7133_v24 = vpop.permute.xlu1 %2299  ;;  %v7172_v34 = vrot.slane %v1800_v12, %v6806_v57 }
 0x1c4   : > { %8780 = vst [vmem:[#allocation112_spill] sm:$0xff] %v7131_v8  ;;  %8781 = vst [vmem:[#allocation113_spill] sm:$0xff] %v7133_v24  ;;  %v1416_v8 = vrot.slane %v6419_v23, %v6445_v50  ;;  %v7151_v24 = vadd.f32 %v6923_v7, %v1916_v46 }
 0x1c5   : > { %1499 = vbcast.lane.b32.xlu0 %v6722_v9, 264  ;;  %1583 = vbcast.lane.b32.xlu1 %v1581_v10, 256  ;;  %v1730_v10 = vrot.slane %v1702_v22, %v6806_v57  ;;  %v1732_v57 = vcombine.high %v7080_v55, %v7080_v55  ;;  %v1830_v55 = vcombine.high %v7107_v58, %v7107_v58 }
 0x1c6   : > { %8786 = vst [vmem:[#allocation118_spill] sm:$0xff] %v7151_v24  ;;  %v7166_v24 = vadd.f32 %v1916_v46, %v6938_v32 }
 0x1c7   : > { %v7144_v63 = vpop.permute.xlu0 %2567  ;;  %v7146_v21 = vpop.permute.xlu1 %2563  ;;  %v1888_v30 = vrot.slane %v1730_v10, %v6163_v25 }
 0x1c8   : > { %8784 = vst [vmem:[#allocation116_spill] sm:$0xff] %v7144_v63  ;;  %8785 = vst [vmem:[#allocation117_spill] sm:$0xff] %v7146_v21  ;;  %v1592_v21 = vrot.slane %v6797_v28, %v6445_v50  ;;  %v1952_v50 = vrot.slane %v7172_v34, %v6163_v25 }
 0x1c9   : > { %1422 = vbcast.lane.b32.xlu0 %v1416_v8, 264  ;;  %1495 = vbcast.lane.b32.xlu1 %v6722_v9, 256  ;;  %v7169_v9 = vadd.f32 %v6818_v41, %v1888_v30 }
 0x1cb   : > { %v7158_v45 = vpop.permute.xlu0 %2479  ;;  %v7160_v63 = vpop.permute.xlu1 %2475 }
 0x1cc   : > { %8787 = vst [vmem:[#allocation119_spill] sm:$0xff] %v7158_v45  ;;  %8788 = vst [vmem:[#allocation120_spill] sm:$0xff] %v7160_v63  ;;  %v7181_v45 = vadd.f32 %v1888_v30, %v6829_v52  ;;  %v1920_v30 = vrot.slane %v7188_v49, %v6163_v25 }
 0x1cd   : > { %1598 = vbcast.lane.b32.xlu0 %v1592_v21, 264  ;;  %1418 = vbcast.lane.b32.xlu1 %v1416_v8, 256  ;;  %v7185_v8 = vadd.f32 %v6923_v7, %v1952_v50 }
 0x1ce   : > { %8791 = vst [vmem:[#allocation123_spill] sm:$0xff] %v7181_v45  ;;  %v1892_v45 = vrot.slane %v1732_v57, %v6163_v25 }
 0x1cf   : > { %v7174_v22 = vpop.permute.xlu0 %2402  ;;  %v7176_v63 = vpop.permute.xlu1 %2398 }
 0x1d0   : > { %8789 = vst [vmem:[#allocation121_spill] sm:$0xff] %v7174_v22  ;;  %8790 = vst [vmem:[#allocation122_spill] sm:$0xff] %v7176_v63  ;;  %v1427_v63 = vrot.slane %v6419_v23, %v6448_v0  ;;  %v7199_v22 = vadd.f32 %v1952_v50, %v6938_v32  ;;  %v7215_v50 = vadd.f32 %v1920_v30, %v6938_v32 }
 0x1d1   : > { %1510 = vbcast.lane.b32.xlu0 %v6726_v5, 264  ;;  %1594 = vbcast.lane.b32.xlu1 %v1592_v21, 256  ;;  %v7203_v21 = vadd.f32 %v6923_v7, %v1920_v30  ;;  %v1781_v30 = vcombine.high %v7127_v39, %v7127_v39 }
 0x1d2   : > { %8794 = vst [vmem:[#allocation126_spill] sm:$0xff] %v7199_v22 }
 0x1d3   : > { %v7190_v46 = vpop.permute.xlu0 %2314  ;;  %v7192_v12 = vpop.permute.xlu1 %2310 }
 0x1d4   : > { %8792 = vst [vmem:[#allocation124_spill] sm:$0xff] %v7190_v46  ;;  %8793 = vst [vmem:[#allocation125_spill] sm:$0xff] %v7192_v12  ;;  %v1603_v12 = vrot.slane %v6797_v28, %v6448_v0  ;;  %v7228_v0 = vadd.f32 %v1892_v45, %v6829_v52 }
 0x1d5   : > { %1433 = vbcast.lane.b32.xlu0 %v1427_v63, 264  ;;  %1506 = vbcast.lane.b32.xlu1 %v6726_v5, 256  ;;  %v7218_v5 = vadd.f32 %v6818_v41, %v1892_v45 }
 0x1d7   : > { %v7207_v31 = vpop.permute.xlu0 %2578  ;;  %v7209_v46 = vpop.permute.xlu1 %2574  ;;  %8797 = vst [vmem:[#allocation129_spill] sm:$0xff] %v7218_v5  ;;  %v1924_v5 = vrot.slane %v1781_v30, %v6163_v25 }
 0x1d8   : > { %8795 = vst [vmem:[#allocation127_spill] sm:$0xff] %v7207_v31  ;;  %8796 = vst [vmem:[#allocation128_spill] sm:$0xff] %v7209_v46  ;;  %v1956_v46 = vrot.slane %v1830_v55, %v6163_v25 }
 0x1d9   : > { %1609 = vbcast.lane.b32.xlu0 %v1603_v12, 264  ;;  %1429 = vbcast.lane.b32.xlu1 %v1427_v63, 256  ;;  %v7247_v45 = vadd.f32 %v6923_v7, %v1924_v5 }
 0x1da   : > { %v7232_v63 = vadd.f32 %v6923_v7, %v1956_v46  ;;  %v7242_v55 = vadd.f32 %v1956_v46, %v6938_v32 }
 0x1db   : > { %v7222_v22 = vpop.permute.xlu0 %2490  ;;  %v7224_v31 = vpop.permute.xlu1 %2486  ;;  %8801 = vst [vmem:[#allocation133_spill] sm:$0xff] %v7247_v45 }
 0x1dc   : > { %8798 = vst [vmem:[#allocation130_spill] sm:$0xff] %v7232_v63 }
 0x1dd   : > { %1521 = vbcast.lane.b32.xlu0 %v6730_v35, 264  ;;  %1605 = vbcast.lane.b32.xlu1 %v1603_v12, 256  ;;  %v1734_v12 = vcombine.high %v1730_v10, %v1730_v10 }
 0x1df   : > { %v7236_v57 = vpop.permute.xlu0 %2413  ;;  %v7238_v58 = vpop.permute.xlu1 %2409 }
 0x1e0   : > { %8799 = vst [vmem:[#allocation131_spill] sm:$0xff] %v7236_v57  ;;  %8800 = vst [vmem:[#allocation132_spill] sm:$0xff] %v7238_v58  ;;  %v1896_v57 = vrot.slane %v1734_v12, %v6163_v25  ;;  %v7255_v58 = vadd.f32 %v1924_v5, %v6938_v32  ;;  %v1832_v5 = vcombine.high %v7172_v34, %v7172_v34 }
 0x1e1   : > { %1444 = vbcast.lane.b32.xlu0 %v6460_v48, 264  ;;  %1517 = vbcast.lane.b32.xlu1 %v6730_v35, 256  ;;  %v1685_v35 = vcombine.high %v6876_v42, %v6876_v42 }
 0x1e2   : > { %8802 = vst [vmem:[#allocation134_spill] sm:$0xff] %v7255_v58  ;;  %v7260_v46 = vadd.f32 %v6818_v41, %v1896_v57  ;;  %v7270_v12 = vadd.f32 %v1896_v57, %v6829_v52  ;;  %v1960_v57 = vrot.slane %v1832_v5, %v6163_v25 }
 0x1e3   : > { %v7249_v63 = vpop.permute.xlu0 %2325  ;;  %v7251_v39 = vpop.permute.xlu1 %2321  ;;  %v1864_v45 = vrot.slane %v1685_v35, %v6163_v25  ;;  %v1449_v35 = vrot.slane %v6419_v23, %v6463_v43  ;;  %v1361_v23 = vrot.slane %v6398_v1, %v6463_v43 }
 0x1e4   : > { %8803 = vst [vmem:[#allocation135_spill] sm:$0xff] %v7260_v46  ;;  %8804 = vst [vmem:[#allocation136_spill] sm:$0xff] %v7270_v12 }
 0x1e5   : > { %1620 = vbcast.lane.b32.xlu0 %v6803_v33, 264  ;;  %1440 = vbcast.lane.b32.xlu1 %v6460_v48, 256  ;;  %v7275_v48 = vadd.f32 %v6818_v41, %v1864_v45  ;;  %v7287_v12 = vadd.f32 %v1864_v45, %v6829_v52  ;;  %v1783_v41 = vcombine.high %v7188_v49, %v7188_v49 }
 0x1e6   : > { %v7301_v52 = vadd.f32 %v1960_v57, %v6938_v32  ;;  %v1625_v49 = vrot.slane %v6797_v28, %v6463_v43 }
 0x1e7   : > { %v7264_v10 = vpop.permute.xlu0 %2589  ;;  %v7266_v30 = vpop.permute.xlu1 %2585  ;;  %8805 = vst [vmem:[#allocation137_spill] sm:$0xff] %v7275_v48  ;;  %8806 = vst [vmem:[#allocation138_spill] sm:$0xff] %v7287_v12  ;;  %v1928_v5 = vrot.slane %v1783_v41, %v6163_v25 }
 0x1e8   : > { %8809 = vst [vmem:[#allocation141_spill] sm:$0xff] %v7301_v52 }
 0x1e9   : > { %1532 = vbcast.lane.b32.xlu0 %v6734_v17, 264  ;;  %1616 = vbcast.lane.b32.xlu1 %v6803_v33, 256  ;;  %v7291_v33 = vadd.f32 %v6923_v7, %v1960_v57  ;;  %v7309_v12 = vadd.f32 %v1928_v5, %v6938_v32  ;;  %v1537_v57 = vrot.slane %v6680_v26, %v6463_v43 }
 0x1eb   : > { %v7279_v42 = vpop.permute.xlu0 %2501  ;;  %v7281_v46 = vpop.permute.xlu1 %2497  ;;  %8807 = vst [vmem:[#allocation139_spill] sm:$0xff] %v7291_v33  ;;  %8811 = vst [vmem:[#allocation143_spill] sm:$0xff] %v7309_v12 }
 0x1ed   : > { %1455 = vbcast.lane.b32.xlu0 %v1449_v35, 264  ;;  %1528 = vbcast.lane.b32.xlu1 %v6734_v17, 256  ;;  %v7304_v17 = vadd.f32 %v6923_v7, %v1928_v5 }
 0x1ef   : > { %v7295_v34 = vpop.permute.xlu1 %2420  ;;  %v1291_v48 = vpop.permute.xlu0 %1290  ;;  %8810 = vst [vmem:[#allocation142_spill] sm:$0xff] %v7304_v17 }
 0x1f0   : > { %8808 = vst [vmem:[#allocation140_spill] sm:$0xff] %v7295_v34 }
 0x1f1   : > { %1367 = vbcast.lane.b32.xlu0 %v1361_v23, 264  ;;  %1451 = vbcast.lane.b32.xlu1 %v1449_v35, 256 }
 0x1f3   : > { %v1302_v45 = vpop.permute.xlu0 %1301  ;;  %v1287_v33 = vpop.permute.xlu1 %1286 }
 0x1f4   : > { %v2057_v5 = vmul.f32 %v6838_v15, %v1287_v33  ;;  %v2429_v15 = vrot.slane %v6194_v37, %v6463_v43 }
 0x1f5   : > { %1631 = vbcast.lane.b32.xlu0 %v1625_v49, 264  ;;  %1363 = vbcast.lane.b32.xlu1 %v1361_v23, 256 }
 0x1f7   : > { %v7311_v1 = vpop.permute.xlu0 %1312  ;;  %v1298_v41 = vpop.permute.xlu1 %1297 }
 0x1f8   : > { %v2059_v37 = vmul.f32 %v6852_v20, %v1298_v41 }
 0x1f9   : > { %1543 = vbcast.lane.b32.xlu0 %v1537_v57, 264  ;;  %1627 = vbcast.lane.b32.xlu1 %v1625_v49, 256 }
 0x1fb   : > { %v7315_v7 = vpop.permute.xlu0 %1323  ;;  %v7317_v35 = vpop.permute.xlu1 %1308 }
 0x1fd   : > { %2424 = vbcast.lane.b32.xlu0 %v6844_v14, 264  ;;  %1539 = vbcast.lane.b32.xlu1 %v1537_v57, 256  ;;  %v2058_v57 = vmul.f32 %v6825_v40, %v1291_v48 }
 0x1ff   : > { %v7320_v28 = vpop.permute.xlu0 %1334  ;;  %v7322_v32 = vpop.permute.xlu1 %1319 }
 0x201   : > { %2336 = vbcast.lane.b32.xlu0 %v6469_v13, 264  ;;  %2332 = vbcast.lane.b32.xlu1 %v6469_v13, 256  ;;  %v7341_v13 = vld [vmem:[%s8481_s5] ss:$0 sm:$0xff] }
 0x202   : > { %v2128_v12 = vadd.f32 %v7341_v13, %v2057_v5  ;;  %v2129_v33 = vadd.f32 %v7341_v13, %v2058_v57  ;;  %v2060_v57 = vmul.f32 %v6833_v54, %v1302_v45  ;;  %v2130_v20 = vadd.f32 %v7341_v13, %v2059_v37  ;;  %v8814_v37 = vld [vmem:[#allocation6_spill] sm:$0xff] }
 0x203   : > { %v7326_v23 = vpop.permute.xlu0 %1345  ;;  %v7328_v26 = vpop.permute.xlu1 %1330 }
 0x204   : > { %5678 = vtanh.f32 %v2128_v12  ;;  %v2131_v54 = vadd.f32 %v7341_v13, %v2060_v57  ;;  %v8816_v57 = vld [vmem:[#allocation87_spill] sm:$0xff] }
 0x205   : > { %2600 = vbcast.lane.b32.xlu0 %v6473_v47, 264  ;;  %2596 = vbcast.lane.b32.xlu1 %v6473_v47, 256  ;;  %5680 = vtanh.f32 %v2129_v33 }
 0x207   : > { %v7333_v14 = vpop.permute.xlu0 %1356  ;;  %v7335_v49 = vpop.permute.xlu1 %1341 }
 0x209   : > { %2512 = vbcast.lane.b32.xlu0 %v6486_v56, 264  ;;  %2508 = vbcast.lane.b32.xlu1 %v6486_v56, 256  ;;  %v2341_v56 = vrot.slane %v6345_v51, %v6463_v43  ;;  %v2605_v51 = vrot.slane %v6364_v6, %v6463_v43  ;;  %v2517_v6 = vrot.slane %v6381_v44, %v6463_v43 }
 0x20b   : > { %v1379_v47 = vpop.permute.xlu0 %1378  ;;  %v7346_v17 = vpop.permute.xlu1 %1352 }
 0x20c   : > { %v2074_v40 = vmul.f32 %v6912_v18, %v1379_v47 }
 0x20d   : > { %2435 = vbcast.lane.b32.xlu0 %v2429_v15, 264  ;;  %2431 = vbcast.lane.b32.xlu1 %v2429_v15, 256 }
 0x20e   : > { %v2145_v48 = vadd.f32 %v7341_v13, %v2074_v40  ;;  %v7371_v41 = vpop.eup %5678 }
 0x20f   : > { %v1555_v52 = vpop.permute.xlu0 %1554  ;;  %v1375_v34 = vpop.permute.xlu1 %1374  ;;  %8812 = vst [vmem:[#allocation144_spill] sm:$0xff] %v7371_v41 }
 0x210   : > { %v2106_v5 = vmul.f32 %v6953_v38, %v1555_v52  ;;  %v2073_v58 = vmul.f32 %v6942_v19, %v1375_v34  ;;  %5682 = vtanh.f32 %v2145_v48  ;;  %v7375_v40 = vpop.eup %5680 }
 0x211   : > { %2347 = vbcast.lane.b32.xlu0 %v2341_v56, 264  ;;  %2343 = vbcast.lane.b32.xlu1 %v2341_v56, 256 }
 0x212   : > { %v2177_v18 = vadd.f32 %v7341_v13, %v2106_v5  ;;  %v2144_v12 = vadd.f32 %v7341_v13, %v2073_v58 }
 0x213   : > { %v1467_v47 = vpop.permute.xlu0 %1466  ;;  %v1551_v15 = vpop.permute.xlu1 %1550 }
 0x214   : > { %5684 = vtanh.f32 %v2177_v18  ;;  %v2090_v38 = vmul.f32 %v6956_v60, %v1467_v47  ;;  %v2105_v19 = vmul.f32 %v6959_v53, %v1551_v15  ;;  %v8813_v60 = vld [vmem:[#allocation84_spill] sm:$0xff]  ;;  %v8815_v18 = vld [vmem:[#allocation79_spill] sm:$0xff] }
 0x215   : > { %5686 = vtanh.f32 %v2144_v12  ;;  %2611 = vbcast.lane.b32.xlu0 %v2605_v51, 264  ;;  %2607 = vbcast.lane.b32.xlu1 %v2605_v51, 256  ;;  %v2613_v12 = vmul.f32 %v7371_v41, %v8815_v18  ;;  %v8817_v15 = vld [vmem:[#allocation88_spill] sm:$0xff] }
 0x216   : > { %v2161_v34 = vadd.f32 %v7341_v13, %v2090_v38  ;;  %v2176_v58 = vadd.f32 %v7341_v13, %v2105_v19  ;;  %v2256_v38 = vld [vmem:[%s8482_s6] sm:$0xf]  ;;  %v8818_v19 = vld [vmem:[#allocation67_spill] sm:$0xff] }
 0x217   : > { %v1390_v52 = vpop.permute.xlu0 %1389  ;;  %v1463_v45 = vpop.permute.xlu1 %1462  ;;  %5117 = vmatprep.mubr.msk.f32.mxu0 %vm2742_vm4, %v2256_v38  ;;  %5151 = vmatprep.mubr.msk.f32.mxu1 %vm2742_vm4, %v2256_v38 }
 0x218   : > { %5688 = vtanh.f32 %v2161_v34  ;;  %v2076_v53 = vmul.f32 %v6973_v11, %v1390_v52  ;;  %v2089_v33 = vmul.f32 %v8813_v60, %v1463_v45  ;;  %v3175_v11 = vrot.slane %v8814_v37, %v6163_v25  ;;  %v8819_v34 = vld [vmem:[#allocation78_spill] sm:$0xff] }
 0x219   : > { %5690 = vtanh.f32 %v2176_v58  ;;  %2523 = vbcast.lane.b32.xlu0 %v2517_v6, 264  ;;  %2519 = vbcast.lane.b32.xlu1 %v2517_v6, 256  ;;  %v2614_v58 = vmul.f32 %v7375_v40, %v8819_v34  ;;  %v8821_v6 = vld [vmem:[#allocation74_spill] sm:$0xff]  ;;  %v2678_v37 = vsel %vm2677_vm6, %v2613_v12, %v8815_v18 }
 0x21a   : > { %5692 = vtanh.f32 %v2130_v20  ;;  %v2147_v48 = vadd.f32 %v7341_v13, %v2076_v53  ;;  %v2160_v56 = vadd.f32 %v7341_v13, %v2089_v33  ;;  %v7379_v5 = vpop.eup %5682  ;;  %v2061_v20 = vmul.f32 %v8818_v19, %v7317_v35  ;;  %v8823_v60 = vld [vmem:[#allocation66_spill] sm:$0xff]  ;;  %v8827_v19 = vld [vmem:[#allocation80_spill] sm:$0xff] }
 0x21b   : > { %5694 = vtanh.f32 %v2131_v54  ;;  %v1566_v44 = vpop.permute.xlu0 %1565  ;;  %v1386_v43 = vpop.permute.xlu1 %1385  ;;  %v2630_v53 = vmul.f32 %v7379_v5, %v8821_v6  ;;  %v2062_v33 = vmul.f32 %v8823_v60, %v7311_v1  ;;  %v2679_v1 = vsel %vm2677_vm6, %v2614_v58, %v8819_v34 }
 0x21c   : > { %5696 = vtanh.f32 %v2147_v48  ;;  %v2108_v47 = vmul.f32 %v8816_v57, %v1566_v44  ;;  %v2075_v51 = vmul.f32 %v8817_v15, %v1386_v43  ;;  %v8824_v44 = vld [vmem:[#allocation2_spill] sm:$0xff]  ;;  %v8826_v15 = vld [vmem:[#allocation75_spill] sm:$0xff]  ;;  %v2132_v38 = vadd.f32 %v7341_v13, %v2061_v20 }
 0x21d   : > { %5698 = vtanh.f32 %v2160_v56  ;;  %3181 = vbcast.lane.b32.xlu0 %v3175_v11, 264  ;;  %3177 = vbcast.lane.b32.xlu1 %v3175_v11, 256  ;;  %v3087_v43 = vrot.slane %v8824_v44, %v6163_v25  ;;  %v8825_v11 = vld [vmem:[#allocation91_spill] sm:$0xff]  ;;  %v2695_v20 = vsel %vm2677_vm6, %v2630_v53, %v8821_v6  ;;  %v2133_v58 = vadd.f32 %v7341_v13, %v2062_v33 }
 0x21e   : > { %v7394_v54 = vpop.eup %5684  ;;  %v2179_v52 = vadd.f32 %v7341_v13, %v2108_v47  ;;  %v2146_v45 = vadd.f32 %v7341_v13, %v2075_v51 }
 0x21f   : > { %8820 = vst [vmem:[#allocation84_spill] sm:$0xff] %v7394_v54  ;;  %v7402_v35 = vpop.eup %5686  ;;  %v1478_v48 = vpop.permute.xlu0 %1477  ;;  %v2662_v60 = vmul.f32 %v7394_v54, %v8827_v19 }
 0x220   : > { %8822 = vst [vmem:[#allocation6_spill] sm:$0xff] %v7402_v35  ;;  %v1562_v56 = vpop.permute.xlu1 %1561  ;;  %5700 = vtanh.f32 %v2179_v52  ;;  %v2092_v57 = vmul.f32 %v8825_v11, %v1478_v48  ;;  %v2629_v51 = vmul.f32 %v7402_v35, %v8826_v15 }
 0x221   : > { %v2107_v47 = vmul.f32 %v7009_v16, %v1562_v56  ;;  %5702 = vtanh.f32 %v2146_v45  ;;  %3093 = vbcast.lane.b32.xlu0 %v3087_v43, 264  ;;  %3089 = vbcast.lane.b32.xlu1 %v3087_v43, 256  ;;  %v8831_v43 = vld [vmem:[#allocation8_spill] sm:$0xff]  ;;  %v2727_v33 = vsel %vm2677_vm6, %v2662_v60, %v8827_v19 }
 0x222   : > { %v7419_v18 = vpop.eup %5688  ;;  %v2163_v12 = vadd.f32 %v7341_v13, %v2092_v57  ;;  %v2694_v52 = vsel %vm2677_vm6, %v2629_v51, %v8826_v15  ;;  %v3351_v11 = vrot.slane %v8831_v43, %v6163_v25  ;;  %v5308_v57 = vpack.c.bf16 %v2679_v1, %v2678_v37  ;;  %v8832_v15 = vld [vmem:[#allocation81_spill] sm:$0xff]  ;;  %v8833_v37 = vld [vmem:[#allocation82_spill] sm:$0xff] }
 0x223   : > { %v2178_v16 = vadd.f32 %v7341_v13, %v2107_v47  ;;  %v7433_v34 = vpop.eup %5690  ;;  %v1401_v48 = vpop.permute.xlu0 %1400  ;;  %v5305_v44 = vpack.c.bf16 %v2695_v20, %v2694_v52  ;;  %v2646_v1 = vmul.f32 %v7419_v18, %v8833_v37 }
 0x224   : > { %8830 = vst [vmem:[#allocation79_spill] sm:$0xff] %v7433_v34  ;;  %v1474_v56 = vpop.permute.xlu1 %1473  ;;  %v7438_v47 = vpop.eup %5692  ;;  %5704 = vtanh.f32 %v2163_v12  ;;  %v2078_v6 = vmul.f32 %v7019_v59, %v1401_v48  ;;  %v2661_v51 = vmul.f32 %v7433_v34, %v8832_v15  ;;  %v8835_v48 = vld [vmem:[#allocation7_spill] sm:$0xff] }
 0x225   : > { %v2091_v53 = vmul.f32 %v7022_v2, %v1474_v56  ;;  %v7444_v54 = vpop.eup %5694  ;;  %5706 = vtanh.f32 %v2178_v16  ;;  %5307 = vmatprep.subr.msk.bf16.mxu0 %vm7429_vm7, %v5305_v44  ;;  %3357 = vbcast.lane.b32.xlu0 %v3351_v11, 264  ;;  %v8836_v56 = vld [vmem:[#allocation90_spill] sm:$0xff] }
 0x226   : > { %v7452_v12 = vpop.eup %5696  ;;  %5708 = vtanh.f32 %v2132_v38  ;;  %v2149_v2 = vadd.f32 %v7341_v13, %v2078_v6  ;;  %3353 = vbcast.lane.b32.xlu1 %v3351_v11, 256  ;;  %5310 = vmatpush3.bf16.xpose.msk.msra.mxu0 %vm7429_vm7, %v5308_v57  ;;  %v2726_v16 = vsel %vm2677_vm6, %v2661_v51, %v8832_v15  ;;  %v3263_v38 = vrot.slane %v8835_v48, %v6163_v25  ;;  %v8837_v57 = vld [vmem:[#allocation83_spill] sm:$0xff]  ;;  %v8839_v51 = vld [vmem:[#allocation89_spill] sm:$0xff] }
 0x227   : > { %v2162_v59 = vadd.f32 %v7341_v13, %v2091_v53  ;;  %v7460_v52 = vpop.eup %5698  ;;  %5710 = vtanh.f32 %v2133_v58  ;;  %v1577_v19 = vpop.permute.xlu0 %1576  ;;  %v5353_v20 = vpack.c.bf16 %v2727_v33, %v2726_v16  ;;  %v2615_v44 = vmul.f32 %v7438_v47, %v8836_v56  ;;  %v8838_v53 = vld [vmem:[#allocation70_spill] sm:$0xff] }
 0x228   : > { %8834 = vst [vmem:[#allocation87_spill] sm:$0xff] %v7460_v52  ;;  %v1397_v60 = vpop.permute.xlu1 %1396  ;;  %5712 = vtanh.f32 %v2149_v2  ;;  %v2110_v43 = vmul.f32 %v7032_v36, %v1577_v19  ;;  %v2645_v6 = vmul.f32 %v7460_v52, %v8837_v57  ;;  %v2063_v58 = vmul.f32 %v8838_v53, %v7322_v32 }
 0x229   : > { %v2077_v11 = vmul.f32 %v7035_v4, %v1397_v60  ;;  %5714 = vtanh.f32 %v2162_v59  ;;  %5355 = vmatprep.subr.msk.bf16.mxu1 %vm7429_vm7, %v5353_v20  ;;  %3269 = vbcast.lane.b32.xlu0 %v3263_v38, 264  ;;  %v2711_v15 = vsel %vm2677_vm6, %v2646_v1, %v8833_v37  ;;  %v2616_v33 = vmul.f32 %v7444_v54, %v8839_v51  ;;  %v8840_v59 = vld [vmem:[#allocation85_spill] sm:$0xff]  ;;  %v8841_v37 = vld [vmem:[#allocation68_spill] sm:$0xff] }
 0x22a   : > { %v7478_v36 = vpop.eup %5700  ;;  %v2181_v4 = vadd.f32 %v7341_v13, %v2110_v43  ;;  %3265 = vbcast.lane.b32.xlu1 %v3263_v38, 256  ;;  %v2710_v32 = vsel %vm2677_vm6, %v2645_v6, %v8837_v57  ;;  %v2632_v16 = vmul.f32 %v7452_v12, %v8840_v59  ;;  %v2064_v1 = vmul.f32 %v8841_v37, %v7315_v7  ;;  %v8842_v57 = vld [vmem:[#allocation86_spill] sm:$0xff]  ;;  %v8843_v7 = vld [vmem:[#allocation11_spill] sm:$0xff] }
 0x22b   : > { %v2148_v2 = vadd.f32 %v7341_v13, %v2077_v11  ;;  %v7486_v19 = vpop.eup %5702  ;;  %v1489_v60 = vpop.permute.xlu0 %1488  ;;  %v5356_v48 = vpack.c.bf16 %v2711_v15, %v2710_v32  ;;  %v2680_v43 = vsel %vm2677_vm6, %v2615_v44, %v8836_v56  ;;  %v2134_v53 = vadd.f32 %v7341_v13, %v2063_v58  ;;  %v8844_v56 = vld [vmem:[#allocation92_spill] sm:$0xff] }
 0x22c   : > { %v1573_v20 = vpop.permute.xlu1 %1572  ;;  %5716 = vtanh.f32 %v2181_v4  ;;  %v2094_v38 = vmul.f32 %v7046_v3, %v1489_v60  ;;  %v2631_v6 = vmul.f32 %v7486_v19, %v8842_v57  ;;  %v2681_v15 = vsel %vm2677_vm6, %v2616_v33, %v8839_v51 }
 0x22d   : > { %v2109_v11 = vmul.f32 %v7051_v62, %v1573_v20  ;;  %5718 = vtanh.f32 %v2148_v2  ;;  %5358 = vmatpush3.bf16.xpose.msk.msra.mxu1 %vm7429_vm7, %v5356_v48  ;;  %3192 = vbcast.lane.b32.xlu0 %v8843_v7, 264  ;;  %v2664_v44 = vmul.f32 %v7478_v36, %v8844_v56  ;;  %v2697_v2 = vsel %vm2677_vm6, %v2632_v16, %v8840_v59  ;;  %v8848_v59 = vld [vmem:[#allocation12_spill] sm:$0xff] }
 0x22e   : > { %v7504_v3 = vpop.eup %5704  ;;  %v2165_v62 = vadd.f32 %v7341_v13, %v2094_v38  ;;  %3188 = vbcast.lane.b32.xlu1 %v8843_v7, 256  ;;  %v2696_v58 = vsel %vm2677_vm6, %v2631_v6, %v8842_v57  ;;  %v2135_v51 = vadd.f32 %v7341_v13, %v2064_v1  ;;  %v5314_v20 = vpack.c.bf16 %v2681_v15, %v2680_v43  ;;  %v8846_v7 = vld [vmem:[#allocation93_spill] sm:$0xff]  ;;  %v8849_v1 = vld [vmem:[#allocation94_spill] sm:$0xff] }
 0x22f   : > { %v2180_v4 = vadd.f32 %v7341_v13, %v2109_v11  ;;  %v7513_v32 = vpop.eup %5706  ;;  %v1412_v33 = vpop.permute.xlu0 %1411  ;;  %v5311_v60 = vpack.c.bf16 %v2697_v2, %v2696_v58  ;;  %v2729_v16 = vsel %vm2677_vm6, %v2664_v44, %v8844_v56  ;;  %v2648_v43 = vmul.f32 %v7504_v3, %v8849_v1  ;;  %v8852_v2 = vld [vmem:[#allocation99_spill] sm:$0xff] }
 0x230   : > { %v1485_v37 = vpop.permute.xlu1 %1484  ;;  %v7516_v48 = vpop.eup %5708  ;;  %5720 = vtanh.f32 %v2165_v62  ;;  %v2080_v38 = vmul.f32 %v7070_v61, %v1412_v33  ;;  %v2663_v57 = vmul.f32 %v7513_v32, %v8846_v7  ;;  %v8853_v33 = vld [vmem:[#allocation103_spill] sm:$0xff] }
 0x231   : > { %8845 = vst [vmem:[#allocation88_spill] sm:$0xff] %v7516_v48  ;;  %v2093_v11 = vmul.f32 %v7065_v29, %v1485_v37  ;;  %v7522_v6 = vpop.eup %5710  ;;  %5722 = vtanh.f32 %v2180_v4  ;;  %5313 = vmatprep.subr.msk.bf16.mxu0 %vm7429_vm7, %v5311_v60  ;;  %3104 = vbcast.lane.b32.xlu0 %v8848_v59, 264  ;;  %v8854_v60 = vld [vmem:[#allocation102_spill] sm:$0xff] }
 0x232   : > { %8847 = vst [vmem:[#allocation67_spill] sm:$0xff] %v7522_v6  ;;  %v7531_v61 = vpop.eup %5712  ;;  %5724 = vtanh.f32 %v2134_v53  ;;  %v2151_v29 = vadd.f32 %v7341_v13, %v2080_v38  ;;  %3100 = vbcast.lane.b32.xlu1 %v8848_v59, 256  ;;  %5316 = vmatpush3.bf16.xpose.msk.msra.mxu0 %vm7429_vm7, %v5314_v20  ;;  %v2728_v62 = vsel %vm2677_vm6, %v2663_v57, %v8846_v7  ;;  %v8856_v59 = vld [vmem:[#allocation69_spill] sm:$0xff] }
 0x233   : > { %8850 = vst [vmem:[#allocation78_spill] sm:$0xff] %v7531_v61  ;;  %v2164_v15 = vadd.f32 %v7341_v13, %v2093_v11  ;;  %v7540_v4 = vpop.eup %5714  ;;  %5726 = vtanh.f32 %v2135_v51  ;;  %v1588_v56 = vpop.permute.xlu0 %1587  ;;  %v5359_v58 = vpack.c.bf16 %v2729_v16, %v2728_v62  ;;  %v2617_v53 = vmul.f32 %v7516_v48, %v8852_v2  ;;  %v8855_v11 = vld [vmem:[#allocation95_spill] sm:$0xff]  ;;  %v8857_v51 = vld [vmem:[#allocation13_spill] sm:$0xff]  ;;  %v8858_v16 = vld [vmem:[#allocation98_spill] sm:$0xff] }
 0x234   : > { %8851 = vst [vmem:[#allocation74_spill] sm:$0xff] %v7540_v4  ;;  %v1408_v44 = vpop.permute.xlu1 %1407  ;;  %5728 = vtanh.f32 %v2151_v29  ;;  %v2112_v37 = vmul.f32 %v8853_v33, %v1588_v56  ;;  %v2647_v20 = vmul.f32 %v7540_v4, %v8855_v11  ;;  %v2066_v7 = vmul.f32 %v8856_v59, %v7320_v28 }
 0x235   : > { %v2079_v38 = vmul.f32 %v8854_v60, %v1408_v44  ;;  %5730 = vtanh.f32 %v2164_v15  ;;  %5361 = vmatprep.subr.msk.bf16.mxu1 %vm7429_vm7, %v5359_v58  ;;  %3368 = vbcast.lane.b32.xlu0 %v8857_v51, 264  ;;  %v2713_v57 = vsel %vm2677_vm6, %v2648_v43, %v8849_v1  ;;  %v2618_v29 = vmul.f32 %v7522_v6, %v8858_v16  ;;  %v8860_v15 = vld [vmem:[#allocation96_spill] sm:$0xff]  ;;  %v8862_v1 = vld [vmem:[#allocation71_spill] sm:$0xff]  ;;  %v8864_v6 = vld [vmem:[#allocation106_spill] sm:$0xff] }
 0x236   : > { %v7557_v62 = vpop.eup %5716  ;;  %v2183_v56 = vadd.f32 %v7341_v13, %v2112_v37  ;;  %3364 = vbcast.lane.b32.xlu1 %v8857_v51, 256  ;;  %v2712_v28 = vsel %vm2677_vm6, %v2647_v20, %v8855_v11  ;;  %v2634_v58 = vmul.f32 %v7531_v61, %v8860_v15  ;;  %v2065_v43 = vmul.f32 %v8862_v1, %v7328_v26  ;;  %v8865_v11 = vld [vmem:[#allocation97_spill] sm:$0xff]  ;;  %v8866_v26 = vld [vmem:[#allocation14_spill] sm:$0xff] }
 0x237   : > { %8859 = vst [vmem:[#allocation66_spill] sm:$0xff] %v7557_v62  ;;  %v2150_v44 = vadd.f32 %v7341_v13, %v2079_v38  ;;  %v7566_v33 = vpop.eup %5718  ;;  %v1500_v60 = vpop.permute.xlu0 %1499  ;;  %v5362_v48 = vpack.c.bf16 %v2713_v57, %v2712_v28  ;;  %v2682_v37 = vsel %vm2677_vm6, %v2617_v53, %v8852_v2  ;;  %v8863_v38 = vld [vmem:[#allocation107_spill] sm:$0xff]  ;;  %v2137_v61 = vadd.f32 %v7341_v13, %v2066_v7  ;;  %v8867_v2 = vld [vmem:[#allocation100_spill] sm:$0xff] }
 0x238   : > { %8861 = vst [vmem:[#allocation2_spill] sm:$0xff] %v7566_v33  ;;  %v1584_v59 = vpop.permute.xlu1 %1583  ;;  %5732 = vtanh.f32 %v2183_v56  ;;  %v2096_v51 = vmul.f32 %v8863_v38, %v1500_v60  ;;  %v2633_v20 = vmul.f32 %v7566_v33, %v8865_v11  ;;  %v2683_v57 = vsel %vm2677_vm6, %v2618_v29, %v8858_v16  ;;  %v8871_v33 = vld [vmem:[#allocation101_spill] sm:$0xff] }
 0x239   : > { %v2111_v4 = vmul.f32 %v8864_v6, %v1584_v59  ;;  %5734 = vtanh.f32 %v2150_v44  ;;  %5364 = vmatpush3.bf16.xpose.msk.msra.mxu1 %vm7429_vm7, %v5362_v48  ;;  %3280 = vbcast.lane.b32.xlu0 %v8866_v26, 264  ;;  %v2666_v53 = vmul.f32 %v7557_v62, %v8867_v2  ;;  %v2699_v48 = vsel %vm2677_vm6, %v2634_v58, %v8860_v15  ;;  %v8873_v15 = vld [vmem:[#allocation15_spill] sm:$0xff] }
 0x23a   : > { %v7584_v56 = vpop.eup %5720  ;;  %v2167_v6 = vadd.f32 %v7341_v13, %v2096_v51  ;;  %3276 = vbcast.lane.b32.xlu1 %v8866_v26, 256  ;;  %v2698_v7 = vsel %vm2677_vm6, %v2633_v20, %v8865_v11  ;;  %v2136_v16 = vadd.f32 %v7341_v13, %v2065_v43  ;;  %v5320_v59 = vpack.c.bf16 %v2683_v57, %v2682_v37  ;;  %v8870_v26 = vld [vmem:[#allocation111_spill] sm:$0xff]  ;;  %v8874_v43 = vld [vmem:[#allocation104_spill] sm:$0xff] }
 0x23b   : > { %v2182_v28 = vadd.f32 %v7341_v13, %v2111_v4  ;;  %v7593_v44 = vpop.eup %5722  ;;  %v1423_v29 = vpop.permute.xlu0 %1422  ;;  %v5317_v60 = vpack.c.bf16 %v2699_v48, %v2698_v7  ;;  %v8869_v4 = vld [vmem:[#allocation110_spill] sm:$0xff]  ;;  %v2731_v58 = vsel %vm2677_vm6, %v2666_v53, %v8867_v2  ;;  %v2650_v37 = vmul.f32 %v7584_v56, %v8874_v43 }
 0x23c   : > { %v1496_v1 = vpop.permute.xlu1 %1495  ;;  %v7596_v38 = vpop.eup %5724  ;;  %5736 = vtanh.f32 %v2167_v6  ;;  %v2082_v51 = vmul.f32 %v8869_v4, %v1423_v29  ;;  %v2665_v11 = vmul.f32 %v7593_v44, %v8871_v33  ;;  %v8879_v4 = vld [vmem:[#allocation115_spill] sm:$0xff] }
 0x23d   : > { %8868 = vst [vmem:[#allocation91_spill] sm:$0xff] %v7596_v38  ;;  %v2095_v62 = vmul.f32 %v8870_v26, %v1496_v1  ;;  %v7602_v20 = vpop.eup %5726  ;;  %5738 = vtanh.f32 %v2182_v28  ;;  %5319 = vmatprep.subr.msk.bf16.mxu0 %vm7429_vm7, %v5317_v60  ;;  %3203 = vbcast.lane.b32.xlu0 %v8873_v15, 264  ;;  %v8877_v1 = vld [vmem:[#allocation113_spill] sm:$0xff]  ;;  %v8878_v60 = vld [vmem:[#allocation114_spill] sm:$0xff] }
 0x23e   : > { %8872 = vst [vmem:[#allocation75_spill] sm:$0xff] %v7602_v20  ;;  %v7611_v57 = vpop.eup %5728  ;;  %5740 = vtanh.f32 %v2137_v61  ;;  %v2153_v6 = vadd.f32 %v7341_v13, %v2082_v51  ;;  %3199 = vbcast.lane.b32.xlu1 %v8873_v15, 256  ;;  %5322 = vmatpush3.bf16.xpose.msk.msra.mxu0 %vm7429_vm7, %v5320_v59  ;;  %v2730_v28 = vsel %vm2677_vm6, %v2665_v11, %v8871_v33  ;;  %v8880_v26 = vld [vmem:[#allocation105_spill] sm:$0xff]  ;;  %v8881_v15 = vld [vmem:[#allocation72_spill] sm:$0xff] }
 0x23f   : > { %8875 = vst [vmem:[#allocation80_spill] sm:$0xff] %v7611_v57  ;;  %v2166_v7 = vadd.f32 %v7341_v13, %v2095_v62  ;;  %v7620_v48 = vpop.eup %5730  ;;  %5742 = vtanh.f32 %v2136_v16  ;;  %v1599_v2 = vpop.permute.xlu0 %1598  ;;  %v5365_v29 = vpack.c.bf16 %v2731_v58, %v2730_v28  ;;  %v2619_v61 = vmul.f32 %v7596_v38, %v8877_v1  ;;  %v8882_v16 = vld [vmem:[#allocation16_spill] sm:$0xff] }
 0x240   : > { %8876 = vst [vmem:[#allocation8_spill] sm:$0xff] %v7620_v48  ;;  %v1419_v53 = vpop.permute.xlu1 %1418  ;;  %5744 = vtanh.f32 %v2153_v6  ;;  %v2114_v62 = vmul.f32 %v8878_v60, %v1599_v2  ;;  %v2649_v59 = vmul.f32 %v7620_v48, %v8880_v26  ;;  %v2068_v33 = vmul.f32 %v8881_v15, %v7326_v23  ;;  %v8883_v58 = vld [vmem:[#allocation112_spill] sm:$0xff] }
 0x241   : > { %v2081_v51 = vmul.f32 %v8879_v4, %v1419_v53  ;;  %5746 = vtanh.f32 %v2166_v7  ;;  %5367 = vmatprep.subr.msk.bf16.mxu1 %vm7429_vm7, %v5365_v29  ;;  %3115 = vbcast.lane.b32.xlu0 %v8882_v16, 264  ;;  %v2715_v11 = vsel %vm2677_vm6, %v2650_v37, %v8874_v43  ;;  %v2620_v6 = vmul.f32 %v7602_v20, %v8883_v58  ;;  %v8884_v7 = vld [vmem:[#allocation108_spill] sm:$0xff]  ;;  %v8886_v43 = vld [vmem:[#allocation73_spill] sm:$0xff] }
 0x242   : > { %v7637_v28 = vpop.eup %5732  ;;  %v2185_v2 = vadd.f32 %v7341_v13, %v2114_v62  ;;  %3111 = vbcast.lane.b32.xlu1 %v8882_v16, 256  ;;  %v2714_v23 = vsel %vm2677_vm6, %v2649_v59, %v8880_v26  ;;  %v2636_v29 = vmul.f32 %v7611_v57, %v8884_v7  ;;  %v2067_v37 = vmul.f32 %v8886_v43, %v7335_v49  ;;  %v8888_v26 = vld [vmem:[#allocation109_spill] sm:$0xff] }
 0x243   : > { %v2152_v53 = vadd.f32 %v7341_v13, %v2081_v51  ;;  %v7646_v60 = vpop.eup %5734  ;;  %v1511_v4 = vpop.permute.xlu0 %1510  ;;  %v5368_v38 = vpack.c.bf16 %v2715_v11, %v2714_v23  ;;  %v2684_v62 = vsel %vm2677_vm6, %v2619_v61, %v8877_v1  ;;  %v8887_v51 = vld [vmem:[#allocation118_spill] sm:$0xff]  ;;  %v2139_v57 = vadd.f32 %v7341_v13, %v2068_v33  ;;  %v8889_v49 = vld [vmem:[#allocation17_spill] sm:$0xff]  ;;  %v8890_v1 = vld [vmem:[#allocation116_spill] sm:$0xff] }
 0x244   : > { %8885 = vst [vmem:[#allocation81_spill] sm:$0xff] %v7646_v60  ;;  %v1595_v15 = vpop.permute.xlu1 %1594  ;;  %5748 = vtanh.f32 %v2185_v2  ;;  %v2098_v16 = vmul.f32 %v8887_v51, %v1511_v4  ;;  %v2635_v59 = vmul.f32 %v7646_v60, %v8888_v26  ;;  %v2685_v11 = vsel %vm2677_vm6, %v2620_v6, %v8883_v58 }
 0x245   : > { %v2113_v20 = vmul.f32 %v7154_v27, %v1595_v15  ;;  %5750 = vtanh.f32 %v2152_v53  ;;  %5370 = vmatpush3.bf16.xpose.msk.msra.mxu1 %vm7429_vm7, %v5368_v38  ;;  %3379 = vbcast.lane.b32.xlu0 %v8889_v49, 264  ;;  %v2668_v61 = vmul.f32 %v7637_v28, %v8890_v1  ;;  %v2701_v38 = vsel %vm2677_vm6, %v2636_v29, %v8884_v7  ;;  %v8893_v7 = vld [vmem:[#allocation18_spill] sm:$0xff] }
 0x246   : > { %v7664_v2 = vpop.eup %5736  ;;  %v2169_v27 = vadd.f32 %v7341_v13, %v2098_v16  ;;  %3375 = vbcast.lane.b32.xlu1 %v8889_v49, 256  ;;  %v2700_v33 = vsel %vm2677_vm6, %v2635_v59, %v8888_v26  ;;  %v2138_v58 = vadd.f32 %v7341_v13, %v2067_v37  ;;  %v5326_v15 = vpack.c.bf16 %v2685_v11, %v2684_v62  ;;  %v8891_v49 = vld [vmem:[#allocation117_spill] sm:$0xff]  ;;  %v8894_v37 = vld [vmem:[#allocation119_spill] sm:$0xff] }
 0x247   : > { %v2184_v23 = vadd.f32 %v7341_v13, %v2113_v20  ;;  %v7673_v53 = vpop.eup %5738  ;;  %v1434_v6 = vpop.permute.xlu0 %1433  ;;  %v5323_v4 = vpack.c.bf16 %v2701_v38, %v2700_v33  ;;  %v2733_v29 = vsel %vm2677_vm6, %v2668_v61, %v8890_v1  ;;  %v2652_v62 = vmul.f32 %v7664_v2, %v8894_v37  ;;  %v8895_v38 = vld [vmem:[#allocation123_spill] sm:$0xff] }
 0x248   : > { %v1507_v43 = vpop.permute.xlu1 %1506  ;;  %v7676_v51 = vpop.eup %5740  ;;  %5752 = vtanh.f32 %v2169_v27  ;;  %v2084_v20 = vmul.f32 %v7169_v9, %v1434_v6  ;;  %v2667_v26 = vmul.f32 %v7673_v53, %v8891_v49 }
 0x249   : > { %v2097_v16 = vmul.f32 %v7166_v24, %v1507_v43  ;;  %v7682_v59 = vpop.eup %5742  ;;  %5754 = vtanh.f32 %v2184_v23  ;;  %5325 = vmatprep.subr.msk.bf16.mxu0 %vm7429_vm7, %v5323_v4  ;;  %3291 = vbcast.lane.b32.xlu0 %v8893_v7, 264  ;;  %v8896_v43 = vld [vmem:[#allocation120_spill] sm:$0xff] }
 0x24a   : > { %8892 = vst [vmem:[#allocation82_spill] sm:$0xff] %v7682_v59  ;;  %v7691_v9 = vpop.eup %5744  ;;  %5756 = vtanh.f32 %v2139_v57  ;;  %v2155_v24 = vadd.f32 %v7341_v13, %v2084_v20  ;;  %3287 = vbcast.lane.b32.xlu1 %v8893_v7, 256  ;;  %5328 = vmatpush3.bf16.xpose.msk.msra.mxu0 %vm7429_vm7, %v5326_v15  ;;  %v2732_v27 = vsel %vm2677_vm6, %v2667_v26, %v8891_v49  ;;  %v8897_v15 = vld [vmem:[#allocation19_spill] sm:$0xff]  ;;  %v8898_v20 = vld [vmem:[#allocation125_spill] sm:$0xff] }
 0x24b   : > { %v2168_v11 = vadd.f32 %v7341_v13, %v2097_v16  ;;  %v7700_v23 = vpop.eup %5746  ;;  %5758 = vtanh.f32 %v2138_v58  ;;  %v1610_v1 = vpop.permute.xlu0 %1609  ;;  %v5371_v33 = vpack.c.bf16 %v2733_v29, %v2732_v27  ;;  %v2717_v58 = vsel %vm2677_vm6, %v2652_v62, %v8894_v37  ;;  %v8900_v29 = vld [vmem:[#allocation121_spill] sm:$0xff] }
 0x24c   : > { %v1430_v61 = vpop.permute.xlu1 %1429  ;;  %5760 = vtanh.f32 %v2155_v24  ;;  %v2116_v57 = vmul.f32 %v7185_v8, %v1610_v1  ;;  %v2651_v4 = vmul.f32 %v7700_v23, %v8896_v43  ;;  %v2621_v16 = vmul.f32 %v7682_v59, %v8898_v20  ;;  %v8902_v1 = vld [vmem:[#allocation124_spill] sm:$0xff] }
 0x24d   : > { %v2083_v6 = vmul.f32 %v8895_v38, %v1430_v61  ;;  %5762 = vtanh.f32 %v2168_v11  ;;  %5373 = vmatprep.subr.msk.bf16.mxu1 %vm7429_vm7, %v5371_v33  ;;  %3214 = vbcast.lane.b32.xlu0 %v8897_v15, 264  ;;  %v2638_v24 = vmul.f32 %v7691_v9, %v8900_v29  ;;  %v2622_v61 = vmul.f32 %v7676_v51, %v8902_v1 }
 0x24e   : > { %v7713_v49 = vpop.eup %5748  ;;  %v2187_v8 = vadd.f32 %v7341_v13, %v2116_v57  ;;  %3210 = vbcast.lane.b32.xlu1 %v8897_v15, 256  ;;  %v2716_v7 = vsel %vm2677_vm6, %v2651_v4, %v8896_v43  ;;  %v8903_v57 = vld [vmem:[#allocation126_spill] sm:$0xff]  ;;  %v8905_v43 = vld [vmem:[#allocation20_spill] sm:$0xff]  ;;  %v2686_v4 = vsel %vm2677_vm6, %v2621_v16, %v8898_v20 }
 0x24f   : > { %8899 = vst [vmem:[#allocation7_spill] sm:$0xff] %v7713_v49  ;;  %v2154_v26 = vadd.f32 %v7341_v13, %v2083_v6  ;;  %v7722_v11 = vpop.eup %5750  ;;  %v1522_v37 = vpop.permute.xlu0 %1521  ;;  %v5374_v27 = vpack.c.bf16 %v2717_v58, %v2716_v7  ;;  %v8904_v6 = vld [vmem:[#allocation122_spill] sm:$0xff]  ;;  %v8906_v58 = vld [vmem:[#allocation127_spill] sm:$0xff] }
 0x250   : > { %8901 = vst [vmem:[#allocation90_spill] sm:$0xff] %v7722_v11  ;;  %v1606_v62 = vpop.permute.xlu1 %1605  ;;  %5764 = vtanh.f32 %v2187_v8  ;;  %v2100_v33 = vmul.f32 %v7203_v21, %v1522_v37  ;;  %v2637_v15 = vmul.f32 %v7722_v11, %v8904_v6  ;;  %v2670_v7 = vmul.f32 %v7713_v49, %v8906_v58 }
 0x251   : > { %v2115_v38 = vmul.f32 %v8903_v57, %v1606_v62  ;;  %5766 = vtanh.f32 %v2154_v26  ;;  %5376 = vmatpush3.bf16.xpose.msk.msra.mxu1 %vm7429_vm7, %v5374_v27  ;;  %3126 = vbcast.lane.b32.xlu0 %v8905_v43, 264  ;;  %v2703_v62 = vsel %vm2677_vm6, %v2638_v24, %v8900_v29  ;;  %v2687_v49 = vsel %vm2677_vm6, %v2622_v61, %v8902_v1  ;;  %v8910_v29 = vld [vmem:[#allocation21_spill] sm:$0xff] }
 0x252   : > { %v7737_v8 = vpop.eup %5752  ;;  %v2171_v21 = vadd.f32 %v7341_v13, %v2100_v33  ;;  %3122 = vbcast.lane.b32.xlu1 %v8905_v43, 256  ;;  %v2702_v26 = vsel %vm2677_vm6, %v2637_v15, %v8904_v6  ;;  %v8908_v43 = vld [vmem:[#allocation128_spill] sm:$0xff]  ;;  %v2735_v24 = vsel %vm2677_vm6, %v2670_v7, %v8906_v58 }
 0x253   : > { %v2186_v37 = vadd.f32 %v7341_v13, %v2115_v38  ;;  %v7746_v27 = vpop.eup %5754  ;;  %v1445_v20 = vpop.permute.xlu0 %1444  ;;  %v5329_v57 = vpack.c.bf16 %v2703_v62, %v2702_v26  ;;  %v5332_v38 = vpack.c.bf16 %v2687_v49, %v2686_v4  ;;  %v2654_v49 = vmul.f32 %v7737_v8, %v7222_v22  ;;  %v8913_v62 = vld [vmem:[#allocation5_spill] sm:$0xff] }
 0x254   : > { %v1518_v16 = vpop.permute.xlu1 %1517  ;;  %v7750_v59 = vpop.eup %5756  ;;  %5768 = vtanh.f32 %v2171_v21  ;;  %v2669_v6 = vmul.f32 %v7746_v27, %v8908_v43 }
 0x255   : > { %8907 = vst [vmem:[#allocation83_spill] sm:$0xff] %v7750_v59  ;;  %v2099_v33 = vmul.f32 %v7215_v50, %v1518_v16  ;;  %v7755_v15 = vpop.eup %5758  ;;  %5770 = vtanh.f32 %v2186_v37  ;;  %5331 = vmatprep.subr.msk.bf16.mxu0 %vm7429_vm7, %v5329_v57  ;;  %3390 = vbcast.lane.b32.xlu0 %v8910_v29, 264 }
 0x256   : > { %8909 = vst [vmem:[#allocation70_spill] sm:$0xff] %v7755_v15  ;;  %v7762_v1 = vpop.eup %5760  ;;  %3386 = vbcast.lane.b32.xlu1 %v8910_v29, 256  ;;  %5334 = vmatpush3.bf16.xpose.msk.msra.mxu0 %vm7429_vm7, %v5332_v38  ;;  %v2734_v50 = vsel %vm2677_vm6, %v2669_v6, %v8908_v43  ;;  %v2623_v16 = vmul.f32 %v7755_v15, %v7251_v39  ;;  %v8914_v43 = vld [vmem:[#allocation131_spill] sm:$0xff] }
 0x257   : > { %8911 = vst [vmem:[#allocation89_spill] sm:$0xff] %v7762_v1  ;;  %v2170_v61 = vadd.f32 %v7341_v13, %v2099_v33  ;;  %v7772_v4 = vpop.eup %5762  ;;  %v1621_v21 = vpop.permute.xlu0 %1620  ;;  %v5377_v58 = vpack.c.bf16 %v2735_v24, %v2734_v50  ;;  %v2719_v38 = vsel %vm2677_vm6, %v2654_v49, %v7222_v22  ;;  %v2624_v50 = vmul.f32 %v7750_v59, %v7249_v63  ;;  %v8918_v22 = vld [vmem:[#allocation22_spill] sm:$0xff] }
 0x258   : > { %8912 = vst [vmem:[#allocation85_spill] sm:$0xff] %v7772_v4  ;;  %v1441_v37 = vpop.permute.xlu1 %1440  ;;  %v2653_v7 = vmul.f32 %v7772_v4, %v7224_v31  ;;  %v2688_v49 = vsel %vm2677_vm6, %v2623_v16, %v7251_v39  ;;  %v8919_v16 = vld [vmem:[#allocation76_spill] sm:$0xff] }
 0x259   : > { %5772 = vtanh.f32 %v2170_v61  ;;  %v2085_v26 = vmul.f32 %v7228_v0, %v1441_v37  ;;  %5379 = vmatprep.subr.msk.bf16.mxu1 %vm7429_vm7, %v5377_v58  ;;  %3302 = vbcast.lane.b32.xlu0 %v8913_v62, 264  ;;  %v2640_v0 = vmul.f32 %v7762_v1, %v8914_v43  ;;  %v8916_v37 = vld [vmem:[#allocation132_spill] sm:$0xff]  ;;  %v2689_v39 = vsel %vm2677_vm6, %v2624_v50, %v7249_v63 }
 0x25a   : > { %v7782_v57 = vpop.eup %5764  ;;  %3298 = vbcast.lane.b32.xlu1 %v8913_v62, 256  ;;  %v2718_v33 = vsel %vm2677_vm6, %v2653_v7, %v7224_v31  ;;  %v8917_v62 = vld [vmem:[#allocation129_spill] sm:$0xff] }
 0x25b   : > { %v7791_v6 = vpop.eup %5766  ;;  %v1533_v29 = vpop.permute.xlu0 %1532  ;;  %v5380_v61 = vpack.c.bf16 %v2719_v38, %v2718_v33  ;;  %v2086_v15 = vmul.f32 %v8917_v62, %v1445_v20  ;;  %v2156_v31 = vadd.f32 %v7341_v13, %v2085_v26  ;;  %v2705_v20 = vsel %vm2677_vm6, %v2640_v0, %v8914_v43  ;;  %v8920_v43 = vld [vmem:[#allocation77_spill] sm:$0xff] }
 0x25c   : > { %8915 = vst [vmem:[#allocation68_spill] sm:$0xff] %v7791_v6  ;;  %v1617_v24 = vpop.permute.xlu1 %1616  ;;  %v2639_v58 = vmul.f32 %v7791_v6, %v8916_v37  ;;  %v2672_v26 = vmul.f32 %v7782_v57, %v7264_v10  ;;  %v5338_v6 = vpack.c.bf16 %v2689_v39, %v2688_v49  ;;  %v2069_v0 = vmul.f32 %v8920_v43, %v7346_v17 }
 0x25d   : > { %5382 = vmatpush3.bf16.xpose.msk.msra.mxu1 %vm7429_vm7, %v5380_v61  ;;  %3225 = vbcast.lane.b32.xlu0 %v8918_v22, 264  ;;  %5774 = vtanh.f32 %v2156_v31 }
 0x25e   : > { %v7804_v7 = vpop.eup %5768  ;;  %3221 = vbcast.lane.b32.xlu1 %v8918_v22, 256  ;;  %v2704_v33 = vsel %vm2677_vm6, %v2639_v58, %v8916_v37  ;;  %v2070_v22 = vmul.f32 %v8919_v16, %v7333_v14  ;;  %v2157_v58 = vadd.f32 %v7341_v13, %v2086_v15  ;;  %v2737_v14 = vsel %vm2677_vm6, %v2672_v26, %v7264_v10  ;;  %v8923_v26 = vld [vmem:[#allocation24_spill] sm:$0xff] }
 0x25f   : > { %v7813_v38 = vpop.eup %5770  ;;  %v1456_v61 = vpop.permute.xlu0 %1455  ;;  %v5335_v59 = vpack.c.bf16 %v2705_v20, %v2704_v33  ;;  %v8921_v33 = vld [vmem:[#allocation23_spill] sm:$0xff]  ;;  %v2656_v17 = vmul.f32 %v7804_v7, %v7279_v42  ;;  %v8922_v20 = vld [vmem:[#allocation130_spill] sm:$0xff]  ;;  %v2117_v10 = vmul.f32 %v7242_v55, %v1617_v24  ;;  %v8924_v55 = vld [vmem:[#allocation133_spill] sm:$0xff] }
 0x260   : > { %v1529_v62 = vpop.permute.xlu1 %1528  ;;  %v2671_v37 = vmul.f32 %v7813_v38, %v7266_v30  ;;  %v2141_v49 = vadd.f32 %v7341_v13, %v2070_v22  ;;  %v2118_v39 = vmul.f32 %v8922_v20, %v1621_v21  ;;  %5776 = vtanh.f32 %v2157_v58 }
 0x261   : > { %5337 = vmatprep.subr.msk.bf16.mxu0 %vm7429_vm7, %v5335_v59  ;;  %3137 = vbcast.lane.b32.xlu0 %v8921_v33, 264  ;;  %v2721_v21 = vsel %vm2677_vm6, %v2656_v17, %v7279_v42  ;;  %v2102_v24 = vmul.f32 %v8924_v55, %v1533_v29  ;;  %v2188_v58 = vadd.f32 %v7341_v13, %v2117_v10  ;;  %v8927_v29 = vld [vmem:[#allocation135_spill] sm:$0xff] }
 0x262   : > { %3133 = vbcast.lane.b32.xlu1 %v8921_v33, 256  ;;  %5340 = vmatpush3.bf16.xpose.msk.msra.mxu0 %vm7429_vm7, %v5338_v6  ;;  %v2736_v63 = vsel %vm2677_vm6, %v2671_v37, %v7266_v30  ;;  %v2140_v30 = vadd.f32 %v7341_v13, %v2069_v0  ;;  %5778 = vtanh.f32 %v2141_v49  ;;  %v2189_v0 = vadd.f32 %v7341_v13, %v2118_v39  ;;  %v8925_v33 = vld [vmem:[#allocation134_spill] sm:$0xff] }
 0x263   : > { %v7836_v15 = vpop.eup %5772  ;;  %v1368_v50 = vpop.permute.xlu0 %1367  ;;  %v5383_v31 = vpack.c.bf16 %v2737_v14, %v2736_v63  ;;  %v2101_v63 = vmul.f32 %v8925_v33, %v1529_v62  ;;  %v2088_v49 = vmul.f32 %v8927_v29, %v1456_v61  ;;  %v8928_v62 = vld [vmem:[#allocation136_spill] sm:$0xff]  ;;  %v8933_v33 = vld [vmem:[#allocation27_spill] sm:$0xff] }
 0x264   : > { %v1452_v59 = vpop.permute.xlu1 %1451  ;;  %v2655_v6 = vmul.f32 %v7836_v15, %v7281_v46  ;;  %5780 = vtanh.f32 %v2140_v30  ;;  %v8930_v30 = vld [vmem:[#allocation140_spill] sm:$0xff] }
 0x265   : > { %5385 = vmatprep.subr.msk.bf16.mxu1 %vm7429_vm7, %v5383_v31  ;;  %3401 = vbcast.lane.b32.xlu0 %v8923_v26, 264  ;;  %5782 = vtanh.f32 %v2189_v0  ;;  %v2173_v31 = vadd.f32 %v7341_v13, %v2102_v24  ;;  %v2172_v20 = vadd.f32 %v7341_v13, %v2101_v63  ;;  %v2087_v39 = vmul.f32 %v8928_v62, %v1452_v59  ;;  %v8932_v24 = vld [vmem:[#allocation138_spill] sm:$0xff] }
 0x266   : > { %3397 = vbcast.lane.b32.xlu1 %v8923_v26, 256  ;;  %v2720_v16 = vsel %vm2677_vm6, %v2655_v6, %v7281_v46  ;;  %v8926_v46 = vld [vmem:[#allocation25_spill] sm:$0xff]  ;;  %5784 = vtanh.f32 %v2188_v58  ;;  %v8929_v6 = vld [vmem:[#allocation26_spill] sm:$0xff]  ;;  %v2159_v61 = vadd.f32 %v7341_v13, %v2088_v49 }
 0x267   : > { %v1632_v22 = vpop.permute.xlu0 %1631  ;;  %v5386_v43 = vpack.c.bf16 %v2721_v21, %v2720_v16  ;;  %v7860_v42 = vpop.eup %5774  ;;  %v8931_v16 = vld [vmem:[#allocation137_spill] sm:$0xff]  ;;  %5786 = vtanh.f32 %v2173_v31  ;;  %v2158_v59 = vadd.f32 %v7341_v13, %v2087_v39 }
 0x268   : > { %v1364_v37 = vpop.permute.xlu1 %1363  ;;  %v2641_v10 = vmul.f32 %v7860_v42, %v8930_v30  ;;  %v2072_v21 = vmul.f32 %v8931_v16, %v1368_v50  ;;  %5788 = vtanh.f32 %v2172_v20 }
 0x269   : > { %5388 = vmatpush3.bf16.xpose.msk.msra.mxu1 %vm7429_vm7, %v5386_v43  ;;  %3313 = vbcast.lane.b32.xlu0 %v8926_v46, 264  ;;  %v2071_v58 = vmul.f32 %v8932_v24, %v1364_v37  ;;  %5790 = vtanh.f32 %v2159_v61  ;;  %v8934_v37 = vld [vmem:[#allocation139_spill] sm:$0xff] }
 0x26a   : > { %3309 = vbcast.lane.b32.xlu1 %v8926_v46, 256  ;;  %v7870_v26 = vpop.eup %5776  ;;  %v2706_v46 = vsel %vm2677_vm6, %v2641_v10, %v8930_v30  ;;  %v2143_v29 = vadd.f32 %v7341_v13, %v2072_v21  ;;  %v2120_v39 = vmul.f32 %v8934_v37, %v1632_v22  ;;  %5792 = vtanh.f32 %v2158_v59  ;;  %v8935_v10 = vld [vmem:[#allocation141_spill] sm:$0xff]  ;;  %v8938_v37 = vld [vmem:[#allocation143_spill] sm:$0xff] }
 0x26b   : > { %v1544_v14 = vpop.permute.xlu0 %1543  ;;  %v2142_v30 = vadd.f32 %v7341_v13, %v2071_v58 }
 0x26c   : > { %v1628_v17 = vpop.permute.xlu1 %1627  ;;  %v7878_v63 = vpop.eup %5778  ;;  %5794 = vtanh.f32 %v2143_v29 }
 0x26d   : > { %3236 = vbcast.lane.b32.xlu0 %v8929_v6, 264  ;;  %5796 = vtanh.f32 %v2142_v30 }
 0x26e   : > { %3232 = vbcast.lane.b32.xlu1 %v8929_v6, 256  ;;  %v7884_v31 = vpop.eup %5780 }
 0x26f   : > { %v2425_v43 = vpop.permute.xlu0 %2424  ;;  %v7895_v21 = vpop.eup %5782 }
 0x270   : > { %v1540_v0 = vpop.permute.xlu1 %1539  ;;  %v2642_v55 = vmul.f32 %v7870_v26, %v2425_v43  ;;  %v7900_v24 = vpop.eup %5784 }
 0x271   : > { %3148 = vbcast.lane.b32.xlu0 %v8933_v33, 264  ;;  %v7912_v29 = vpop.eup %5786 }
 0x272   : > { %v2707_v50 = vsel %vm2677_vm6, %v2642_v55, %v2425_v43  ;;  %3144 = vbcast.lane.b32.xlu1 %v8933_v33, 256  ;;  %v2119_v43 = vmul.f32 %v8935_v10, %v1628_v17  ;;  %v8936_v55 = vld [vmem:[#allocation28_spill] sm:$0xff]  ;;  %v5806_v17 = vld [vmem:[%s8481_s5] ss:$0 sm:$0xff] }
 0x273   : > { %v5341_v49 = vpack.c.bf16 %v2707_v50, %v2706_v46  ;;  %v2337_v20 = vpop.permute.xlu0 %2336  ;;  %v2191_v33 = vadd.f32 %v5806_v17, %v2120_v39  ;;  %v8937_v46 = vld [vmem:[#allocation142_spill] sm:$0xff] }
 0x274   : > { %v2333_v62 = vpop.permute.xlu1 %2332  ;;  %v2626_v6 = vmul.f32 %v7878_v63, %v2337_v20  ;;  %v2104_v50 = vmul.f32 %v8937_v46, %v1544_v14  ;;  %v7917_v14 = vpop.eup %5788  ;;  %v8940_v46 = vld [vmem:[#allocation30_spill] sm:$0xff] }
 0x275   : > { %v2625_v16 = vmul.f32 %v7884_v31, %v2333_v62  ;;  %3412 = vbcast.lane.b32.xlu0 %v8936_v55, 264  ;;  %5343 = vmatprep.subr.msk.bf16.mxu0 %vm7429_vm7, %v5341_v49  ;;  %5798 = vtanh.f32 %v2191_v33 }
 0x276   : > { %v2691_v61 = vsel %vm2677_vm6, %v2626_v6, %v2337_v20  ;;  %3408 = vbcast.lane.b32.xlu1 %v8936_v55, 256  ;;  %v2103_v6 = vmul.f32 %v8938_v37, %v1540_v0  ;;  %v2175_v0 = vadd.f32 %v5806_v17, %v2104_v50 }
 0x277   : > { %v2690_v22 = vsel %vm2677_vm6, %v2625_v16, %v2333_v62  ;;  %v2601_v13 = vpop.permute.xlu0 %2600  ;;  %v2190_v62 = vadd.f32 %v5806_v17, %v2119_v43  ;;  %v8939_v16 = vld [vmem:[#allocation29_spill] sm:$0xff] }
 0x278   : > { %v5344_v59 = vpack.c.bf16 %v2691_v61, %v2690_v22  ;;  %v2597_v58 = vpop.permute.xlu1 %2596  ;;  %v2674_v49 = vmul.f32 %v7895_v21, %v2601_v13 }
 0x279   : > { %v2673_v20 = vmul.f32 %v7900_v24, %v2597_v58  ;;  %3324 = vbcast.lane.b32.xlu0 %v8939_v16, 264  ;;  %5800 = vtanh.f32 %v2190_v62 }
 0x27a   : > { %5346 = vmatpush3.bf16.xpose.msk.msra.mxu0 %vm7429_vm7, %v5344_v59  ;;  %v2739_v10 = vsel %vm2677_vm6, %v2674_v49, %v2601_v13  ;;  %3320 = vbcast.lane.b32.xlu1 %v8939_v16, 256  ;;  %v2174_v59 = vadd.f32 %v5806_v17, %v2103_v6  ;;  %v7924_v13 = vpop.eup %5790  ;;  %5802 = vtanh.f32 %v2175_v0  ;;  %v8941_v16 = vld [vmem:[#allocation31_spill] sm:$0xff] }
 0x27b   : > { %v2738_v39 = vsel %vm2677_vm6, %v2673_v20, %v2597_v58  ;;  %v2513_v30 = vpop.permute.xlu0 %2512  ;;  %v7929_v33 = vpop.eup %5792 }
 0x27c   : > { %v5389_v55 = vpack.c.bf16 %v2739_v10, %v2738_v39  ;;  %v2509_v43 = vpop.permute.xlu1 %2508  ;;  %v2658_v61 = vmul.f32 %v7912_v29, %v2513_v30  ;;  %v7933_v6 = vpop.eup %5794  ;;  %5804 = vtanh.f32 %v2174_v59  ;;  %v8943_v59 = vld [vmem:[#allocation32_spill] sm:$0xff] }
 0x27d   : > { %v2657_v22 = vmul.f32 %v7917_v14, %v2509_v43  ;;  %3247 = vbcast.lane.b32.xlu0 %v8940_v46, 264 }
 0x27e   : > { %5391 = vmatprep.subr.msk.bf16.mxu1 %vm7429_vm7, %v5389_v55  ;;  %v2723_v58 = vsel %vm2677_vm6, %v2658_v61, %v2513_v30  ;;  %3243 = vbcast.lane.b32.xlu1 %v8940_v46, 256  ;;  %v7941_v55 = vpop.eup %5796 }
 0x27f   : > { %v2722_v49 = vsel %vm2677_vm6, %v2657_v22, %v2509_v43  ;;  %v2436_v20 = vpop.permute.xlu0 %2435  ;;  %8942 = vst [vmem:[#allocation86_spill] sm:$0xff] %v7941_v55  ;;  %v7948_v46 = vpop.eup %5798 }
 0x280   : > { %v5392_v50 = vpack.c.bf16 %v2723_v58, %v2722_v49  ;;  %v2432_v37 = vpop.permute.xlu1 %2431  ;;  %v2644_v17 = vmul.f32 %v7924_v13, %v2436_v20 }
 0x281   : > { %v2643_v62 = vmul.f32 %v7929_v33, %v2432_v37  ;;  %3159 = vbcast.lane.b32.xlu0 %v8941_v16, 264 }
 0x282   : > { %5394 = vmatpush3.bf16.xpose.msk.msra.mxu1 %vm7429_vm7, %v5392_v50  ;;  %v2709_v10 = vsel %vm2677_vm6, %v2644_v17, %v2436_v20  ;;  %3155 = vbcast.lane.b32.xlu1 %v8941_v16, 256 }
 0x283   : > { %v2708_v39 = vsel %vm2677_vm6, %v2643_v62, %v2432_v37  ;;  %v2348_v43 = vpop.permute.xlu0 %2347  ;;  %v7953_v50 = vpop.eup %5800 }
 0x284   : > { %v5347_v30 = vpack.c.bf16 %v2709_v10, %v2708_v39  ;;  %v2344_v0 = vpop.permute.xlu1 %2343  ;;  %v2628_v61 = vmul.f32 %v7933_v6, %v2348_v43  ;;  %8944 = vst [vmem:[#allocation11_spill] sm:$0xff] %v7953_v50  ;;  %v8945_v10 = vld [vmem:[#allocation33_spill] sm:$0xff]  ;;  %v7960_v39 = vpop.eup %5802 }
 0x285   : > { %v2627_v22 = vmul.f32 %v7941_v55, %v2344_v0  ;;  %3423 = vbcast.lane.b32.xlu0 %v8943_v59, 264 }
 0x286   : > { %5349 = vmatprep.subr.msk.bf16.mxu0 %vm7429_vm7, %v5347_v30  ;;  %v2693_v58 = vsel %vm2677_vm6, %v2628_v61, %v2348_v43  ;;  %3419 = vbcast.lane.b32.xlu1 %v8943_v59, 256 }
 0x287   : > { %v2692_v49 = vsel %vm2677_vm6, %v2627_v22, %v2344_v0  ;;  %v2612_v37 = vpop.permute.xlu0 %2611  ;;  %v7965_v0 = vpop.eup %5804 }
 0x288   : > { %v5350_v20 = vpack.c.bf16 %v2693_v58, %v2692_v49  ;;  %v2608_v17 = vpop.permute.xlu1 %2607  ;;  %v2676_v62 = vmul.f32 %v7948_v46, %v2612_v37 }
 0x289   : > { %v2675_v16 = vmul.f32 %v7953_v50, %v2608_v17  ;;  %3335 = vbcast.lane.b32.xlu0 %v8945_v10, 264  ;;  %v8946_v50 = vld [vmem:[#allocation34_spill] sm:$0xff] }
 0x28a   : > { %5352 = vmatpush3.bf16.xpose.msk.msra.mxu0 %vm7429_vm7, %v5350_v20  ;;  %v2741_v30 = vsel %vm2677_vm6, %v2676_v62, %v2612_v37  ;;  %3331 = vbcast.lane.b32.xlu1 %v8945_v10, 256 }
 0x28b   : > { %v2740_v43 = vsel %vm2677_vm6, %v2675_v16, %v2608_v17  ;;  %v2524_v22 = vpop.permute.xlu0 %2523 }
 0x28c   : > { %v5395_v61 = vpack.c.bf16 %v2741_v30, %v2740_v43  ;;  %v2520_v59 = vpop.permute.xlu1 %2519  ;;  %v2660_v58 = vmul.f32 %v7960_v39, %v2524_v22  ;;  %v7980_v43 = vld [vmem:[%s8482_s6] sm:$0xf] }
 0x28d   : > { %v2659_v49 = vmul.f32 %v7965_v0, %v2520_v59  ;;  %3258 = vbcast.lane.b32.xlu0 %v8946_v50, 264 }
 0x28e   : > { %5397 = vmatprep.subr.msk.bf16.mxu1 %vm7429_vm7, %v5395_v61  ;;  %v2725_v20 = vsel %vm2677_vm6, %v2660_v58, %v2524_v22  ;;  %3254 = vbcast.lane.b32.xlu1 %v8946_v50, 256  ;;  %v8947_v61 = vld [vmem:[#allocation35_spill] sm:$0xff] }
 0x28f   : > { %v2724_v37 = vsel %vm2677_vm6, %v2659_v49, %v2520_v59  ;;  %v3182_v62 = vpop.permute.xlu0 %3181 }
 0x290   : > { %v5398_v17 = vpack.c.bf16 %v2725_v20, %v2724_v37  ;;  %v3178_v16 = vpop.permute.xlu1 %3177  ;;  %v3453_v10 = vmul.f32 %v7379_v5, %v3182_v62 }
 0x291   : > { %v3452_v30 = vmul.f32 %v7402_v35, %v3178_v16  ;;  %5118 = vmatmul.mubr.msk.f32.vlgmr.msra.gmra.mrb[4].mxu0 %vm2742_vm4, %v7980_v43  ;;  %3170 = vbcast.lane.b32.xlu0 %v8947_v61, 264  ;;  %v8948_v35 = vld [vmem:[#allocation36_spill] sm:$0xff] }
 0x292   : > { %5400 = vmatpush3.bf16.xpose.msk.msra.mxu1 %vm7429_vm7, %v5398_v17  ;;  %v3517_v50 = vsel %vm2677_vm6, %v3453_v10, %v3182_v62  ;;  %3166 = vbcast.lane.b32.xlu1 %v8947_v61, 256 }
 0x293   : > { %v3516_v22 = vsel %vm2677_vm6, %v3452_v30, %v3178_v16  ;;  %5185 = vmatprep.mubr.msk.f32.mxu0 %vm2742_vm4, %v7980_v43  ;;  %v3094_v58 = vpop.permute.xlu0 %3093  ;;  %v8949_v30 = vld [vmem:[#allocation84_spill] sm:$0xff] }
 0x294   : > { %v5401_v59 = vpack.c.bf16 %v3517_v50, %v3516_v22  ;;  %v3090_v49 = vpop.permute.xlu1 %3089  ;;  %v3437_v20 = vmul.f32 %v7375_v40, %v3094_v58 }
 0x295   : > { %v3436_v37 = vmul.f32 %v7371_v41, %v3090_v49  ;;  %3434 = vbcast.lane.b32.xlu0 %v8948_v35, 264  ;;  %v8950_v41 = vld [vmem:[#allocation37_spill] sm:$0xff] }
 0x296   : > { %5403 = vmatprep.subr.msk.bf16.mxu0 %vm7429_vm7, %v5401_v59  ;;  %v3501_v17 = vsel %vm2677_vm6, %v3437_v20, %v3094_v58  ;;  %3430 = vbcast.lane.b32.xlu1 %v8948_v35, 256 }
 0x297   : > { %v3500_v62 = vsel %vm2677_vm6, %v3436_v37, %v3090_v49  ;;  %v3358_v10 = vpop.permute.xlu0 %3357  ;;  %v8951_v49 = vld [vmem:[#allocation4_spill] sm:$0xff] }
 0x298   : > { %v5404_v16 = vpack.c.bf16 %v3501_v17, %v3500_v62  ;;  %v3485_v61 = vmul.f32 %v8949_v30, %v3358_v10  ;;  %v3354_v50 = vpop.permute.xlu1 %3353  ;;  %v3993_v20 = vrot.slane %v8951_v49, %v6163_v25 }
 0x299   : > { %5152 = vmatmul.mubr.msk.f32.vlgmr.msra.gmra.mrb[4].mxu1 %vm2742_vm4, %v7980_v43  ;;  %v3484_v22 = vmul.f32 %v7433_v34, %v3354_v50  ;;  %3346 = vbcast.lane.b32.xlu0 %v8950_v41, 264 }
 0x29a   : > { %5406 = vmatpush3.bf16.xpose.msk.msra.mxu0 %vm7429_vm7, %v5404_v16  ;;  %v3549_v59 = vsel %vm2677_vm6, %v3485_v61, %v3358_v10  ;;  %3342 = vbcast.lane.b32.xlu1 %v8950_v41, 256  ;;  %v8952_v61 = vld [vmem:[#allocation3_spill] sm:$0xff] }
 0x29b   : > { %5219 = vmatprep.mubr.msk.f32.mxu1 %vm2742_vm4, %v7980_v43  ;;  %v3548_v35 = vsel %vm2677_vm6, %v3484_v22, %v3354_v50  ;;  %v3270_v58 = vpop.permute.xlu0 %3269  ;;  %v3905_v50 = vrot.slane %v8952_v61, %v6163_v25 }
 0x29c   : > { %v5449_v37 = vpack.c.bf16 %v3549_v59, %v3548_v35  ;;  %v3469_v17 = vmul.f32 %v7419_v18, %v3270_v58  ;;  %v3266_v62 = vpop.permute.xlu1 %3265 }
 0x29d   : > { %v3468_v34 = vmul.f32 %v7460_v52, %v3266_v62  ;;  %3999 = vbcast.lane.b32.xlu0 %v3993_v20, 264 }
 0x29e   : > { %v3533_v16 = vsel %vm2677_vm6, %v3469_v17, %v3270_v58  ;;  %3995 = vbcast.lane.b32.xlu1 %v3993_v20, 256  ;;  %5451 = vmatprep.subr.msk.bf16.mxu1 %vm7429_vm7, %v5449_v37  ;;  %v8953_v20 = vld [vmem:[#allocation10_spill] sm:$0xff] }
 0x29f   : > { %v3532_v41 = vsel %vm2677_vm6, %v3468_v34, %v3266_v62  ;;  %v3193_v10 = vpop.permute.xlu0 %3192  ;;  %v4169_v37 = vrot.slane %v8953_v20, %v6163_v25 }
 0x2a0   : > { %v5452_v22 = vpack.c.bf16 %v3533_v16, %v3532_v41  ;;  %v3455_v59 = vmul.f32 %v7452_v12, %v3193_v10  ;;  %v3189_v35 = vpop.permute.xlu1 %3188 }
 0x2a1   : > { %v3454_v49 = vmul.f32 %v7486_v19, %v3189_v35  ;;  %3911 = vbcast.lane.b32.xlu0 %v3905_v50, 264 }
 0x2a2   : > { %v3519_v52 = vsel %vm2677_vm6, %v3455_v59, %v3193_v10  ;;  %3907 = vbcast.lane.b32.xlu1 %v3905_v50, 256  ;;  %5454 = vmatpush3.bf16.xpose.msk.msra.mxu1 %vm7429_vm7, %v5452_v22  ;;  %v8954_v22 = vld [vmem:[#allocation9_spill] sm:$0xff] }
 0x2a3   : > { %v3518_v58 = vsel %vm2677_vm6, %v3454_v49, %v3189_v35  ;;  %v3105_v34 = vpop.permute.xlu0 %3104  ;;  %v4081_v59 = vrot.slane %v8954_v22, %v6163_v25 }
 0x2a4   : > { %v5407_v17 = vpack.c.bf16 %v3519_v52, %v3518_v58  ;;  %v3439_v62 = vmul.f32 %v7444_v54, %v3105_v34  ;;  %v3101_v16 = vpop.permute.xlu1 %3100 }
 0x2a5   : > { %v3438_v41 = vmul.f32 %v7438_v47, %v3101_v16  ;;  %4175 = vbcast.lane.b32.xlu0 %v4169_v37, 264 }
 0x2a6   : > { %v3503_v61 = vsel %vm2677_vm6, %v3439_v62, %v3105_v34  ;;  %4171 = vbcast.lane.b32.xlu1 %v4169_v37, 256  ;;  %5409 = vmatprep.subr.msk.bf16.mxu0 %vm7429_vm7, %v5407_v17 }
 0x2a7   : > { %v3502_v10 = vsel %vm2677_vm6, %v3438_v41, %v3101_v16  ;;  %v3369_v50 = vpop.permute.xlu0 %3368  ;;  %v8955_v16 = vld [vmem:[#allocation74_spill] sm:$0xff] }
 0x2a8   : > { %v5410_v35 = vpack.c.bf16 %v3503_v61, %v3502_v10  ;;  %v3487_v52 = vmul.f32 %v7478_v36, %v3369_v50  ;;  %v3365_v49 = vpop.permute.xlu1 %3364  ;;  %v8956_v61 = vld [vmem:[#allocation38_spill] sm:$0xff] }
 0x2a9   : > { %v3486_v58 = vmul.f32 %v7513_v32, %v3365_v49  ;;  %4087 = vbcast.lane.b32.xlu0 %v4081_v59, 264 }
 0x2aa   : > { %v3551_v20 = vsel %vm2677_vm6, %v3487_v52, %v3369_v50  ;;  %4083 = vbcast.lane.b32.xlu1 %v4081_v59, 256  ;;  %5412 = vmatpush3.bf16.xpose.msk.msra.mxu0 %vm7429_vm7, %v5410_v35  ;;  %v8957_v35 = vld [vmem:[#allocation78_spill] sm:$0xff] }
 0x2ab   : > { %v3550_v34 = vsel %vm2677_vm6, %v3486_v58, %v3365_v49  ;;  %v3281_v37 = vpop.permute.xlu0 %3280  ;;  %v8958_v58 = vld [vmem:[#allocation2_spill] sm:$0xff] }
 0x2ac   : > { %v5455_v17 = vpack.c.bf16 %v3551_v20, %v3550_v34  ;;  %v3471_v62 = vmul.f32 %v7504_v3, %v3281_v37  ;;  %v3277_v25 = vpop.permute.xlu1 %3276  ;;  %v8959_v34 = vld [vmem:[#allocation39_spill] sm:$0xff] }
 0x2ad   : > { %v3470_v41 = vmul.f32 %v8955_v16, %v3277_v25  ;;  %4010 = vbcast.lane.b32.xlu0 %v8956_v61, 264 }
 0x2ae   : > { %v3535_v10 = vsel %vm2677_vm6, %v3471_v62, %v3281_v37  ;;  %4006 = vbcast.lane.b32.xlu1 %v8956_v61, 256  ;;  %5457 = vmatprep.subr.msk.bf16.mxu1 %vm7429_vm7, %v5455_v17 }
 0x2af   : > { %v3534_v50 = vsel %vm2677_vm6, %v3470_v41, %v3277_v25  ;;  %v3204_v22 = vpop.permute.xlu0 %3203  ;;  %v8960_v25 = vld [vmem:[#allocation67_spill] sm:$0xff] }
 0x2b0   : > { %v5458_v59 = vpack.c.bf16 %v3535_v10, %v3534_v50  ;;  %v3457_v52 = vmul.f32 %v8957_v35, %v3204_v22  ;;  %v3200_v49 = vpop.permute.xlu1 %3199  ;;  %v8961_v10 = vld [vmem:[#allocation88_spill] sm:$0xff] }
 0x2b1   : > { %v3456_v20 = vmul.f32 %v8958_v58, %v3200_v49  ;;  %3922 = vbcast.lane.b32.xlu0 %v8959_v34, 264  ;;  %v8962_v35 = vld [vmem:[#allocation40_spill] sm:$0xff] }
 0x2b2   : > { %v3521_v16 = vsel %vm2677_vm6, %v3457_v52, %v3204_v22  ;;  %3918 = vbcast.lane.b32.xlu1 %v8959_v34, 256  ;;  %5460 = vmatpush3.bf16.xpose.msk.msra.mxu1 %vm7429_vm7, %v5458_v59 }
 0x2b3   : > { %v3520_v37 = vsel %vm2677_vm6, %v3456_v20, %v3200_v49  ;;  %v3116_v17 = vpop.permute.xlu0 %3115  ;;  %v8963_v49 = vld [vmem:[#allocation66_spill] sm:$0xff] }
 0x2b4   : > { %v5413_v62 = vpack.c.bf16 %v3521_v16, %v3520_v37  ;;  %v3441_v41 = vmul.f32 %v8960_v25, %v3116_v17  ;;  %v3112_v61 = vpop.permute.xlu1 %3111  ;;  %v8964_v37 = vld [vmem:[#allocation41_spill] sm:$0xff] }
 0x2b5   : > { %v3440_v50 = vmul.f32 %v8961_v10, %v3112_v61  ;;  %4186 = vbcast.lane.b32.xlu0 %v8962_v35, 264 }
 0x2b6   : > { %v3505_v58 = vsel %vm2677_vm6, %v3441_v41, %v3116_v17  ;;  %4182 = vbcast.lane.b32.xlu1 %v8962_v35, 256  ;;  %5415 = vmatprep.subr.msk.bf16.mxu0 %vm7429_vm7, %v5413_v62 }
 0x2b7   : > { %v3504_v22 = vsel %vm2677_vm6, %v3440_v50, %v3112_v61  ;;  %v3380_v59 = vpop.permute.xlu0 %3379  ;;  %v8965_v50 = vld [vmem:[#allocation42_spill] sm:$0xff] }
 0x2b8   : > { %v5416_v52 = vpack.c.bf16 %v3505_v58, %v3504_v22  ;;  %v3489_v16 = vmul.f32 %v8963_v49, %v3380_v59  ;;  %v3376_v20 = vpop.permute.xlu1 %3375 }
 0x2b9   : > { %v3488_v34 = vmul.f32 %v7593_v44, %v3376_v20  ;;  %4098 = vbcast.lane.b32.xlu0 %v8964_v37, 264 }
 0x2ba   : > { %v3553_v10 = vsel %vm2677_vm6, %v3489_v16, %v3380_v59  ;;  %4094 = vbcast.lane.b32.xlu1 %v8964_v37, 256  ;;  %5418 = vmatpush3.bf16.xpose.msk.msra.mxu0 %vm7429_vm7, %v5416_v52 }
 0x2bb   : > { %v3552_v35 = vsel %vm2677_vm6, %v3488_v34, %v3376_v20  ;;  %v3292_v17 = vpop.permute.xlu0 %3291  ;;  %v8966_v20 = vld [vmem:[#allocation80_spill] sm:$0xff] }
 0x2bc   : > { %v5461_v62 = vpack.c.bf16 %v3553_v10, %v3552_v35  ;;  %v3473_v58 = vmul.f32 %v7584_v56, %v3292_v17  ;;  %v3288_v41 = vpop.permute.xlu1 %3287  ;;  %v8967_v35 = vld [vmem:[#allocation43_spill] sm:$0xff] }
 0x2bd   : > { %v3472_v61 = vmul.f32 %v7620_v48, %v3288_v41  ;;  %4021 = vbcast.lane.b32.xlu0 %v8965_v50, 264 }
 0x2be   : > { %v3537_v22 = vsel %vm2677_vm6, %v3473_v58, %v3292_v17  ;;  %4017 = vbcast.lane.b32.xlu1 %v8965_v50, 256  ;;  %5463 = vmatprep.subr.msk.bf16.mxu1 %vm7429_vm7, %v5461_v62 }
 0x2bf   : > { %v3536_v59 = vsel %vm2677_vm6, %v3472_v61, %v3288_v41  ;;  %v3215_v52 = vpop.permute.xlu0 %3214  ;;  %v8968_v41 = vld [vmem:[#allocation75_spill] sm:$0xff] }
 0x2c0   : > { %v5464_v16 = vpack.c.bf16 %v3537_v22, %v3536_v59  ;;  %v3459_v10 = vmul.f32 %v8966_v20, %v3215_v52  ;;  %v3211_v34 = vpop.permute.xlu1 %3210  ;;  %v8969_v22 = vld [vmem:[#allocation91_spill] sm:$0xff]  ;;  %v8970_v20 = vld [vmem:[#allocation44_spill] sm:$0xff] }
 0x2c1   : > { %v3458_v37 = vmul.f32 %v7646_v60, %v3211_v34  ;;  %3933 = vbcast.lane.b32.xlu0 %v8967_v35, 264 }
 0x2c2   : > { %v3523_v48 = vsel %vm2677_vm6, %v3459_v10, %v3215_v52  ;;  %3929 = vbcast.lane.b32.xlu1 %v8967_v35, 256  ;;  %5466 = vmatpush3.bf16.xpose.msk.msra.mxu1 %vm7429_vm7, %v5464_v16  ;;  %v8971_v35 = vld [vmem:[#allocation45_spill] sm:$0xff] }
 0x2c3   : > { %v3522_v17 = vsel %vm2677_vm6, %v3458_v37, %v3211_v34  ;;  %v3127_v62 = vpop.permute.xlu0 %3126 }
 0x2c4   : > { %v5419_v58 = vpack.c.bf16 %v3523_v48, %v3522_v17  ;;  %v3443_v61 = vmul.f32 %v8968_v41, %v3127_v62  ;;  %v3123_v50 = vpop.permute.xlu1 %3122 }
 0x2c5   : > { %v3442_v59 = vmul.f32 %v8969_v22, %v3123_v50  ;;  %4197 = vbcast.lane.b32.xlu0 %v8970_v20, 264 }
 0x2c6   : > { %v3507_v60 = vsel %vm2677_vm6, %v3443_v61, %v3127_v62  ;;  %4193 = vbcast.lane.b32.xlu1 %v8970_v20, 256  ;;  %5421 = vmatprep.subr.msk.bf16.mxu0 %vm7429_vm7, %v5419_v58 }
 0x2c7   : > { %v3506_v52 = vsel %vm2677_vm6, %v3442_v59, %v3123_v50  ;;  %v3391_v16 = vpop.permute.xlu0 %3390  ;;  %v8972_v59 = vld [vmem:[#allocation46_spill] sm:$0xff] }
 0x2c8   : > { %v5422_v10 = vpack.c.bf16 %v3507_v60, %v3506_v52  ;;  %v3491_v48 = vmul.f32 %v7637_v28, %v3391_v16  ;;  %v3387_v34 = vpop.permute.xlu1 %3386 }
 0x2c9   : > { %v3490_v37 = vmul.f32 %v7673_v53, %v3387_v34  ;;  %4109 = vbcast.lane.b32.xlu0 %v8971_v35, 264 }
 0x2ca   : > { %v3555_v17 = vsel %vm2677_vm6, %v3491_v48, %v3391_v16  ;;  %4105 = vbcast.lane.b32.xlu1 %v8971_v35, 256  ;;  %5424 = vmatpush3.bf16.xpose.msk.msra.mxu0 %vm7429_vm7, %v5422_v10 }
 0x2cb   : > { %v3554_v20 = vsel %vm2677_vm6, %v3490_v37, %v3387_v34  ;;  %v3303_v62 = vpop.permute.xlu0 %3302 }
 0x2cc   : > { %v5467_v58 = vpack.c.bf16 %v3555_v17, %v3554_v20  ;;  %v3475_v60 = vmul.f32 %v7664_v2, %v3303_v62  ;;  %v3299_v61 = vpop.permute.xlu1 %3298  ;;  %v8973_v17 = vld [vmem:[#allocation47_spill] sm:$0xff] }
 0x2cd   : > { %v3474_v50 = vmul.f32 %v7700_v23, %v3299_v61  ;;  %4032 = vbcast.lane.b32.xlu0 %v8972_v59, 264 }
 0x2ce   : > { %v3539_v52 = vsel %vm2677_vm6, %v3475_v60, %v3303_v62  ;;  %4028 = vbcast.lane.b32.xlu1 %v8972_v59, 256  ;;  %5469 = vmatprep.subr.msk.bf16.mxu1 %vm7429_vm7, %v5467_v58  ;;  %v8974_v59 = vld [vmem:[#allocation82_spill] sm:$0xff] }
 0x2cf   : > { %v3538_v16 = vsel %vm2677_vm6, %v3474_v50, %v3299_v61  ;;  %v3226_v10 = vpop.permute.xlu0 %3225 }
 0x2d0   : > { %v5470_v48 = vpack.c.bf16 %v3539_v52, %v3538_v16  ;;  %v3461_v34 = vmul.f32 %v7691_v9, %v3226_v10  ;;  %v3222_v37 = vpop.permute.xlu1 %3221  ;;  %v8975_v16 = vld [vmem:[#allocation48_spill] sm:$0xff] }
 0x2d1   : > { %v3460_v35 = vmul.f32 %v7722_v11, %v3222_v37  ;;  %3944 = vbcast.lane.b32.xlu0 %v8973_v17, 264 }
 0x2d2   : > { %v3525_v20 = vsel %vm2677_vm6, %v3461_v34, %v3226_v10  ;;  %3940 = vbcast.lane.b32.xlu1 %v8973_v17, 256  ;;  %5472 = vmatpush3.bf16.xpose.msk.msra.mxu1 %vm7429_vm7, %v5470_v48 }
 0x2d3   : > { %v3524_v62 = vsel %vm2677_vm6, %v3460_v35, %v3222_v37  ;;  %v3138_v58 = vpop.permute.xlu0 %3137  ;;  %v8976_v37 = vld [vmem:[#allocation7_spill] sm:$0xff] }
 0x2d4   : > { %v5425_v60 = vpack.c.bf16 %v3525_v20, %v3524_v62  ;;  %v3445_v61 = vmul.f32 %v7676_v51, %v3138_v58  ;;  %v3134_v50 = vpop.permute.xlu1 %3133  ;;  %v8977_v62 = vld [vmem:[#allocation49_spill] sm:$0xff] }
 0x2d5   : > { %v3444_v52 = vmul.f32 %v8974_v59, %v3134_v50  ;;  %4208 = vbcast.lane.b32.xlu0 %v8975_v16, 264 }
 0x2d6   : > { %v3509_v11 = vsel %vm2677_vm6, %v3445_v61, %v3138_v58  ;;  %4204 = vbcast.lane.b32.xlu1 %v8975_v16, 256  ;;  %5427 = vmatprep.subr.msk.bf16.mxu0 %vm7429_vm7, %v5425_v60  ;;  %v8978_v16 = vld [vmem:[#allocation50_spill] sm:$0xff] }
 0x2d7   : > { %v3508_v10 = vsel %vm2677_vm6, %v3444_v52, %v3134_v50  ;;  %v3402_v48 = vpop.permute.xlu0 %3401 }
 0x2d8   : > { %v5428_v34 = vpack.c.bf16 %v3509_v11, %v3508_v10  ;;  %v3493_v35 = vmul.f32 %v8976_v37, %v3402_v48  ;;  %v3398_v17 = vpop.permute.xlu1 %3397 }
 0x2d9   : > { %v3492_v20 = vmul.f32 %v7746_v27, %v3398_v17  ;;  %4120 = vbcast.lane.b32.xlu0 %v8977_v62, 264 }
 0x2da   : > { %v3557_v59 = vsel %vm2677_vm6, %v3493_v35, %v3402_v48  ;;  %4116 = vbcast.lane.b32.xlu1 %v8977_v62, 256  ;;  %5430 = vmatpush3.bf16.xpose.msk.msra.mxu0 %vm7429_vm7, %v5428_v34 }
 0x2db   : > { %v3556_v58 = vsel %vm2677_vm6, %v3492_v20, %v3398_v17  ;;  %v3314_v60 = vpop.permute.xlu0 %3313  ;;  %v8979_v20 = vld [vmem:[#allocation68_spill] sm:$0xff] }
 0x2dc   : > { %v5473_v61 = vpack.c.bf16 %v3557_v59, %v3556_v58  ;;  %v3477_v11 = vmul.f32 %v7737_v8, %v3314_v60  ;;  %v3310_v50 = vpop.permute.xlu1 %3309  ;;  %v8980_v58 = vld [vmem:[#allocation51_spill] sm:$0xff] }
 0x2dd   : > { %v3476_v52 = vmul.f32 %v7772_v4, %v3310_v50  ;;  %4043 = vbcast.lane.b32.xlu0 %v8978_v16, 264 }
 0x2de   : > { %v3541_v10 = vsel %vm2677_vm6, %v3477_v11, %v3314_v60  ;;  %4039 = vbcast.lane.b32.xlu1 %v8978_v16, 256  ;;  %5475 = vmatprep.subr.msk.bf16.mxu1 %vm7429_vm7, %v5473_v61 }
 0x2df   : > { %v3540_v48 = vsel %vm2677_vm6, %v3476_v52, %v3310_v50  ;;  %v3237_v34 = vpop.permute.xlu0 %3236  ;;  %v8981_v50 = vld [vmem:[#allocation83_spill] sm:$0xff] }
 0x2e0   : > { %v5476_v35 = vpack.c.bf16 %v3541_v10, %v3540_v48  ;;  %v3463_v59 = vmul.f32 %v7762_v1, %v3237_v34  ;;  %v3233_v17 = vpop.permute.xlu1 %3232  ;;  %v8982_v10 = vld [vmem:[#allocation70_spill] sm:$0xff]  ;;  %v8983_v1 = vld [vmem:[#allocation52_spill] sm:$0xff] }
 0x2e1   : > { %v3462_v62 = vmul.f32 %v8979_v20, %v3233_v17  ;;  %3955 = vbcast.lane.b32.xlu0 %v8980_v58, 264 }
 0x2e2   : > { %v3527_v4 = vsel %vm2677_vm6, %v3463_v59, %v3237_v34  ;;  %3951 = vbcast.lane.b32.xlu1 %v8980_v58, 256  ;;  %5478 = vmatpush3.bf16.xpose.msk.msra.mxu1 %vm7429_vm7, %v5476_v35  ;;  %v8984_v58 = vld [vmem:[#allocation53_spill] sm:$0xff] }
 0x2e3   : > { %v3526_v60 = vsel %vm2677_vm6, %v3462_v62, %v3233_v17  ;;  %v3149_v61 = vpop.permute.xlu0 %3148 }
 0x2e4   : > { %v5431_v11 = vpack.c.bf16 %v3527_v4, %v3526_v60  ;;  %v3447_v52 = vmul.f32 %v8981_v50, %v3149_v61  ;;  %v3145_v16 = vpop.permute.xlu1 %3144 }
 0x2e5   : > { %v3446_v48 = vmul.f32 %v8982_v10, %v3145_v16  ;;  %4219 = vbcast.lane.b32.xlu0 %v8983_v1, 264 }
 0x2e6   : > { %v3511_v20 = vsel %vm2677_vm6, %v3447_v52, %v3149_v61  ;;  %4215 = vbcast.lane.b32.xlu1 %v8983_v1, 256  ;;  %5433 = vmatprep.subr.msk.bf16.mxu0 %vm7429_vm7, %v5431_v11 }
 0x2e7   : > { %v3510_v34 = vsel %vm2677_vm6, %v3446_v48, %v3145_v16  ;;  %v3413_v35 = vpop.permute.xlu0 %3412  ;;  %v8985_v48 = vld [vmem:[#allocation54_spill] sm:$0xff] }
 0x2e8   : > { %v5434_v59 = vpack.c.bf16 %v3511_v20, %v3510_v34  ;;  %v3495_v4 = vmul.f32 %v7782_v57, %v3413_v35  ;;  %v3409_v17 = vpop.permute.xlu1 %3408 }
 0x2e9   : > { %v3494_v62 = vmul.f32 %v7813_v38, %v3409_v17  ;;  %4131 = vbcast.lane.b32.xlu0 %v8984_v58, 264 }
 0x2ea   : > { %v3559_v60 = vsel %vm2677_vm6, %v3495_v4, %v3413_v35  ;;  %4127 = vbcast.lane.b32.xlu1 %v8984_v58, 256  ;;  %5436 = vmatpush3.bf16.xpose.msk.msra.mxu0 %vm7429_vm7, %v5434_v59 }
 0x2eb   : > { %v3558_v1 = vsel %vm2677_vm6, %v3494_v62, %v3409_v17  ;;  %v3325_v61 = vpop.permute.xlu0 %3324 }
 0x2ec   : > { %v5479_v11 = vpack.c.bf16 %v3559_v60, %v3558_v1  ;;  %v3479_v20 = vmul.f32 %v7804_v7, %v3325_v61  ;;  %v3321_v52 = vpop.permute.xlu1 %3320  ;;  %v8986_v60 = vld [vmem:[#allocation55_spill] sm:$0xff] }
 0x2ed   : > { %v3478_v16 = vmul.f32 %v7836_v15, %v3321_v52  ;;  %4054 = vbcast.lane.b32.xlu0 %v8985_v48, 264 }
 0x2ee   : > { %v3543_v34 = vsel %vm2677_vm6, %v3479_v20, %v3325_v61  ;;  %4050 = vbcast.lane.b32.xlu1 %v8985_v48, 256  ;;  %5481 = vmatprep.subr.msk.bf16.mxu1 %vm7429_vm7, %v5479_v11 }
 0x2ef   : > { %v3542_v35 = vsel %vm2677_vm6, %v3478_v16, %v3321_v52  ;;  %v3248_v59 = vpop.permute.xlu0 %3247 }
 0x2f0   : > { %v5482_v4 = vpack.c.bf16 %v3543_v34, %v3542_v35  ;;  %v3465_v17 = vmul.f32 %v7870_v26, %v3248_v59  ;;  %v3244_v62 = vpop.permute.xlu1 %3243  ;;  %v8987_v34 = vld [vmem:[#allocation56_spill] sm:$0xff] }
 0x2f1   : > { %v3464_v58 = vmul.f32 %v7860_v42, %v3244_v62  ;;  %3966 = vbcast.lane.b32.xlu0 %v8986_v60, 264 }
 0x2f2   : > { %v3529_v1 = vsel %vm2677_vm6, %v3465_v17, %v3248_v59  ;;  %3962 = vbcast.lane.b32.xlu1 %v8986_v60, 256  ;;  %5484 = vmatpush3.bf16.xpose.msk.msra.mxu1 %vm7429_vm7, %v5482_v4 }
 0x2f3   : > { %v3528_v61 = vsel %vm2677_vm6, %v3464_v58, %v3244_v62  ;;  %v3160_v11 = vpop.permute.xlu0 %3159 }
 0x2f4   : > { %v5437_v20 = vpack.c.bf16 %v3529_v1, %v3528_v61  ;;  %v3449_v52 = vmul.f32 %v7878_v63, %v3160_v11  ;;  %v3156_v16 = vpop.permute.xlu1 %3155  ;;  %v8988_v1 = vld [vmem:[#allocation57_spill] sm:$0xff] }
 0x2f5   : > { %v3448_v48 = vmul.f32 %v7884_v31, %v3156_v16  ;;  %4230 = vbcast.lane.b32.xlu0 %v8987_v34, 264 }
 0x2f6   : > { %v3513_v35 = vsel %vm2677_vm6, %v3449_v52, %v3160_v11  ;;  %4226 = vbcast.lane.b32.xlu1 %v8987_v34, 256  ;;  %5439 = vmatprep.subr.msk.bf16.mxu0 %vm7429_vm7, %v5437_v20 }
 0x2f7   : > { %v3512_v59 = vsel %vm2677_vm6, %v3448_v48, %v3156_v16  ;;  %v3424_v4 = vpop.permute.xlu0 %3423 }
 0x2f8   : > { %v5440_v17 = vpack.c.bf16 %v3513_v35, %v3512_v59  ;;  %v3497_v62 = vmul.f32 %v7895_v21, %v3424_v4  ;;  %v3420_v58 = vpop.permute.xlu1 %3419  ;;  %v8989_v35 = vld [vmem:[#allocation58_spill] sm:$0xff] }
 0x2f9   : > { %v3496_v60 = vmul.f32 %v7900_v24, %v3420_v58  ;;  %4142 = vbcast.lane.b32.xlu0 %v8988_v1, 264 }
 0x2fa   : > { %v3561_v61 = vsel %vm2677_vm6, %v3497_v62, %v3424_v4  ;;  %4138 = vbcast.lane.b32.xlu1 %v8988_v1, 256  ;;  %5442 = vmatpush3.bf16.xpose.msk.msra.mxu0 %vm7429_vm7, %v5440_v17 }
 0x2fb   : > { %v3560_v11 = vsel %vm2677_vm6, %v3496_v60, %v3420_v58  ;;  %v3336_v20 = vpop.permute.xlu0 %3335 }
 0x2fc   : > { %v5485_v52 = vpack.c.bf16 %v3561_v61, %v3560_v11  ;;  %v3481_v16 = vmul.f32 %v7912_v29, %v3336_v20  ;;  %v3332_v48 = vpop.permute.xlu1 %3331  ;;  %v8990_v61 = vld [vmem:[#allocation59_spill] sm:$0xff] }
 0x2fd   : > { %v3480_v34 = vmul.f32 %v7917_v14, %v3332_v48  ;;  %4065 = vbcast.lane.b32.xlu0 %v8989_v35, 264 }
 0x2fe   : > { %v3545_v59 = vsel %vm2677_vm6, %v3481_v16, %v3336_v20  ;;  %4061 = vbcast.lane.b32.xlu1 %v8989_v35, 256  ;;  %5487 = vmatprep.subr.msk.bf16.mxu1 %vm7429_vm7, %v5485_v52 }
 0x2ff   : > { %v3544_v4 = vsel %vm2677_vm6, %v3480_v34, %v3332_v48  ;;  %v3259_v17 = vpop.permute.xlu0 %3258 }
 0x300   : > { %v5488_v62 = vpack.c.bf16 %v3545_v59, %v3544_v4  ;;  %v3467_v58 = vmul.f32 %v7924_v13, %v3259_v17  ;;  %v3255_v60 = vpop.permute.xlu1 %3254  ;;  %v8991_v59 = vld [vmem:[#allocation60_spill] sm:$0xff] }
 0x301   : > { %v3466_v1 = vmul.f32 %v7929_v33, %v3255_v60  ;;  %3977 = vbcast.lane.b32.xlu0 %v8990_v61, 264 }
 0x302   : > { %v3531_v11 = vsel %vm2677_vm6, %v3467_v58, %v3259_v17  ;;  %3973 = vbcast.lane.b32.xlu1 %v8990_v61, 256  ;;  %5490 = vmatpush3.bf16.xpose.msk.msra.mxu1 %vm7429_vm7, %v5488_v62  ;;  %v8992_v61 = vld [vmem:[#allocation11_spill] sm:$0xff] }
 0x303   : > { %v3530_v20 = vsel %vm2677_vm6, %v3466_v1, %v3255_v60  ;;  %v3171_v52 = vpop.permute.xlu0 %3170 }
 0x304   : > { %v5443_v16 = vpack.c.bf16 %v3531_v11, %v3530_v20  ;;  %v3451_v48 = vmul.f32 %v7933_v6, %v3171_v52  ;;  %v3167_v34 = vpop.permute.xlu1 %3166  ;;  %v8993_v20 = vld [vmem:[#allocation61_spill] sm:$0xff] }
 0x305   : > { %v3450_v35 = vmul.f32 %v7941_v55, %v3167_v34  ;;  %4241 = vbcast.lane.b32.xlu0 %v8991_v59, 264 }
 0x306   : > { %v3515_v4 = vsel %vm2677_vm6, %v3451_v48, %v3171_v52  ;;  %4237 = vbcast.lane.b32.xlu1 %v8991_v59, 256  ;;  %5445 = vmatprep.subr.msk.bf16.mxu0 %vm7429_vm7, %v5443_v16 }
 0x307   : > { %v3514_v17 = vsel %vm2677_vm6, %v3450_v35, %v3167_v34  ;;  %v3435_v62 = vpop.permute.xlu0 %3434 }
 0x308   : > { %v5446_v58 = vpack.c.bf16 %v3515_v4, %v3514_v17  ;;  %v3499_v60 = vmul.f32 %v7948_v46, %v3435_v62  ;;  %v3431_v1 = vpop.permute.xlu1 %3430  ;;  %v8994_v4 = vld [vmem:[#allocation62_spill] sm:$0xff] }
 0x309   : > { %v3498_v11 = vmul.f32 %v8992_v61, %v3431_v1  ;;  %4153 = vbcast.lane.b32.xlu0 %v8993_v20, 264 }
 0x30a   : > { %v3563_v55 = vsel %vm2677_vm6, %v3499_v60, %v3435_v62  ;;  %4149 = vbcast.lane.b32.xlu1 %v8993_v20, 256  ;;  %5448 = vmatpush3.bf16.xpose.msk.msra.mxu0 %vm7429_vm7, %v5446_v58 }
 0x30b   : > { %v3562_v52 = vsel %vm2677_vm6, %v3498_v11, %v3431_v1  ;;  %v3347_v16 = vpop.permute.xlu0 %3346  ;;  %v8995_v11 = vld [vmem:[#allocation6_spill] sm:$0xff] }
 0x30c   : > { %v5491_v48 = vpack.c.bf16 %v3563_v55, %v3562_v52  ;;  %v3483_v34 = vmul.f32 %v7960_v39, %v3347_v16  ;;  %v3343_v35 = vpop.permute.xlu1 %3342  ;;  %v8996_v52 = vld [vmem:[#allocation63_spill] sm:$0xff] }
 0x30d   : > { %v3482_v59 = vmul.f32 %v7965_v0, %v3343_v35  ;;  %4076 = vbcast.lane.b32.xlu0 %v8994_v4, 264 }
 0x30e   : > { %v3547_v17 = vsel %vm2677_vm6, %v3483_v34, %v3347_v16  ;;  %4072 = vbcast.lane.b32.xlu1 %v8994_v4, 256  ;;  %5493 = vmatprep.subr.msk.bf16.mxu1 %vm7429_vm7, %v5491_v48  ;;  %v8997_v4 = vld [vmem:[#allocation144_spill] sm:$0xff] }
 0x30f   : > { %v3546_v62 = vsel %vm2677_vm6, %v3482_v59, %v3343_v35  ;;  %v4000_v58 = vpop.permute.xlu0 %3999 }
 0x310   : > { %v5494_v60 = vpack.c.bf16 %v3547_v17, %v3546_v62  ;;  %v4271_v55 = vmul.f32 %v7379_v5, %v4000_v58  ;;  %v3996_v1 = vpop.permute.xlu1 %3995  ;;  %v8998_v62 = vld [vmem:[#allocation64_spill] sm:$0xff] }
 0x311   : > { %v4270_v20 = vmul.f32 %v8995_v11, %v3996_v1  ;;  %3988 = vbcast.lane.b32.xlu0 %v8996_v52, 264  ;;  %5186 = vmatmul.mubr.msk.f32.vlgmr.msra.gmra.mrb[6].mxu0 %vm2742_vm4, %v7980_v43 }
 0x312   : > { %v4335_v16 = vsel %vm2677_vm6, %v4271_v55, %v4000_v58  ;;  %3984 = vbcast.lane.b32.xlu1 %v8996_v52, 256  ;;  %5496 = vmatpush3.bf16.xpose.msk.msra.mxu1 %vm7429_vm7, %v5494_v60 }
 0x313   : > { %v4334_v48 = vsel %vm2677_vm6, %v4270_v20, %v3996_v1  ;;  %v3912_v34 = vpop.permute.xlu0 %3911  ;;  %5253 = vmatprep.mubr.msk.f32.mxu0 %vm2742_vm4, %v7980_v43 }
 0x314   : > { %v5497_v5 = vpack.c.bf16 %v4335_v16, %v4334_v48  ;;  %v4255_v35 = vmul.f32 %v7375_v40, %v3912_v34  ;;  %v3908_v59 = vpop.permute.xlu1 %3907  ;;  %v8999_v40 = vld [vmem:[#allocation79_spill] sm:$0xff]  ;;  %v9000_v16 = vld [vmem:[#allocation65_spill] sm:$0xff] }
 0x315   : > { %v4254_v17 = vmul.f32 %v8997_v4, %v3908_v59  ;;  %4252 = vbcast.lane.b32.xlu0 %v8998_v62, 264  ;;  %v9001_v4 = vld [vmem:[#allocation87_spill] sm:$0xff] }
 0x316   : > { %v4319_v58 = vsel %vm2677_vm6, %v4255_v35, %v3912_v34  ;;  %4248 = vbcast.lane.b32.xlu1 %v8998_v62, 256  ;;  %5499 = vmatprep.subr.msk.bf16.mxu0 %vm7429_vm7, %v5497_v5 }
 0x317   : > { %v4318_v60 = vsel %vm2677_vm6, %v4254_v17, %v3908_v59  ;;  %v4176_v55 = vpop.permute.xlu0 %4175 }
 0x318   : > { %v5500_v1 = vpack.c.bf16 %v4319_v58, %v4318_v60  ;;  %v4303_v11 = vmul.f32 %v8949_v30, %v4176_v55  ;;  %v4172_v20 = vpop.permute.xlu1 %4171 }
 0x319   : > { %v4302_v52 = vmul.f32 %v8999_v40, %v4172_v20  ;;  %5220 = vmatmul.mubr.msk.f32.vlgmr.msra.gmra.mrb[6].mxu1 %vm2742_vm4, %v7980_v43  ;;  %4164 = vbcast.lane.b32.xlu0 %v9000_v16, 264 }
 0x31a   : > { %v4367_v48 = vsel %vm2677_vm6, %v4303_v11, %v4176_v55  ;;  %4160 = vbcast.lane.b32.xlu1 %v9000_v16, 256  ;;  %5502 = vmatpush3.bf16.xpose.msk.msra.mxu0 %vm7429_vm7, %v5500_v1 }
 0x31b   : > { %v4366_v34 = vsel %vm2677_vm6, %v4302_v52, %v4172_v20  ;;  %v4088_v5 = vpop.permute.xlu0 %4087  ;;  %5287 = vmatprep.mubr.msk.f32.mxu1 %vm2742_vm4, %v7980_v43 }
 0x31c   : > { %v5545_v30 = vpack.c.bf16 %v4367_v48, %v4366_v34  ;;  %v4287_v35 = vmul.f32 %v7419_v18, %v4088_v5  ;;  %v4084_v59 = vpop.permute.xlu1 %4083 }
 0x31d   : > { %v4286_v17 = vmul.f32 %v9001_v4, %v4084_v59 }
 0x31e   : > { %v4351_v62 = vsel %vm2677_vm6, %v4287_v35, %v4088_v5  ;;  %5547 = vmatprep.subr.msk.bf16.mxu1 %vm7429_vm7, %v5545_v30 }
 0x31f   : > { %v4350_v58 = vsel %vm2677_vm6, %v4286_v17, %v4084_v59  ;;  %v4011_v60 = vpop.permute.xlu0 %4010 }
 0x320   : > { %v5548_v55 = vpack.c.bf16 %v4351_v62, %v4350_v58  ;;  %v4273_v1 = vmul.f32 %v7452_v12, %v4011_v60  ;;  %v4007_v11 = vpop.permute.xlu1 %4006 }
 0x321   : > { %v4272_v43 = vmul.f32 %v7486_v19, %v4007_v11 }
 0x322   : > { %v4337_v20 = vsel %vm2677_vm6, %v4273_v1, %v4011_v60  ;;  %5550 = vmatpush3.bf16.xpose.msk.msra.mxu1 %vm7429_vm7, %v5548_v55  ;;  %v9002_v55 = vld [vmem:[#allocation74_spill] sm:$0xff] }
 0x323   : > { %v4336_v18 = vsel %vm2677_vm6, %v4272_v43, %v4007_v11  ;;  %v3923_v40 = vpop.permute.xlu0 %3922 }
 0x324   : > { %v5503_v52 = vpack.c.bf16 %v4337_v20, %v4336_v18  ;;  %v4257_v16 = vmul.f32 %v7444_v54, %v3923_v40  ;;  %v3919_v48 = vpop.permute.xlu1 %3918  ;;  %v9003_v20 = vld [vmem:[#allocation78_spill] sm:$0xff] }
 0x325   : > { %v4256_v34 = vmul.f32 %v7438_v47, %v3919_v48 }
 0x326   : > { %v4321_v5 = vsel %vm2677_vm6, %v4257_v16, %v3923_v40  ;;  %5505 = vmatprep.subr.msk.bf16.mxu0 %vm7429_vm7, %v5503_v52  ;;  %v9004_v52 = vld [vmem:[#allocation2_spill] sm:$0xff] }
 0x327   : > { %v4320_v12 = vsel %vm2677_vm6, %v4256_v34, %v3919_v48  ;;  %v4187_v19 = vpop.permute.xlu0 %4186 }
 0x328   : > { %v5506_v30 = vpack.c.bf16 %v4321_v5, %v4320_v12  ;;  %v4305_v35 = vmul.f32 %v7478_v36, %v4187_v19  ;;  %v4183_v59 = vpop.permute.xlu1 %4182 }
 0x329   : > { %v4304_v4 = vmul.f32 %v7513_v32, %v4183_v59 }
 0x32a   : > { %v4369_v17 = vsel %vm2677_vm6, %v4305_v35, %v4187_v19  ;;  %5508 = vmatpush3.bf16.xpose.msk.msra.mxu0 %vm7429_vm7, %v5506_v30  ;;  %v9005_v30 = vld [vmem:[#allocation88_spill] sm:$0xff] }
 0x32b   : > { %v4368_v54 = vsel %vm2677_vm6, %v4304_v4, %v4183_v59  ;;  %v4099_v47 = vpop.permute.xlu0 %4098 }
 0x32c   : > { %v5551_v62 = vpack.c.bf16 %v4369_v17, %v4368_v54  ;;  %v4289_v58 = vmul.f32 %v7504_v3, %v4099_v47  ;;  %v4095_v60 = vpop.permute.xlu1 %4094 }
 0x32d   : > { %v4288_v1 = vmul.f32 %v9002_v55, %v4095_v60 }
 0x32e   : > { %v4353_v11 = vsel %vm2677_vm6, %v4289_v58, %v4099_v47  ;;  %5553 = vmatprep.subr.msk.bf16.mxu1 %vm7429_vm7, %v5551_v62 }
 0x32f   : > { %v4352_v36 = vsel %vm2677_vm6, %v4288_v1, %v4095_v60  ;;  %v4022_v32 = vpop.permute.xlu0 %4021 }
 0x330   : > { %v5554_v43 = vpack.c.bf16 %v4353_v11, %v4352_v36  ;;  %v4275_v18 = vmul.f32 %v9003_v20, %v4022_v32  ;;  %v4018_v40 = vpop.permute.xlu1 %4017 }
 0x331   : > { %v4274_v16 = vmul.f32 %v9004_v52, %v4018_v40 }
 0x332   : > { %v4339_v48 = vsel %vm2677_vm6, %v4275_v18, %v4022_v32  ;;  %5556 = vmatpush3.bf16.xpose.msk.msra.mxu1 %vm7429_vm7, %v5554_v43  ;;  %v9006_v32 = vld [vmem:[#allocation8_spill] sm:$0xff] }
 0x333   : > { %v4338_v3 = vsel %vm2677_vm6, %v4274_v16, %v4018_v40  ;;  %v3934_v34 = vpop.permute.xlu0 %3933  ;;  %v9007_v40 = vld [vmem:[#allocation80_spill] sm:$0xff] }
 0x334   : > { %v5509_v5 = vpack.c.bf16 %v4339_v48, %v4338_v3  ;;  %v4259_v12 = vmul.f32 %v8960_v25, %v3934_v34  ;;  %v3930_v19 = vpop.permute.xlu1 %3929  ;;  %v9008_v48 = vld [vmem:[#allocation81_spill] sm:$0xff] }
 0x335   : > { %v4258_v35 = vmul.f32 %v9005_v30, %v3930_v19 }
 0x336   : > { %v4323_v59 = vsel %vm2677_vm6, %v4259_v12, %v3934_v34  ;;  %5511 = vmatprep.subr.msk.bf16.mxu0 %vm7429_vm7, %v5509_v5 }
 0x337   : > { %v4322_v4 = vsel %vm2677_vm6, %v4258_v35, %v3930_v19  ;;  %v4198_v17 = vpop.permute.xlu0 %4197 }
 0x338   : > { %v5512_v54 = vpack.c.bf16 %v4323_v59, %v4322_v4  ;;  %v4307_v47 = vmul.f32 %v8963_v49, %v4198_v17  ;;  %v4194_v62 = vpop.permute.xlu1 %4193 }
 0x339   : > { %v4306_v58 = vmul.f32 %v7593_v44, %v4194_v62 }
 0x33a   : > { %v4371_v60 = vsel %vm2677_vm6, %v4307_v47, %v4198_v17  ;;  %5514 = vmatpush3.bf16.xpose.msk.msra.mxu0 %vm7429_vm7, %v5512_v54 }
 0x33b   : > { %v4370_v25 = vsel %vm2677_vm6, %v4306_v58, %v4194_v62  ;;  %v4110_v55 = vpop.permute.xlu0 %4109 }
 0x33c   : > { %v5557_v1 = vpack.c.bf16 %v4371_v60, %v4370_v25  ;;  %v4291_v11 = vmul.f32 %v7584_v56, %v4110_v55  ;;  %v4106_v36 = vpop.permute.xlu1 %4105 }
 0x33d   : > { %v4290_v43 = vmul.f32 %v9006_v32, %v4106_v36 }
 0x33e   : > { %v4355_v20 = vsel %vm2677_vm6, %v4291_v11, %v4110_v55  ;;  %5559 = vmatprep.subr.msk.bf16.mxu1 %vm7429_vm7, %v5557_v1 }
 0x33f   : > { %v4354_v44 = vsel %vm2677_vm6, %v4290_v43, %v4106_v36  ;;  %v4033_v49 = vpop.permute.xlu0 %4032 }
 0x340   : > { %v5560_v18 = vpack.c.bf16 %v4355_v20, %v4354_v44  ;;  %v4277_v52 = vmul.f32 %v9007_v40, %v4033_v49  ;;  %v4029_v16 = vpop.permute.xlu1 %4028  ;;  %v9009_v44 = vld [vmem:[#allocation90_spill] sm:$0xff] }
 0x341   : > { %v4276_v3 = vmul.f32 %v9008_v48, %v4029_v16  ;;  %v9010_v48 = vld [vmem:[#allocation82_spill] sm:$0xff] }
 0x342   : > { %v4341_v34 = vsel %vm2677_vm6, %v4277_v52, %v4033_v49  ;;  %5562 = vmatpush3.bf16.xpose.msk.msra.mxu1 %vm7429_vm7, %v5560_v18 }
 0x343   : > { %v4340_v56 = vsel %vm2677_vm6, %v4276_v3, %v4029_v16  ;;  %v3945_v5 = vpop.permute.xlu0 %3944 }
 0x344   : > { %v5515_v12 = vpack.c.bf16 %v4341_v34, %v4340_v56  ;;  %v4261_v19 = vmul.f32 %v8968_v41, %v3945_v5  ;;  %v3941_v30 = vpop.permute.xlu1 %3940 }
 0x345   : > { %v4260_v35 = vmul.f32 %v8969_v22, %v3941_v30 }
 0x346   : > { %v4325_v59 = vsel %vm2677_vm6, %v4261_v19, %v3945_v5  ;;  %5517 = vmatprep.subr.msk.bf16.mxu0 %vm7429_vm7, %v5515_v12 }
 0x347   : > { %v4324_v4 = vsel %vm2677_vm6, %v4260_v35, %v3941_v30  ;;  %v4209_v17 = vpop.permute.xlu0 %4208 }
 0x348   : > { %v5518_v54 = vpack.c.bf16 %v4325_v59, %v4324_v4  ;;  %v4309_v47 = vmul.f32 %v7637_v28, %v4209_v17  ;;  %v4205_v62 = vpop.permute.xlu1 %4204 }
 0x349   : > { %v4308_v58 = vmul.f32 %v7673_v53, %v4205_v62 }
 0x34a   : > { %v4373_v60 = vsel %vm2677_vm6, %v4309_v47, %v4209_v17  ;;  %5520 = vmatpush3.bf16.xpose.msk.msra.mxu0 %vm7429_vm7, %v5518_v54  ;;  %v9011_v47 = vld [vmem:[#allocation85_spill] sm:$0xff] }
 0x34b   : > { %v4372_v41 = vsel %vm2677_vm6, %v4308_v58, %v4205_v62  ;;  %v4121_v22 = vpop.permute.xlu0 %4120 }
 0x34c   : > { %v5563_v25 = vpack.c.bf16 %v4373_v60, %v4372_v41  ;;  %v4293_v55 = vmul.f32 %v7664_v2, %v4121_v22  ;;  %v4117_v1 = vpop.permute.xlu1 %4116  ;;  %v9012_v41 = vld [vmem:[#allocation89_spill] sm:$0xff] }
 0x34d   : > { %v4292_v11 = vmul.f32 %v7700_v23, %v4117_v1 }
 0x34e   : > { %v4357_v36 = vsel %vm2677_vm6, %v4293_v55, %v4121_v22  ;;  %5565 = vmatprep.subr.msk.bf16.mxu1 %vm7429_vm7, %v5563_v25  ;;  %v9013_v55 = vld [vmem:[#allocation68_spill] sm:$0xff] }
 0x34f   : > { %v4356_v28 = vsel %vm2677_vm6, %v4292_v11, %v4117_v1  ;;  %v4044_v53 = vpop.permute.xlu0 %4043 }
 0x350   : > { %v5566_v32 = vpack.c.bf16 %v4357_v36, %v4356_v28  ;;  %v4279_v43 = vmul.f32 %v7691_v9, %v4044_v53  ;;  %v4040_v20 = vpop.permute.xlu1 %4039 }
 0x351   : > { %v4278_v49 = vmul.f32 %v9009_v44, %v4040_v20 }
 0x352   : > { %v4343_v18 = vsel %vm2677_vm6, %v4279_v43, %v4044_v53  ;;  %5568 = vmatpush3.bf16.xpose.msk.msra.mxu1 %vm7429_vm7, %v5566_v32 }
 0x353   : > { %v4342_v2 = vsel %vm2677_vm6, %v4278_v49, %v4040_v20  ;;  %v3956_v23 = vpop.permute.xlu0 %3955 }
 0x354   : > { %v5521_v40 = vpack.c.bf16 %v4343_v18, %v4342_v2  ;;  %v4263_v52 = vmul.f32 %v7676_v51, %v3956_v23  ;;  %v3952_v16 = vpop.permute.xlu1 %3951 }
 0x355   : > { %v4262_v3 = vmul.f32 %v9010_v48, %v3952_v16 }
 0x356   : > { %v4327_v34 = vsel %vm2677_vm6, %v4263_v52, %v3956_v23  ;;  %5523 = vmatprep.subr.msk.bf16.mxu0 %vm7429_vm7, %v5521_v40 }
 0x357   : > { %v4326_v9 = vsel %vm2677_vm6, %v4262_v3, %v3952_v16  ;;  %v4220_v56 = vpop.permute.xlu0 %4219 }
 0x358   : > { %v5524_v5 = vpack.c.bf16 %v4327_v34, %v4326_v9  ;;  %v4311_v12 = vmul.f32 %v8976_v37, %v4220_v56  ;;  %v4216_v19 = vpop.permute.xlu1 %4215 }
 0x359   : > { %v4310_v30 = vmul.f32 %v7746_v27, %v4216_v19 }
 0x35a   : > { %v4375_v35 = vsel %vm2677_vm6, %v4311_v12, %v4220_v56  ;;  %5526 = vmatpush3.bf16.xpose.msk.msra.mxu0 %vm7429_vm7, %v5524_v5 }
 0x35b   : > { %v4374_v51 = vsel %vm2677_vm6, %v4310_v30, %v4216_v19  ;;  %v4132_v59 = vpop.permute.xlu0 %4131 }
 0x35c   : > { %v5569_v4 = vpack.c.bf16 %v4375_v35, %v4374_v51  ;;  %v4295_v17 = vmul.f32 %v7737_v8, %v4132_v59  ;;  %v4128_v54 = vpop.permute.xlu1 %4127 }
 0x35d   : > { %v4294_v62 = vmul.f32 %v9011_v47, %v4128_v54 }
 0x35e   : > { %v4359_v58 = vsel %vm2677_vm6, %v4295_v17, %v4132_v59  ;;  %5571 = vmatprep.subr.msk.bf16.mxu1 %vm7429_vm7, %v5569_v4 }
 0x35f   : > { %v4358_v27 = vsel %vm2677_vm6, %v4294_v62, %v4128_v54  ;;  %v4055_v37 = vpop.permute.xlu0 %4054 }
 0x360   : > { %v5572_v60 = vpack.c.bf16 %v4359_v58, %v4358_v27  ;;  %v4281_v22 = vmul.f32 %v9012_v41, %v4055_v37  ;;  %v4051_v25 = vpop.permute.xlu1 %4050 }
 0x361   : > { %v4280_v1 = vmul.f32 %v9013_v55, %v4051_v25 }
 0x362   : > { %v4345_v11 = vsel %vm2677_vm6, %v4281_v22, %v4055_v37  ;;  %5574 = vmatpush3.bf16.xpose.msk.msra.mxu1 %vm7429_vm7, %v5572_v60 }
 0x363   : > { %v4344_v8 = vsel %vm2677_vm6, %v4280_v1, %v4051_v25  ;;  %v3967_v36 = vpop.permute.xlu0 %3966 }
 0x364   : > { %v8384_v28 = vpop.f32.mrb[4].mxu0  ;;  %v5527_v53 = vpack.c.bf16 %v4345_v11, %v4344_v8  ;;  %v4265_v32 = vmul.f32 %v8981_v50, %v3967_v36  ;;  %v3963_v43 = vpop.permute.xlu1 %3962 }
 0x365   : > { %v8387_v20 = vpop.f32.mrb[5].mxu0  ;;  %v4264_v44 = vmul.f32 %v8982_v10, %v3963_v43 }
 0x366   : > { %v4329_v49 = vsel %vm2677_vm6, %v4265_v32, %v3967_v36  ;;  %5529 = vmatprep.subr.msk.bf16.mxu0 %vm7429_vm7, %v5527_v53 }
 0x367   : > { %v4328_v18 = vsel %vm2677_vm6, %v4264_v44, %v3963_v43  ;;  %v4231_v2 = vpop.permute.xlu0 %4230 }
 0x368   : > { %v5530_v23 = vpack.c.bf16 %v4329_v49, %v4328_v18  ;;  %v4313_v40 = vmul.f32 %v7782_v57, %v4231_v2  ;;  %v4227_v52 = vpop.permute.xlu1 %4226 }
 0x369   : > { %v4312_v16 = vmul.f32 %v7813_v38, %v4227_v52 }
 0x36a   : > { %v4377_v50 = vsel %vm2677_vm6, %v4313_v40, %v4231_v2  ;;  %5532 = vmatpush3.bf16.xpose.msk.msra.mxu0 %vm7429_vm7, %v5530_v23  ;;  %v9014_v23 = vld [vmem:[#allocation86_spill] sm:$0xff] }
 0x36b   : > { %v4376_v10 = vsel %vm2677_vm6, %v4312_v16, %v4227_v52  ;;  %v4143_v48 = vpop.permute.xlu0 %4142 }
 0x36c   : > { %v8400_v3 = vpop.f32.mrb[4].mxu1  ;;  %v5575_v34 = vpack.c.bf16 %v4377_v50, %v4376_v10  ;;  %v4297_v9 = vmul.f32 %v7804_v7, %v4143_v48  ;;  %v4139_v56 = vpop.permute.xlu1 %4138 }
 0x36d   : > { %v8403_v5 = vpop.f32.mrb[5].mxu1  ;;  %v4296_v57 = vmul.f32 %v7836_v15, %v4139_v56 }
 0x36e   : > { %v4361_v38 = vsel %vm2677_vm6, %v4297_v9, %v4143_v48  ;;  %5577 = vmatprep.subr.msk.bf16.mxu1 %vm7429_vm7, %v5575_v34 }
 0x36f   : > { %v4360_v12 = vsel %vm2677_vm6, %v4296_v57, %v4139_v56  ;;  %v4066_v19 = vpop.permute.xlu0 %4065 }
 0x370   : > { %v5578_v30 = vpack.c.bf16 %v4361_v38, %v4360_v12  ;;  %v4283_v35 = vmul.f32 %v7870_v26, %v4066_v19  ;;  %v4062_v51 = vpop.permute.xlu1 %4061 }
 0x371   : > { %v4282_v59 = vmul.f32 %v7860_v42, %v4062_v51 }
 0x372   : > { %v4347_v7 = vsel %vm2677_vm6, %v4283_v35, %v4066_v19  ;;  %5580 = vmatpush3.bf16.xpose.msk.msra.mxu1 %vm7429_vm7, %v5578_v30  ;;  %v5808_v30 = vld [vmem:[%s8482_s6] sm:$0xf] }
 0x373   : > { %v4346_v15 = vsel %vm2677_vm6, %v4282_v59, %v4062_v51  ;;  %v3978_v4 = vpop.permute.xlu0 %3977 }
 0x374   : > { %v5533_v17 = vpack.c.bf16 %v4347_v7, %v4346_v15  ;;  %v4267_v54 = vmul.f32 %v7878_v63, %v3978_v4  ;;  %v3974_v47 = vpop.permute.xlu1 %3973 }
 0x375   : > { %v4266_v62 = vmul.f32 %v7884_v31, %v3974_v47 }
 0x376   : > { %v4331_v58 = vsel %vm2677_vm6, %v4267_v54, %v3978_v4  ;;  %5535 = vmatprep.subr.msk.bf16.mxu0 %vm7429_vm7, %v5533_v17 }
 0x377   : > { %v4330_v42 = vsel %vm2677_vm6, %v4266_v62, %v3974_v47  ;;  %v4242_v26 = vpop.permute.xlu0 %4241 }
 0x378   : > { %v5536_v27 = vpack.c.bf16 %v4331_v58, %v4330_v42  ;;  %v4315_v37 = vmul.f32 %v7895_v21, %v4242_v26  ;;  %v4238_v60 = vpop.permute.xlu1 %4237 }
 0x379   : > { %v4314_v41 = vmul.f32 %v7900_v24, %v4238_v60 }
 0x37a   : > { %v4379_v22 = vsel %vm2677_vm6, %v4315_v37, %v4242_v26  ;;  %5538 = vmatpush3.bf16.xpose.msk.msra.mxu0 %vm7429_vm7, %v5536_v27 }
 0x37b   : > { %v4378_v63 = vsel %vm2677_vm6, %v4314_v41, %v4238_v60  ;;  %v4154_v31 = vpop.permute.xlu0 %4153 }
 0x37c   : > { %v5581_v25 = vpack.c.bf16 %v4379_v22, %v4378_v63  ;;  %v4299_v55 = vmul.f32 %v7912_v29, %v4154_v31  ;;  %v4150_v1 = vpop.permute.xlu1 %4149 }
 0x37d   : > { %v4298_v11 = vmul.f32 %v7917_v14, %v4150_v1 }
 0x37e   : > { %v4363_v8 = vsel %vm2677_vm6, %v4299_v55, %v4154_v31  ;;  %5583 = vmatprep.subr.msk.bf16.mxu1 %vm7429_vm7, %v5581_v25 }
 0x37f   : > { %v4362_v21 = vsel %vm2677_vm6, %v4298_v11, %v4150_v1  ;;  %v4077_v24 = vpop.permute.xlu0 %4076 }
 0x380   : > { %v5584_v36 = vpack.c.bf16 %v4363_v8, %v4362_v21  ;;  %v4285_v53 = vmul.f32 %v7924_v13, %v4077_v24  ;;  %v4073_v32 = vpop.permute.xlu1 %4072 }
 0x381   : > { %v4284_v43 = vmul.f32 %v7929_v33, %v4073_v32 }
 0x382   : > { %v4349_v44 = vsel %vm2677_vm6, %v4285_v53, %v4077_v24  ;;  %5586 = vmatpush3.bf16.xpose.msk.msra.mxu1 %vm7429_vm7, %v5584_v36 }
 0x383   : > { %v4348_v29 = vsel %vm2677_vm6, %v4284_v43, %v4073_v32  ;;  %v3989_v14 = vpop.permute.xlu0 %3988 }
 0x384   : > { %v5539_v49 = vpack.c.bf16 %v4349_v44, %v4348_v29  ;;  %v4269_v18 = vmul.f32 %v7933_v6, %v3989_v14  ;;  %v3985_v2 = vpop.permute.xlu1 %3984 }
 0x385   : > { %v4268_v40 = vmul.f32 %v9014_v23, %v3985_v2 }
 0x386   : > { %v4333_v52 = vsel %vm2677_vm6, %v4269_v18, %v3989_v14  ;;  %5541 = vmatprep.subr.msk.bf16.mxu0 %vm7429_vm7, %v5539_v49 }
 0x387   : > { %v4332_v13 = vsel %vm2677_vm6, %v4268_v40, %v3985_v2  ;;  %v4253_v33 = vpop.permute.xlu0 %4252 }
 0x388   : > { %v5542_v16 = vpack.c.bf16 %v4333_v52, %v4332_v13  ;;  %v4317_v50 = vmul.f32 %v7948_v46, %v4253_v33  ;;  %v4249_v10 = vpop.permute.xlu1 %4248 }
 0x389   : > { %v4316_v48 = vmul.f32 %v8992_v61, %v4249_v10 }
 0x38a   : > { %v4381_v34 = vsel %vm2677_vm6, %v4317_v50, %v4253_v33  ;;  %5544 = vmatpush3.bf16.xpose.msk.msra.mxu0 %vm7429_vm7, %v5542_v16 }
 0x38b   : > { %v4380_v6 = vsel %vm2677_vm6, %v4316_v48, %v4249_v10  ;;  %v4165_v9 = vpop.permute.xlu0 %4164 }
 0x38c   : > { %v5587_v56 = vpack.c.bf16 %v4381_v34, %v4380_v6  ;;  %v4301_v57 = vmul.f32 %v7960_v39, %v4165_v9  ;;  %v4161_v38 = vpop.permute.xlu1 %4160 }
 0x38d   : > { %v4300_v12 = vmul.f32 %v7965_v0, %v4161_v38 }
 0x38e   : > { %v4365_v46 = vsel %vm2677_vm6, %v4301_v57, %v4165_v9  ;;  %5589 = vmatprep.subr.msk.bf16.mxu1 %vm7429_vm7, %v5587_v56 }
 0x38f   : > { %v4364_v61 = vsel %vm2677_vm6, %v4300_v12, %v4161_v38 }
 0x390   : > { %v5590_v19 = vpack.c.bf16 %v4365_v46, %v4364_v61 }
 0x391   : > { %5254 = vmatmul.mubr.msk.f32.vlgmr.msra.gmra.mrb[8].mxu0 %vm2742_vm4, %v5808_v30 }
 0x392   : > { %5592 = vmatpush3.bf16.xpose.msk.msra.mxu1 %vm7429_vm7, %v5590_v19 }
 0x399   : > { %5288 = vmatmul.mubr.msk.f32.vlgmr.msra.gmra.mrb[8].mxu1 %vm2742_vm4, %v5808_v30 }
 0x3e4   : > { %v3726_v39 = vpop.f32.mrb[6].mxu0 }
 0x3e5   : > { %v4720_v0 = vrot.slane %v3726_v39, 4  ;;  %v3728_v35 = vpop.f32.mrb[7].mxu0 }
 0x3e6   : > { %v4721_v51 = vrot.slane %v3728_v35, 4 }
 0x3e7   : > { %v4729_v59 = vsel %vm4728_vm8, %v8384_v28, %v4720_v0 }
 0x3e8   : > { %4733 = vst [vmem:[%s335_s10] sm:$0xff] %v4729_v59  ;;  %v4730_v7 = vsel %vm4728_vm8, %v8387_v20, %v4721_v51 }
 0x3e9   : > { %4734 = vst [vmem:[%s335_s10 + $0x8] sm:$0xff] %v4730_v7 }
 0x3ec   : > { %v3893_v45 = vpop.f32.mrb[6].mxu1 }
 0x3ed   : > { %v4722_v15 = vrot.slane %v3893_v45, 4  ;;  %v3895_v4 = vpop.f32.mrb[7].mxu1 }
 0x3ee   : > { %v4723_v17 = vrot.slane %v3895_v4, 4 }
 0x3ef   : > { %v4731_v54 = vsel %vm4728_vm8, %v8400_v3, %v4722_v15 }
 0x3f0   : > { %4737 = vst [vmem:[%s335_s10 + $0x20] sm:$0xff] %v4731_v54  ;;  %v4732_v47 = vsel %vm4728_vm8, %v8403_v5, %v4723_v17 }
 0x3f1   : > { %4738 = vst [vmem:[%s335_s10 + $0x28] sm:$0xff] %v4732_v47 }
 0x464   : > { %v4544_v62 = vpop.f32.mrb[8].mxu0 }
 0x465   : > { %4735 = vst [vmem:[%s335_s10 + $0x10] sm:$0xf] %v4544_v62  ;;  %v4546_v58 = vpop.f32.mrb[9].mxu0 }
 0x466   : > { %4736 = vst [vmem:[%s335_s10 + $0x18] sm:$0xf] %v4546_v58 }
 0x46c   : > { %v4711_v42 = vpop.f32.mrb[8].mxu1 }
 0x46d   : > { %4739 = vst [vmem:[%s335_s10 + $0x30] sm:$0xf] %v4711_v42  ;;  %v4713_v28 = vpop.f32.mrb[9].mxu1 }
 0x46e   : > { %4740 = vst [vmem:[%s335_s10 + $0x38] sm:$0xf] %v4713_v28 }
 0x46f PF: > { %s17_s24 = sadd.s32 1, %s5815_s24  }
 0x470   : > { %p14_p4 = scmp.ge.s32.totalorder %s17_s24, 4  }
 0x472   :  { %16 = sbr.rel (!%p14_p4) target bundleno = 1 (0x1), region = 84 }

</bundles_post_ra>
